<compile_context>
chip_gen: v7x
topology: tpu7x:2x2x1
jax: 0.10.0
libtpu: 0.0.40
codegen_flags: <defaults>
</compile_context>

<pallas_src>
import math

import jax
import jax.numpy as jnp
from jax.experimental import pallas as pl
from jax.experimental.pallas import tpu as pltpu

# ---- small config consistent with the module's forward ----
VOCAB    = 64
SEQ      = 8
HIDDEN   = 32
N_HEADS  = 4
HEAD_DIM = HIDDEN // N_HEADS
INTER    = 4 * HIDDEN
N_LAYERS = 2
BATCH    = 2
N_GROUPS = 3          # A, B, C
LN_EPS   = 1e-12

GB  = N_GROUPS * BATCH          # group-folded batch
GBS = GB * SEQ                  # group-folded tokens

# rows of the packed per-layer small-parameter slab (L, 8, INTER)
V_BQKV, V_BO, V_LN1G, V_LN1B, V_BFF1, V_BFF2, V_LN2G, V_LN2B = range(8)


def _vmem():
    return pl.BlockSpec(memory_space=pltpu.MemorySpace.VMEM)


def _smem():
    return pl.BlockSpec(memory_space=pltpu.MemorySpace.SMEM)


def _layer_norm(x, g, b):
    mu = jnp.mean(x, axis=-1, keepdims=True)
    var = jnp.mean((x - mu) ** 2, axis=-1, keepdims=True)
    return (x - mu) * jax.lax.rsqrt(var + LN_EPS) * g + b


def _gelu(x):
    # TODO(synk): PyTorch default nn.GELU uses the exact erf form (~1e-3 difference);
    # the tanh approximation keeps the transcendental on the EUP.
    c = math.sqrt(2.0 / math.pi)
    return 0.5 * x * (1.0 + jnp.tanh(c * (x + 0.044715 * x * x * x)))


def _mm(a, b):
    # bf16 MXU operands (native on v6e/v7x, fine on v5e's MXU), f32 accumulation.
    return jnp.dot(a.astype(jnp.bfloat16), b.astype(jnp.bfloat16),
                   preferred_element_type=jnp.float32)


# ---------------- fused kernel ----------------

def _bert_layer(x, wqkv, bqkv, wo, bo, g1, be1, w1, b1, w2, b2, g2, be2):
    """One BERT layer on a resident (GB, S, H) activation (values in vregs/VMEM)."""
    x2 = x.reshape(GB * SEQ, HIDDEN)

    # fused QKV projection: one MXU push instead of three
    qkv = _mm(x2, wqkv) + bqkv                                   # (GB*S, 3H)
    scale = 1.0 / math.sqrt(HEAD_DIM)
    q = (qkv[:, 0:HIDDEN] * scale).reshape(GB, SEQ, HIDDEN)      # scale folded into Q once
    k = qkv[:, HIDDEN:2 * HIDDEN].reshape(GB, SEQ, HIDDEN)
    v = qkv[:, 2 * HIDDEN:3 * HIDDEN].reshape(GB, SEQ, HIDDEN)

    # batch all heads along the leading axis -> two batched einsums (single batch
    # dim for Mosaic) instead of a per-head Python loop of tiny matmuls.
    def to_heads(t):
        return jnp.concatenate(
            [t[:, :, h * HEAD_DIM:(h + 1) * HEAD_DIM] for h in range(N_HEADS)], axis=0)

    qh, kh, vh = to_heads(q), to_heads(k), to_heads(v)           # (NH*GB, S, HD)
    sc = jnp.einsum('bqd,bkd->bqk', qh.astype(jnp.bfloat16), kh.astype(jnp.bfloat16),
                    preferred_element_type=jnp.float32)          # (NH*GB, S, S)
    sc = sc - jnp.max(sc, axis=-1, keepdims=True)
    p = jnp.exp(sc)
    # TODO(synk): approx reciprocal (EUP slot) gives ~1e-3 rel. error vs exact softmax.
    p = p * pl.reciprocal(jnp.sum(p, axis=-1, keepdims=True), approx=True)
    ctx = jnp.einsum('bqk,bkd->bqd', p.astype(jnp.bfloat16), vh.astype(jnp.bfloat16),
                     preferred_element_type=jnp.float32)         # (NH*GB, S, HD)
    # re-interleave heads on the lane axis, then a single output projection
    ctx = jnp.concatenate([ctx[h * GB:(h + 1) * GB] for h in range(N_HEADS)], axis=-1)
    attn = _mm(ctx.reshape(GB * SEQ, HIDDEN), wo) + bo           # (GB*S, H)

    h1 = _layer_norm(x2 + attn, g1, be1)
    ff = _gelu(_mm(h1, w1) + b1)
    ff = _mm(ff, w2) + b2
    return _layer_norm(h1 + ff, g2, be2).reshape(GB, SEQ, HIDDEN)


def scm_bert_kernel(ids_ref, label_ref, tok_emb_ref, pos_emb_ref, emb_ln_ref,
                    wqkv_ref, wo_ref, w1_ref, w2_ref, vecs_ref,
                    head_w_ref, pool_b_ref, bil_b_ref,
                    s_ref, loss_ref, correct_ref):
    # ---- embedding gather as one-hot @ table (single MXU push, no XLA gather) ----
    ids = ids_ref[...]                                           # (GBS, 1) int32
    vocab_iota = jax.lax.broadcasted_iota(jnp.int32, (GBS, VOCAB), 1)
    one_hot = (vocab_iota == ids).astype(jnp.float32)            # (GBS, VOCAB)
    x2 = _mm(one_hot, tok_emb_ref[...])                          # (GBS, H)
    x = x2.reshape(GB, SEQ, HIDDEN) + pos_emb_ref[...][None, :, :]
    emb_ln = emb_ln_ref[...]
    x = _layer_norm(x, emb_ln[0:1, :], emb_ln[1:2, :])           # (GB, S, H)

    # ---- N_LAYERS fused BERT layers ----
    for l in range(N_LAYERS):
        vecs = vecs_ref[l]                                       # (8, INTER)
        x = _bert_layer(
            x,
            wqkv_ref[l], vecs[V_BQKV:V_BQKV + 1, 0:3 * HIDDEN],
            wo_ref[l],   vecs[V_BO:V_BO + 1, 0:HIDDEN],
            vecs[V_LN1G:V_LN1G + 1, 0:HIDDEN], vecs[V_LN1B:V_LN1B + 1, 0:HIDDEN],
            w1_ref[l],   vecs[V_BFF1:V_BFF1 + 1, 0:INTER],
            w2_ref[l],   vecs[V_BFF2:V_BFF2 + 1, 0:HIDDEN],
            vecs[V_LN2G:V_LN2G + 1, 0:HIDDEN], vecs[V_LN2B:V_LN2B + 1, 0:HIDDEN])

    # ---- pooler ("[CLS]" token) ----
    cls = x[:, 0, :]                                             # (GB, H)
    pooled = jnp.tanh(_mm(cls, head_w_ref[0]) + pool_b_ref[...]) # (GB, H)

    # ---- Bilinear head + cross-entropy + top-1 accuracy (fused, no 2nd launch) ----
    A  = pooled[0 * BATCH:1 * BATCH]                             # (B, H)
    Bv = pooled[1 * BATCH:2 * BATCH]
    Cv = pooled[2 * BATCH:3 * BATCH]
    bias = bil_b_ref[0, 0]                                       # scalar from SMEM
    AW = _mm(A, head_w_ref[1])                                   # (B, H) ; nn.Bilinear weight[0]
    b_s = jnp.sum(AW * Bv, axis=-1, keepdims=True) + bias        # (B, 1)
    c_s = jnp.sum(AW * Cv, axis=-1, keepdims=True) + bias        # (B, 1)
    s = jnp.concatenate([b_s, c_s], axis=1)                      # (B, 2)
    s_ref[...] = s

    # cross-entropy with integer labels, mean reduction
    m = jnp.max(s, axis=-1, keepdims=True)
    lse = m + jnp.log(jnp.sum(jnp.exp(s - m), axis=-1, keepdims=True))
    logp = s - lse                                               # (B, 2)
    lbl = label_ref[...]                                         # (B, 1) int32
    cls_ids = jax.lax.broadcasted_iota(jnp.int32, s.shape, 1)
    picked = jnp.sum(jnp.where(cls_ids == lbl, logp, 0.0), axis=-1, keepdims=True)
    loss_ref[0, 0] = -jnp.mean(picked)

    # single-label top-1 accuracy: number of correct predictions
    pred = (s[:, 1:2] > s[:, 0:1]).astype(jnp.int32)             # (B, 1)
    correct_ref[0, 0] = jnp.sum((pred == lbl).astype(jnp.int32))


# ---------------- wrappers ----------------

def pallas_scm_bert(ids, label2d, params):
    return pl.pallas_call(
        scm_bert_kernel,
        out_shape=(jax.ShapeDtypeStruct((BATCH, 2), jnp.float32),
                   jax.ShapeDtypeStruct((1, 1), jnp.float32),
                   jax.ShapeDtypeStruct((1, 1), jnp.int32)),
        in_specs=[_vmem(),   # ids (GBS, 1)
                  _vmem(),   # label (B, 1)
                  _vmem(),   # tok_emb
                  _vmem(),   # pos_emb
                  _vmem(),   # emb_ln (2, H)
                  _vmem(),   # wqkv (L, H, 3H)
                  _vmem(),   # wo   (L, H, H)
                  _vmem(),   # w1   (L, H, INTER)
                  _vmem(),   # w2   (L, INTER, H)
                  _vmem(),   # vecs (L, 8, INTER)
                  _vmem(),   # head_w (2, H, H) = [pool_w, bilinear_w]
                  _vmem(),   # pool_b (1, H)
                  _smem()],  # bil_b (1, 1) scalar
        out_specs=(_vmem(), _smem(), _smem()),
    )(ids, label2d, params['tok_emb'], params['pos_emb'], params['emb_ln'],
      params['wqkv'], params['wo'], params['w1'], params['w2'], params['vecs'],
      params['head_w'], params['pool_b'], params['bil_b'])


def scm_bert_forward(A_ids, B_ids, C_ids, label, params, acc_result=None):
    # stack A/B/C group-major and flatten; the whole forward is ONE pallas_call.
    ids = jnp.stack([A_ids, B_ids, C_ids], axis=0).reshape(GBS, 1).astype(jnp.int32)
    lbl2d = label.reshape(-1, 1).astype(jnp.int32)
    s, loss, correct = pallas_scm_bert(ids, lbl2d, params)

    # accuracy counters stay on-device (no blocking host sync in the hot path);
    # cross-step accumulation mirrors the original acc_result mutation functionally.
    total = jnp.asarray(label.shape[0], jnp.int32)
    right = correct[0, 0]
    if acc_result is not None:
        total = total + acc_result['total']
        right = right + acc_result['right']
    return {'loss': loss[0, 0], 'score': s,
            'acc_result': {'total': total, 'right': right}}


# ---------------- deterministic parameter init (packed layout) ----------------

def init_params(key):
    n_keys = 2 + 4 * N_LAYERS + 2
    ks = iter(jax.random.split(key, n_keys))

    def dense_w(k, fin, fout):
        return 0.02 * jax.random.normal(k, (fin, fout), jnp.float32)

    tok_emb = 0.02 * jax.random.normal(next(ks), (VOCAB, HIDDEN), jnp.float32)
    pos_emb = 0.02 * jax.random.normal(next(ks), (SEQ, HIDDEN), jnp.float32)
    emb_ln = jnp.concatenate([jnp.ones((1, HIDDEN), jnp.float32),
                              jnp.zeros((1, HIDDEN), jnp.float32)], axis=0)

    wqkv, wo, w1, w2, vecs = [], [], [], [], []
    for _ in range(N_LAYERS):
        wqkv.append(dense_w(next(ks), HIDDEN, 3 * HIDDEN))
        wo.append(dense_w(next(ks), HIDDEN, HIDDEN))
        w1.append(dense_w(next(ks), HIDDEN, INTER))
        w2.append(dense_w(next(ks), INTER, HIDDEN))
        v = jnp.zeros((8, INTER), jnp.float32)
        v = v.at[V_LN1G, :HIDDEN].set(1.0)   # LayerNorm gammas = 1, all biases = 0
        v = v.at[V_LN2G, :HIDDEN].set(1.0)
        vecs.append(v)

    params = {
        'tok_emb': tok_emb,
        'pos_emb': pos_emb,
        'emb_ln': emb_ln,
        'wqkv': jnp.stack(wqkv),
        'wo': jnp.stack(wo),
        'w1': jnp.stack(w1),
        'w2': jnp.stack(w2),
        'vecs': jnp.stack(vecs),
        # head_w[0] = pooler weight, head_w[1] = nn.Bilinear weight[0] (H, H)
        'head_w': jnp.stack([dense_w(next(ks), HIDDEN, HIDDEN),
                             0.02 * jax.random.normal(next(ks), (HIDDEN, HIDDEN),
                                                      jnp.float32)]),
        'pool_b': jnp.zeros((1, HIDDEN), jnp.float32),
        'bil_b': jnp.zeros((1, 1), jnp.float32),
    }
    return params


if __name__ == "__main__":
    root = jax.random.PRNGKey(0)
    kp, ka, kb, kc, kl = jax.random.split(root, 5)
    params = init_params(kp)

    A_ids = jax.random.randint(ka, (BATCH, SEQ), 0, VOCAB, dtype=jnp.int32)
    B_ids = jax.random.randint(kb, (BATCH, SEQ), 0, VOCAB, dtype=jnp.int32)
    C_ids = jax.random.randint(kc, (BATCH, SEQ), 0, VOCAB, dtype=jnp.int32)
    label = jax.random.randint(kl, (BATCH,), 0, 2, dtype=jnp.int32)

    forward = jax.jit(scm_bert_forward)
    out = forward(A_ids, B_ids, C_ids, label, params)
    jax.block_until_ready(out)
    print("KERNEL_OK")
</pallas_src>

<mosaic_0001>
module attributes {stable_mosaic.version = 11 : i64} {
  func.func @scm_bert_kernel(%arg0: memref<48x1xi32, #tpu.memory_space<vmem>>, %arg1: memref<2x1xi32, #tpu.memory_space<vmem>>, %arg2: memref<64x32xf32, #tpu.memory_space<vmem>>, %arg3: memref<8x32xf32, #tpu.memory_space<vmem>>, %arg4: memref<2x32xf32, #tpu.memory_space<vmem>>, %arg5: memref<2x32x96xf32, #tpu.memory_space<vmem>>, %arg6: memref<2x32x32xf32, #tpu.memory_space<vmem>>, %arg7: memref<2x32x128xf32, #tpu.memory_space<vmem>>, %arg8: memref<2x128x32xf32, #tpu.memory_space<vmem>>, %arg9: memref<2x8x128xf32, #tpu.memory_space<vmem>>, %arg10: memref<2x32x32xf32, #tpu.memory_space<vmem>>, %arg11: memref<1x32xf32, #tpu.memory_space<vmem>>, %arg12: memref<1x1xf32, #tpu.memory_space<smem>>, %arg13: memref<2x2xf32, #tpu.memory_space<vmem>>, %arg14: memref<1x1xf32, #tpu.memory_space<smem>>, %arg15: memref<1x1xi32, #tpu.memory_space<smem>>) attributes {dimension_semantics = [], scalar_prefetch = 0 : i64, scratch_operands = 0 : i64, tpu.core_type = #tpu.core_type<tc>} {
    %c0 = arith.constant 0 : index
    %c0_0 = arith.constant 0 : index
    %0 = vector.load %arg0[%c0, %c0_0] : memref<48x1xi32, #tpu.memory_space<vmem>>, vector<48x1xi32>
    %1 = tpu.iota {dimensions = array<i32: 1>} : vector<48x64xi32>
    %2 = vector.broadcast %0 : vector<48x1xi32> to vector<48x64xi32>
    %3 = arith.cmpi eq, %1, %2 : vector<48x64xi32>
    %4 = arith.extui %3 : vector<48x64xi1> to vector<48x64xi32>
    %5 = arith.sitofp %4 : vector<48x64xi32> to vector<48x64xf32>
    %c0_1 = arith.constant 0 : index
    %c0_2 = arith.constant 0 : index
    %6 = vector.load %arg2[%c0_1, %c0_2] : memref<64x32xf32, #tpu.memory_space<vmem>>, vector<64x32xf32>
    %7 = arith.truncf %5 : vector<48x64xf32> to vector<48x64xbf16>
    %8 = arith.truncf %6 : vector<64x32xf32> to vector<64x32xbf16>
    %cst = arith.constant dense<0.000000e+00> : vector<48x32xf32>
    %9 = tpu.matmul %7, %8, %cst {dimension_numbers = #tpu.dot_dimension_numbers<[1], [0], [0], [1], [0, 0, 1, 1], [], []>} : vector<48x64xbf16>, vector<64x32xbf16>, vector<48x32xf32> -> vector<48x32xf32>
    %10 = vector.shape_cast %9 : vector<48x32xf32> to vector<6x8x32xf32>
    %c0_3 = arith.constant 0 : index
    %c0_4 = arith.constant 0 : index
    %11 = vector.load %arg3[%c0_3, %c0_4] : memref<8x32xf32, #tpu.memory_space<vmem>>, vector<8x32xf32>
    %12 = vector.shape_cast %11 : vector<8x32xf32> to vector<1x8x32xf32>
    %13 = vector.broadcast %12 : vector<1x8x32xf32> to vector<6x8x32xf32>
    %14 = arith.addf %10, %13 : vector<6x8x32xf32>
    %c0_5 = arith.constant 0 : index
    %c0_6 = arith.constant 0 : index
    %15 = vector.load %arg4[%c0_5, %c0_6] : memref<2x32xf32, #tpu.memory_space<vmem>>, vector<2x32xf32>
    %16 = vector.extract_strided_slice %15 {offsets = [0, 0], sizes = [1, 32], strides = [1, 1]} : vector<2x32xf32> to vector<1x32xf32>
    %17 = vector.extract_strided_slice %15 {offsets = [1, 0], sizes = [1, 32], strides = [1, 1]} : vector<2x32xf32> to vector<1x32xf32>
    %cst_7 = arith.constant dense<0.000000e+00> : vector<6x8xf32>
    %18 = vector.multi_reduction <add>, %14, %cst_7 [2] : vector<6x8x32xf32> to vector<6x8xf32>
    %19 = vector.shape_cast %18 : vector<6x8xf32> to vector<6x8x1xf32>
    %cst_8 = arith.constant 3.200000e+01 : f32
    %20 = vector.broadcast %cst_8 : f32 to vector<6x8x1xf32>
    %21 = arith.divf %19, %20 : vector<6x8x1xf32>
    %22 = vector.broadcast %21 : vector<6x8x1xf32> to vector<6x8x32xf32>
    %23 = arith.subf %14, %22 : vector<6x8x32xf32>
    %24 = arith.mulf %23, %23 : vector<6x8x32xf32>
    %cst_9 = arith.constant dense<0.000000e+00> : vector<6x8xf32>
    %25 = vector.multi_reduction <add>, %24, %cst_9 [2] : vector<6x8x32xf32> to vector<6x8xf32>
    %26 = vector.shape_cast %25 : vector<6x8xf32> to vector<6x8x1xf32>
    %cst_10 = arith.constant 3.200000e+01 : f32
    %27 = vector.broadcast %cst_10 : f32 to vector<6x8x1xf32>
    %28 = arith.divf %26, %27 : vector<6x8x1xf32>
    %29 = vector.broadcast %21 : vector<6x8x1xf32> to vector<6x8x32xf32>
    %30 = arith.subf %14, %29 : vector<6x8x32xf32>
    %cst_11 = arith.constant 9.99999996E-13 : f32
    %31 = vector.broadcast %cst_11 : f32 to vector<6x8x1xf32>
    %32 = arith.addf %28, %31 : vector<6x8x1xf32>
    %33 = math.rsqrt %32 : vector<6x8x1xf32>
    %34 = vector.broadcast %33 : vector<6x8x1xf32> to vector<6x8x32xf32>
    %35 = arith.mulf %30, %34 : vector<6x8x32xf32>
    %36 = vector.shape_cast %16 : vector<1x32xf32> to vector<1x1x32xf32>
    %37 = vector.broadcast %36 : vector<1x1x32xf32> to vector<6x8x32xf32>
    %38 = arith.mulf %35, %37 : vector<6x8x32xf32>
    %39 = vector.shape_cast %17 : vector<1x32xf32> to vector<1x1x32xf32>
    %40 = vector.broadcast %39 : vector<1x1x32xf32> to vector<6x8x32xf32>
    %41 = arith.addf %38, %40 : vector<6x8x32xf32>
    %c0_12 = arith.constant 0 : index
    %c0_13 = arith.constant 0 : index
    %c0_14 = arith.constant 0 : index
    %42 = vector.load %arg9[%c0_12, %c0_13, %c0_14] : memref<2x8x128xf32, #tpu.memory_space<vmem>>, vector<1x8x128xf32>
    %43 = vector.shape_cast %42 : vector<1x8x128xf32> to vector<8x128xf32>
    %c0_15 = arith.constant 0 : index
    %c0_16 = arith.constant 0 : index
    %c0_17 = arith.constant 0 : index
    %44 = vector.load %arg5[%c0_15, %c0_16, %c0_17] : memref<2x32x96xf32, #tpu.memory_space<vmem>>, vector<1x32x96xf32>
    %45 = vector.shape_cast %44 : vector<1x32x96xf32> to vector<32x96xf32>
    %46 = vector.extract_strided_slice %43 {offsets = [0, 0], sizes = [1, 96], strides = [1, 1]} : vector<8x128xf32> to vector<1x96xf32>
    %c0_18 = arith.constant 0 : index
    %c0_19 = arith.constant 0 : index
    %c0_20 = arith.constant 0 : index
    %47 = vector.load %arg6[%c0_18, %c0_19, %c0_20] : memref<2x32x32xf32, #tpu.memory_space<vmem>>, vector<1x32x32xf32>
    %48 = vector.shape_cast %47 : vector<1x32x32xf32> to vector<32x32xf32>
    %49 = vector.extract_strided_slice %43 {offsets = [1, 0], sizes = [1, 32], strides = [1, 1]} : vector<8x128xf32> to vector<1x32xf32>
    %50 = vector.extract_strided_slice %43 {offsets = [2, 0], sizes = [1, 32], strides = [1, 1]} : vector<8x128xf32> to vector<1x32xf32>
    %51 = vector.extract_strided_slice %43 {offsets = [3, 0], sizes = [1, 32], strides = [1, 1]} : vector<8x128xf32> to vector<1x32xf32>
    %c0_21 = arith.constant 0 : index
    %c0_22 = arith.constant 0 : index
    %c0_23 = arith.constant 0 : index
    %52 = vector.load %arg7[%c0_21, %c0_22, %c0_23] : memref<2x32x128xf32, #tpu.memory_space<vmem>>, vector<1x32x128xf32>
    %53 = vector.shape_cast %52 : vector<1x32x128xf32> to vector<32x128xf32>
    %54 = vector.extract_strided_slice %43 {offsets = [4, 0], sizes = [1, 128], strides = [1, 1]} : vector<8x128xf32> to vector<1x128xf32>
    %c0_24 = arith.constant 0 : index
    %c0_25 = arith.constant 0 : index
    %c0_26 = arith.constant 0 : index
    %55 = vector.load %arg8[%c0_24, %c0_25, %c0_26] : memref<2x128x32xf32, #tpu.memory_space<vmem>>, vector<1x128x32xf32>
    %56 = vector.shape_cast %55 : vector<1x128x32xf32> to vector<128x32xf32>
    %57 = vector.extract_strided_slice %43 {offsets = [5, 0], sizes = [1, 32], strides = [1, 1]} : vector<8x128xf32> to vector<1x32xf32>
    %58 = vector.extract_strided_slice %43 {offsets = [6, 0], sizes = [1, 32], strides = [1, 1]} : vector<8x128xf32> to vector<1x32xf32>
    %59 = vector.extract_strided_slice %43 {offsets = [7, 0], sizes = [1, 32], strides = [1, 1]} : vector<8x128xf32> to vector<1x32xf32>
    %60 = vector.shape_cast %41 : vector<6x8x32xf32> to vector<48x32xf32>
    %61 = arith.truncf %60 : vector<48x32xf32> to vector<48x32xbf16>
    %62 = arith.truncf %45 : vector<32x96xf32> to vector<32x96xbf16>
    %cst_27 = arith.constant dense<0.000000e+00> : vector<48x96xf32>
    %63 = tpu.matmul %61, %62, %cst_27 {dimension_numbers = #tpu.dot_dimension_numbers<[1], [0], [0], [1], [0, 0, 1, 1], [], []>} : vector<48x32xbf16>, vector<32x96xbf16>, vector<48x96xf32> -> vector<48x96xf32>
    %64 = vector.broadcast %46 : vector<1x96xf32> to vector<48x96xf32>
    %65 = arith.addf %63, %64 : vector<48x96xf32>
    %66 = vector.extract_strided_slice %65 {offsets = [0, 0], sizes = [48, 32], strides = [1, 1]} : vector<48x96xf32> to vector<48x32xf32>
    %cst_28 = arith.constant 0.353553385 : f32
    %67 = vector.broadcast %cst_28 : f32 to vector<48x32xf32>
    %68 = arith.mulf %66, %67 : vector<48x32xf32>
    %69 = vector.shape_cast %68 : vector<48x32xf32> to vector<6x8x32xf32>
    %70 = vector.extract_strided_slice %65 {offsets = [0, 32], sizes = [48, 32], strides = [1, 1]} : vector<48x96xf32> to vector<48x32xf32>
    %71 = vector.shape_cast %70 : vector<48x32xf32> to vector<6x8x32xf32>
    %72 = vector.extract_strided_slice %65 {offsets = [0, 64], sizes = [48, 32], strides = [1, 1]} : vector<48x96xf32> to vector<48x32xf32>
    %73 = vector.shape_cast %72 : vector<48x32xf32> to vector<6x8x32xf32>
    %74 = vector.extract_strided_slice %69 {offsets = [0, 0, 0], sizes = [6, 8, 8], strides = [1, 1, 1]} : vector<6x8x32xf32> to vector<6x8x8xf32>
    %75 = vector.extract_strided_slice %69 {offsets = [0, 0, 8], sizes = [6, 8, 8], strides = [1, 1, 1]} : vector<6x8x32xf32> to vector<6x8x8xf32>
    %76 = vector.extract_strided_slice %69 {offsets = [0, 0, 16], sizes = [6, 8, 8], strides = [1, 1, 1]} : vector<6x8x32xf32> to vector<6x8x8xf32>
    %77 = vector.extract_strided_slice %69 {offsets = [0, 0, 24], sizes = [6, 8, 8], strides = [1, 1, 1]} : vector<6x8x32xf32> to vector<6x8x8xf32>
    %78 = tpu.concatenate %74, %75, %76, %77 in 0 : vector<6x8x8xf32>, vector<6x8x8xf32>, vector<6x8x8xf32>, vector<6x8x8xf32> -> vector<24x8x8xf32>
    %79 = vector.extract_strided_slice %71 {offsets = [0, 0, 0], sizes = [6, 8, 8], strides = [1, 1, 1]} : vector<6x8x32xf32> to vector<6x8x8xf32>
    %80 = vector.extract_strided_slice %71 {offsets = [0, 0, 8], sizes = [6, 8, 8], strides = [1, 1, 1]} : vector<6x8x32xf32> to vector<6x8x8xf32>
    %81 = vector.extract_strided_slice %71 {offsets = [0, 0, 16], sizes = [6, 8, 8], strides = [1, 1, 1]} : vector<6x8x32xf32> to vector<6x8x8xf32>
    %82 = vector.extract_strided_slice %71 {offsets = [0, 0, 24], sizes = [6, 8, 8], strides = [1, 1, 1]} : vector<6x8x32xf32> to vector<6x8x8xf32>
    %83 = tpu.concatenate %79, %80, %81, %82 in 0 : vector<6x8x8xf32>, vector<6x8x8xf32>, vector<6x8x8xf32>, vector<6x8x8xf32> -> vector<24x8x8xf32>
    %84 = vector.extract_strided_slice %73 {offsets = [0, 0, 0], sizes = [6, 8, 8], strides = [1, 1, 1]} : vector<6x8x32xf32> to vector<6x8x8xf32>
    %85 = vector.extract_strided_slice %73 {offsets = [0, 0, 8], sizes = [6, 8, 8], strides = [1, 1, 1]} : vector<6x8x32xf32> to vector<6x8x8xf32>
    %86 = vector.extract_strided_slice %73 {offsets = [0, 0, 16], sizes = [6, 8, 8], strides = [1, 1, 1]} : vector<6x8x32xf32> to vector<6x8x8xf32>
    %87 = vector.extract_strided_slice %73 {offsets = [0, 0, 24], sizes = [6, 8, 8], strides = [1, 1, 1]} : vector<6x8x32xf32> to vector<6x8x8xf32>
    %88 = tpu.concatenate %84, %85, %86, %87 in 0 : vector<6x8x8xf32>, vector<6x8x8xf32>, vector<6x8x8xf32>, vector<6x8x8xf32> -> vector<24x8x8xf32>
    %89 = arith.truncf %78 : vector<24x8x8xf32> to vector<24x8x8xbf16>
    %90 = arith.truncf %83 : vector<24x8x8xf32> to vector<24x8x8xbf16>
    "tpu.trace_start"() <{level = 10 : i32, message = "bqd,bkd->bqk"}> : () -> ()
    %cst_29 = arith.constant dense<0.000000e+00> : vector<24x8x8xf32>
    %91 = tpu.matmul %89, %90, %cst_29 {dimension_numbers = #tpu.dot_dimension_numbers<[2], [2], [1], [1], [0, 0, 0, 1, 1, 1], [0], [0]>} : vector<24x8x8xbf16>, vector<24x8x8xbf16>, vector<24x8x8xf32> -> vector<24x8x8xf32>
    "tpu.trace_stop"() : () -> ()
    %cst_30 = arith.constant dense<0xFF800000> : vector<24x8xf32>
    %92 = vector.multi_reduction <maximumf>, %91, %cst_30 [2] : vector<24x8x8xf32> to vector<24x8xf32>
    %93 = vector.shape_cast %92 : vector<24x8xf32> to vector<24x8x1xf32>
    %94 = vector.broadcast %93 : vector<24x8x1xf32> to vector<24x8x8xf32>
    %95 = arith.subf %91, %94 : vector<24x8x8xf32>
    %96 = math.exp %95 : vector<24x8x8xf32>
    %cst_31 = arith.constant dense<0.000000e+00> : vector<24x8xf32>
    %97 = vector.multi_reduction <add>, %96, %cst_31 [2] : vector<24x8x8xf32> to vector<24x8xf32>
    %98 = vector.shape_cast %97 : vector<24x8xf32> to vector<24x8x1xf32>
    %99 = tpu.reciprocal %98 {approx = true} : vector<24x8x1xf32> -> vector<24x8x1xf32>
    %100 = vector.broadcast %99 : vector<24x8x1xf32> to vector<24x8x8xf32>
    %101 = arith.mulf %96, %100 : vector<24x8x8xf32>
    %102 = arith.truncf %101 : vector<24x8x8xf32> to vector<24x8x8xbf16>
    %103 = arith.truncf %88 : vector<24x8x8xf32> to vector<24x8x8xbf16>
    "tpu.trace_start"() <{level = 10 : i32, message = "bqk,bkd->bqd"}> : () -> ()
    %cst_32 = arith.constant dense<0.000000e+00> : vector<24x8x8xf32>
    %104 = tpu.matmul %102, %103, %cst_32 {dimension_numbers = #tpu.dot_dimension_numbers<[2], [1], [1], [2], [0, 0, 0, 1, 1, 2], [0], [0]>} : vector<24x8x8xbf16>, vector<24x8x8xbf16>, vector<24x8x8xf32> -> vector<24x8x8xf32>
    "tpu.trace_stop"() : () -> ()
    %105 = vector.extract_strided_slice %104 {offsets = [0, 0, 0], sizes = [6, 8, 8], strides = [1, 1, 1]} : vector<24x8x8xf32> to vector<6x8x8xf32>
    %106 = vector.extract_strided_slice %104 {offsets = [6, 0, 0], sizes = [6, 8, 8], strides = [1, 1, 1]} : vector<24x8x8xf32> to vector<6x8x8xf32>
    %107 = vector.extract_strided_slice %104 {offsets = [12, 0, 0], sizes = [6, 8, 8], strides = [1, 1, 1]} : vector<24x8x8xf32> to vector<6x8x8xf32>
    %108 = vector.extract_strided_slice %104 {offsets = [18, 0, 0], sizes = [6, 8, 8], strides = [1, 1, 1]} : vector<24x8x8xf32> to vector<6x8x8xf32>
    %109 = tpu.concatenate %105, %106, %107, %108 in 2 : vector<6x8x8xf32>, vector<6x8x8xf32>, vector<6x8x8xf32>, vector<6x8x8xf32> -> vector<6x8x32xf32>
    %110 = vector.shape_cast %109 : vector<6x8x32xf32> to vector<48x32xf32>
    %111 = arith.truncf %110 : vector<48x32xf32> to vector<48x32xbf16>
    %112 = arith.truncf %48 : vector<32x32xf32> to vector<32x32xbf16>
    %cst_33 = arith.constant dense<0.000000e+00> : vector<48x32xf32>
    %113 = tpu.matmul %111, %112, %cst_33 {dimension_numbers = #tpu.dot_dimension_numbers<[1], [0], [0], [1], [0, 0, 1, 1], [], []>} : vector<48x32xbf16>, vector<32x32xbf16>, vector<48x32xf32> -> vector<48x32xf32>
    %114 = vector.broadcast %49 : vector<1x32xf32> to vector<48x32xf32>
    %115 = arith.addf %113, %114 : vector<48x32xf32>
    %116 = arith.addf %60, %115 : vector<48x32xf32>
    %cst_34 = arith.constant dense<0.000000e+00> : vector<48xf32>
    %117 = vector.multi_reduction <add>, %116, %cst_34 [1] : vector<48x32xf32> to vector<48xf32>
    %118 = vector.shape_cast %117 : vector<48xf32> to vector<48x1xf32>
    %cst_35 = arith.constant 3.200000e+01 : f32
    %119 = vector.broadcast %cst_35 : f32 to vector<48x1xf32>
    %120 = arith.divf %118, %119 : vector<48x1xf32>
    %121 = vector.broadcast %120 : vector<48x1xf32> to vector<48x32xf32>
    %122 = arith.subf %116, %121 : vector<48x32xf32>
    %123 = arith.mulf %122, %122 : vector<48x32xf32>
    %cst_36 = arith.constant dense<0.000000e+00> : vector<48xf32>
    %124 = vector.multi_reduction <add>, %123, %cst_36 [1] : vector<48x32xf32> to vector<48xf32>
    %125 = vector.shape_cast %124 : vector<48xf32> to vector<48x1xf32>
    %cst_37 = arith.constant 3.200000e+01 : f32
    %126 = vector.broadcast %cst_37 : f32 to vector<48x1xf32>
    %127 = arith.divf %125, %126 : vector<48x1xf32>
    %128 = vector.broadcast %120 : vector<48x1xf32> to vector<48x32xf32>
    %129 = arith.subf %116, %128 : vector<48x32xf32>
    %cst_38 = arith.constant 9.99999996E-13 : f32
    %130 = vector.broadcast %cst_38 : f32 to vector<48x1xf32>
    %131 = arith.addf %127, %130 : vector<48x1xf32>
    %132 = math.rsqrt %131 : vector<48x1xf32>
    %133 = vector.broadcast %132 : vector<48x1xf32> to vector<48x32xf32>
    %134 = arith.mulf %129, %133 : vector<48x32xf32>
    %135 = vector.broadcast %50 : vector<1x32xf32> to vector<48x32xf32>
    %136 = arith.mulf %134, %135 : vector<48x32xf32>
    %137 = vector.broadcast %51 : vector<1x32xf32> to vector<48x32xf32>
    %138 = arith.addf %136, %137 : vector<48x32xf32>
    %139 = arith.truncf %138 : vector<48x32xf32> to vector<48x32xbf16>
    %140 = arith.truncf %53 : vector<32x128xf32> to vector<32x128xbf16>
    %cst_39 = arith.constant dense<0.000000e+00> : vector<48x128xf32>
    %141 = tpu.matmul %139, %140, %cst_39 {dimension_numbers = #tpu.dot_dimension_numbers<[1], [0], [0], [1], [0, 0, 1, 1], [], []>} : vector<48x32xbf16>, vector<32x128xbf16>, vector<48x128xf32> -> vector<48x128xf32>
    %142 = vector.broadcast %54 : vector<1x128xf32> to vector<48x128xf32>
    %143 = arith.addf %141, %142 : vector<48x128xf32>
    %cst_40 = arith.constant 5.000000e-01 : f32
    %144 = vector.broadcast %cst_40 : f32 to vector<48x128xf32>
    %145 = arith.mulf %144, %143 : vector<48x128xf32>
    %cst_41 = arith.constant 4.471500e-02 : f32
    %146 = vector.broadcast %cst_41 : f32 to vector<48x128xf32>
    %147 = arith.mulf %146, %143 : vector<48x128xf32>
    %148 = arith.mulf %147, %143 : vector<48x128xf32>
    %149 = arith.mulf %148, %143 : vector<48x128xf32>
    %150 = arith.addf %143, %149 : vector<48x128xf32>
    %cst_42 = arith.constant 0.797884583 : f32
    %151 = vector.broadcast %cst_42 : f32 to vector<48x128xf32>
    %152 = arith.mulf %151, %150 : vector<48x128xf32>
    %153 = math.tanh %152 : vector<48x128xf32>
    %cst_43 = arith.constant 1.000000e+00 : f32
    %154 = vector.broadcast %cst_43 : f32 to vector<48x128xf32>
    %155 = arith.addf %154, %153 : vector<48x128xf32>
    %156 = arith.mulf %145, %155 : vector<48x128xf32>
    %157 = arith.truncf %156 : vector<48x128xf32> to vector<48x128xbf16>
    %158 = arith.truncf %56 : vector<128x32xf32> to vector<128x32xbf16>
    %cst_44 = arith.constant dense<0.000000e+00> : vector<48x32xf32>
    %159 = tpu.matmul %157, %158, %cst_44 {dimension_numbers = #tpu.dot_dimension_numbers<[1], [0], [0], [1], [0, 0, 1, 1], [], []>} : vector<48x128xbf16>, vector<128x32xbf16>, vector<48x32xf32> -> vector<48x32xf32>
    %160 = vector.broadcast %57 : vector<1x32xf32> to vector<48x32xf32>
    %161 = arith.addf %159, %160 : vector<48x32xf32>
    %162 = arith.addf %138, %161 : vector<48x32xf32>
    %cst_45 = arith.constant dense<0.000000e+00> : vector<48xf32>
    %163 = vector.multi_reduction <add>, %162, %cst_45 [1] : vector<48x32xf32> to vector<48xf32>
    %164 = vector.shape_cast %163 : vector<48xf32> to vector<48x1xf32>
    %cst_46 = arith.constant 3.200000e+01 : f32
    %165 = vector.broadcast %cst_46 : f32 to vector<48x1xf32>
    %166 = arith.divf %164, %165 : vector<48x1xf32>
    %167 = vector.broadcast %166 : vector<48x1xf32> to vector<48x32xf32>
    %168 = arith.subf %162, %167 : vector<48x32xf32>
    %169 = arith.mulf %168, %168 : vector<48x32xf32>
    %cst_47 = arith.constant dense<0.000000e+00> : vector<48xf32>
    %170 = vector.multi_reduction <add>, %169, %cst_47 [1] : vector<48x32xf32> to vector<48xf32>
    %171 = vector.shape_cast %170 : vector<48xf32> to vector<48x1xf32>
    %cst_48 = arith.constant 3.200000e+01 : f32
    %172 = vector.broadcast %cst_48 : f32 to vector<48x1xf32>
    %173 = arith.divf %171, %172 : vector<48x1xf32>
    %174 = vector.broadcast %166 : vector<48x1xf32> to vector<48x32xf32>
    %175 = arith.subf %162, %174 : vector<48x32xf32>
    %cst_49 = arith.constant 9.99999996E-13 : f32
    %176 = vector.broadcast %cst_49 : f32 to vector<48x1xf32>
    %177 = arith.addf %173, %176 : vector<48x1xf32>
    %178 = math.rsqrt %177 : vector<48x1xf32>
    %179 = vector.broadcast %178 : vector<48x1xf32> to vector<48x32xf32>
    %180 = arith.mulf %175, %179 : vector<48x32xf32>
    %181 = vector.broadcast %58 : vector<1x32xf32> to vector<48x32xf32>
    %182 = arith.mulf %180, %181 : vector<48x32xf32>
    %183 = vector.broadcast %59 : vector<1x32xf32> to vector<48x32xf32>
    %184 = arith.addf %182, %183 : vector<48x32xf32>
    %185 = vector.shape_cast %184 : vector<48x32xf32> to vector<6x8x32xf32>
    %c1 = arith.constant 1 : index
    %c0_50 = arith.constant 0 : index
    %c0_51 = arith.constant 0 : index
    %186 = vector.load %arg9[%c1, %c0_50, %c0_51] : memref<2x8x128xf32, #tpu.memory_space<vmem>>, vector<1x8x128xf32>
    %187 = vector.shape_cast %186 : vector<1x8x128xf32> to vector<8x128xf32>
    %c1_52 = arith.constant 1 : index
    %c0_53 = arith.constant 0 : index
    %c0_54 = arith.constant 0 : index
    %188 = vector.load %arg5[%c1_52, %c0_53, %c0_54] : memref<2x32x96xf32, #tpu.memory_space<vmem>>, vector<1x32x96xf32>
    %189 = vector.shape_cast %188 : vector<1x32x96xf32> to vector<32x96xf32>
    %190 = vector.extract_strided_slice %187 {offsets = [0, 0], sizes = [1, 96], strides = [1, 1]} : vector<8x128xf32> to vector<1x96xf32>
    %c1_55 = arith.constant 1 : index
    %c0_56 = arith.constant 0 : index
    %c0_57 = arith.constant 0 : index
    %191 = vector.load %arg6[%c1_55, %c0_56, %c0_57] : memref<2x32x32xf32, #tpu.memory_space<vmem>>, vector<1x32x32xf32>
    %192 = vector.shape_cast %191 : vector<1x32x32xf32> to vector<32x32xf32>
    %193 = vector.extract_strided_slice %187 {offsets = [1, 0], sizes = [1, 32], strides = [1, 1]} : vector<8x128xf32> to vector<1x32xf32>
    %194 = vector.extract_strided_slice %187 {offsets = [2, 0], sizes = [1, 32], strides = [1, 1]} : vector<8x128xf32> to vector<1x32xf32>
    %195 = vector.extract_strided_slice %187 {offsets = [3, 0], sizes = [1, 32], strides = [1, 1]} : vector<8x128xf32> to vector<1x32xf32>
    %c1_58 = arith.constant 1 : index
    %c0_59 = arith.constant 0 : index
    %c0_60 = arith.constant 0 : index
    %196 = vector.load %arg7[%c1_58, %c0_59, %c0_60] : memref<2x32x128xf32, #tpu.memory_space<vmem>>, vector<1x32x128xf32>
    %197 = vector.shape_cast %196 : vector<1x32x128xf32> to vector<32x128xf32>
    %198 = vector.extract_strided_slice %187 {offsets = [4, 0], sizes = [1, 128], strides = [1, 1]} : vector<8x128xf32> to vector<1x128xf32>
    %c1_61 = arith.constant 1 : index
    %c0_62 = arith.constant 0 : index
    %c0_63 = arith.constant 0 : index
    %199 = vector.load %arg8[%c1_61, %c0_62, %c0_63] : memref<2x128x32xf32, #tpu.memory_space<vmem>>, vector<1x128x32xf32>
    %200 = vector.shape_cast %199 : vector<1x128x32xf32> to vector<128x32xf32>
    %201 = vector.extract_strided_slice %187 {offsets = [5, 0], sizes = [1, 32], strides = [1, 1]} : vector<8x128xf32> to vector<1x32xf32>
    %202 = vector.extract_strided_slice %187 {offsets = [6, 0], sizes = [1, 32], strides = [1, 1]} : vector<8x128xf32> to vector<1x32xf32>
    %203 = vector.extract_strided_slice %187 {offsets = [7, 0], sizes = [1, 32], strides = [1, 1]} : vector<8x128xf32> to vector<1x32xf32>
    %204 = vector.shape_cast %185 : vector<6x8x32xf32> to vector<48x32xf32>
    %205 = arith.truncf %204 : vector<48x32xf32> to vector<48x32xbf16>
    %206 = arith.truncf %189 : vector<32x96xf32> to vector<32x96xbf16>
    %cst_64 = arith.constant dense<0.000000e+00> : vector<48x96xf32>
    %207 = tpu.matmul %205, %206, %cst_64 {dimension_numbers = #tpu.dot_dimension_numbers<[1], [0], [0], [1], [0, 0, 1, 1], [], []>} : vector<48x32xbf16>, vector<32x96xbf16>, vector<48x96xf32> -> vector<48x96xf32>
    %208 = vector.broadcast %190 : vector<1x96xf32> to vector<48x96xf32>
    %209 = arith.addf %207, %208 : vector<48x96xf32>
    %210 = vector.extract_strided_slice %209 {offsets = [0, 0], sizes = [48, 32], strides = [1, 1]} : vector<48x96xf32> to vector<48x32xf32>
    %cst_65 = arith.constant 0.353553385 : f32
    %211 = vector.broadcast %cst_65 : f32 to vector<48x32xf32>
    %212 = arith.mulf %210, %211 : vector<48x32xf32>
    %213 = vector.shape_cast %212 : vector<48x32xf32> to vector<6x8x32xf32>
    %214 = vector.extract_strided_slice %209 {offsets = [0, 32], sizes = [48, 32], strides = [1, 1]} : vector<48x96xf32> to vector<48x32xf32>
    %215 = vector.shape_cast %214 : vector<48x32xf32> to vector<6x8x32xf32>
    %216 = vector.extract_strided_slice %209 {offsets = [0, 64], sizes = [48, 32], strides = [1, 1]} : vector<48x96xf32> to vector<48x32xf32>
    %217 = vector.shape_cast %216 : vector<48x32xf32> to vector<6x8x32xf32>
    %218 = vector.extract_strided_slice %213 {offsets = [0, 0, 0], sizes = [6, 8, 8], strides = [1, 1, 1]} : vector<6x8x32xf32> to vector<6x8x8xf32>
    %219 = vector.extract_strided_slice %213 {offsets = [0, 0, 8], sizes = [6, 8, 8], strides = [1, 1, 1]} : vector<6x8x32xf32> to vector<6x8x8xf32>
    %220 = vector.extract_strided_slice %213 {offsets = [0, 0, 16], sizes = [6, 8, 8], strides = [1, 1, 1]} : vector<6x8x32xf32> to vector<6x8x8xf32>
    %221 = vector.extract_strided_slice %213 {offsets = [0, 0, 24], sizes = [6, 8, 8], strides = [1, 1, 1]} : vector<6x8x32xf32> to vector<6x8x8xf32>
    %222 = tpu.concatenate %218, %219, %220, %221 in 0 : vector<6x8x8xf32>, vector<6x8x8xf32>, vector<6x8x8xf32>, vector<6x8x8xf32> -> vector<24x8x8xf32>
    %223 = vector.extract_strided_slice %215 {offsets = [0, 0, 0], sizes = [6, 8, 8], strides = [1, 1, 1]} : vector<6x8x32xf32> to vector<6x8x8xf32>
    %224 = vector.extract_strided_slice %215 {offsets = [0, 0, 8], sizes = [6, 8, 8], strides = [1, 1, 1]} : vector<6x8x32xf32> to vector<6x8x8xf32>
    %225 = vector.extract_strided_slice %215 {offsets = [0, 0, 16], sizes = [6, 8, 8], strides = [1, 1, 1]} : vector<6x8x32xf32> to vector<6x8x8xf32>
    %226 = vector.extract_strided_slice %215 {offsets = [0, 0, 24], sizes = [6, 8, 8], strides = [1, 1, 1]} : vector<6x8x32xf32> to vector<6x8x8xf32>
    %227 = tpu.concatenate %223, %224, %225, %226 in 0 : vector<6x8x8xf32>, vector<6x8x8xf32>, vector<6x8x8xf32>, vector<6x8x8xf32> -> vector<24x8x8xf32>
    %228 = vector.extract_strided_slice %217 {offsets = [0, 0, 0], sizes = [6, 8, 8], strides = [1, 1, 1]} : vector<6x8x32xf32> to vector<6x8x8xf32>
    %229 = vector.extract_strided_slice %217 {offsets = [0, 0, 8], sizes = [6, 8, 8], strides = [1, 1, 1]} : vector<6x8x32xf32> to vector<6x8x8xf32>
    %230 = vector.extract_strided_slice %217 {offsets = [0, 0, 16], sizes = [6, 8, 8], strides = [1, 1, 1]} : vector<6x8x32xf32> to vector<6x8x8xf32>
    %231 = vector.extract_strided_slice %217 {offsets = [0, 0, 24], sizes = [6, 8, 8], strides = [1, 1, 1]} : vector<6x8x32xf32> to vector<6x8x8xf32>
    %232 = tpu.concatenate %228, %229, %230, %231 in 0 : vector<6x8x8xf32>, vector<6x8x8xf32>, vector<6x8x8xf32>, vector<6x8x8xf32> -> vector<24x8x8xf32>
    %233 = arith.truncf %222 : vector<24x8x8xf32> to vector<24x8x8xbf16>
    %234 = arith.truncf %227 : vector<24x8x8xf32> to vector<24x8x8xbf16>
    "tpu.trace_start"() <{level = 10 : i32, message = "bqd,bkd->bqk"}> : () -> ()
    %cst_66 = arith.constant dense<0.000000e+00> : vector<24x8x8xf32>
    %235 = tpu.matmul %233, %234, %cst_66 {dimension_numbers = #tpu.dot_dimension_numbers<[2], [2], [1], [1], [0, 0, 0, 1, 1, 1], [0], [0]>} : vector<24x8x8xbf16>, vector<24x8x8xbf16>, vector<24x8x8xf32> -> vector<24x8x8xf32>
    "tpu.trace_stop"() : () -> ()
    %cst_67 = arith.constant dense<0xFF800000> : vector<24x8xf32>
    %236 = vector.multi_reduction <maximumf>, %235, %cst_67 [2] : vector<24x8x8xf32> to vector<24x8xf32>
    %237 = vector.shape_cast %236 : vector<24x8xf32> to vector<24x8x1xf32>
    %238 = vector.broadcast %237 : vector<24x8x1xf32> to vector<24x8x8xf32>
    %239 = arith.subf %235, %238 : vector<24x8x8xf32>
    %240 = math.exp %239 : vector<24x8x8xf32>
    %cst_68 = arith.constant dense<0.000000e+00> : vector<24x8xf32>
    %241 = vector.multi_reduction <add>, %240, %cst_68 [2] : vector<24x8x8xf32> to vector<24x8xf32>
    %242 = vector.shape_cast %241 : vector<24x8xf32> to vector<24x8x1xf32>
    %243 = tpu.reciprocal %242 {approx = true} : vector<24x8x1xf32> -> vector<24x8x1xf32>
    %244 = vector.broadcast %243 : vector<24x8x1xf32> to vector<24x8x8xf32>
    %245 = arith.mulf %240, %244 : vector<24x8x8xf32>
    %246 = arith.truncf %245 : vector<24x8x8xf32> to vector<24x8x8xbf16>
    %247 = arith.truncf %232 : vector<24x8x8xf32> to vector<24x8x8xbf16>
    "tpu.trace_start"() <{level = 10 : i32, message = "bqk,bkd->bqd"}> : () -> ()
    %cst_69 = arith.constant dense<0.000000e+00> : vector<24x8x8xf32>
    %248 = tpu.matmul %246, %247, %cst_69 {dimension_numbers = #tpu.dot_dimension_numbers<[2], [1], [1], [2], [0, 0, 0, 1, 1, 2], [0], [0]>} : vector<24x8x8xbf16>, vector<24x8x8xbf16>, vector<24x8x8xf32> -> vector<24x8x8xf32>
    "tpu.trace_stop"() : () -> ()
    %249 = vector.extract_strided_slice %248 {offsets = [0, 0, 0], sizes = [6, 8, 8], strides = [1, 1, 1]} : vector<24x8x8xf32> to vector<6x8x8xf32>
    %250 = vector.extract_strided_slice %248 {offsets = [6, 0, 0], sizes = [6, 8, 8], strides = [1, 1, 1]} : vector<24x8x8xf32> to vector<6x8x8xf32>
    %251 = vector.extract_strided_slice %248 {offsets = [12, 0, 0], sizes = [6, 8, 8], strides = [1, 1, 1]} : vector<24x8x8xf32> to vector<6x8x8xf32>
    %252 = vector.extract_strided_slice %248 {offsets = [18, 0, 0], sizes = [6, 8, 8], strides = [1, 1, 1]} : vector<24x8x8xf32> to vector<6x8x8xf32>
    %253 = tpu.concatenate %249, %250, %251, %252 in 2 : vector<6x8x8xf32>, vector<6x8x8xf32>, vector<6x8x8xf32>, vector<6x8x8xf32> -> vector<6x8x32xf32>
    %254 = vector.shape_cast %253 : vector<6x8x32xf32> to vector<48x32xf32>
    %255 = arith.truncf %254 : vector<48x32xf32> to vector<48x32xbf16>
    %256 = arith.truncf %192 : vector<32x32xf32> to vector<32x32xbf16>
    %cst_70 = arith.constant dense<0.000000e+00> : vector<48x32xf32>
    %257 = tpu.matmul %255, %256, %cst_70 {dimension_numbers = #tpu.dot_dimension_numbers<[1], [0], [0], [1], [0, 0, 1, 1], [], []>} : vector<48x32xbf16>, vector<32x32xbf16>, vector<48x32xf32> -> vector<48x32xf32>
    %258 = vector.broadcast %193 : vector<1x32xf32> to vector<48x32xf32>
    %259 = arith.addf %257, %258 : vector<48x32xf32>
    %260 = arith.addf %204, %259 : vector<48x32xf32>
    %cst_71 = arith.constant dense<0.000000e+00> : vector<48xf32>
    %261 = vector.multi_reduction <add>, %260, %cst_71 [1] : vector<48x32xf32> to vector<48xf32>
    %262 = vector.shape_cast %261 : vector<48xf32> to vector<48x1xf32>
    %cst_72 = arith.constant 3.200000e+01 : f32
    %263 = vector.broadcast %cst_72 : f32 to vector<48x1xf32>
    %264 = arith.divf %262, %263 : vector<48x1xf32>
    %265 = vector.broadcast %264 : vector<48x1xf32> to vector<48x32xf32>
    %266 = arith.subf %260, %265 : vector<48x32xf32>
    %267 = arith.mulf %266, %266 : vector<48x32xf32>
    %cst_73 = arith.constant dense<0.000000e+00> : vector<48xf32>
    %268 = vector.multi_reduction <add>, %267, %cst_73 [1] : vector<48x32xf32> to vector<48xf32>
    %269 = vector.shape_cast %268 : vector<48xf32> to vector<48x1xf32>
    %cst_74 = arith.constant 3.200000e+01 : f32
    %270 = vector.broadcast %cst_74 : f32 to vector<48x1xf32>
    %271 = arith.divf %269, %270 : vector<48x1xf32>
    %272 = vector.broadcast %264 : vector<48x1xf32> to vector<48x32xf32>
    %273 = arith.subf %260, %272 : vector<48x32xf32>
    %cst_75 = arith.constant 9.99999996E-13 : f32
    %274 = vector.broadcast %cst_75 : f32 to vector<48x1xf32>
    %275 = arith.addf %271, %274 : vector<48x1xf32>
    %276 = math.rsqrt %275 : vector<48x1xf32>
    %277 = vector.broadcast %276 : vector<48x1xf32> to vector<48x32xf32>
    %278 = arith.mulf %273, %277 : vector<48x32xf32>
    %279 = vector.broadcast %194 : vector<1x32xf32> to vector<48x32xf32>
    %280 = arith.mulf %278, %279 : vector<48x32xf32>
    %281 = vector.broadcast %195 : vector<1x32xf32> to vector<48x32xf32>
    %282 = arith.addf %280, %281 : vector<48x32xf32>
    %283 = arith.truncf %282 : vector<48x32xf32> to vector<48x32xbf16>
    %284 = arith.truncf %197 : vector<32x128xf32> to vector<32x128xbf16>
    %cst_76 = arith.constant dense<0.000000e+00> : vector<48x128xf32>
    %285 = tpu.matmul %283, %284, %cst_76 {dimension_numbers = #tpu.dot_dimension_numbers<[1], [0], [0], [1], [0, 0, 1, 1], [], []>} : vector<48x32xbf16>, vector<32x128xbf16>, vector<48x128xf32> -> vector<48x128xf32>
    %286 = vector.broadcast %198 : vector<1x128xf32> to vector<48x128xf32>
    %287 = arith.addf %285, %286 : vector<48x128xf32>
    %cst_77 = arith.constant 5.000000e-01 : f32
    %288 = vector.broadcast %cst_77 : f32 to vector<48x128xf32>
    %289 = arith.mulf %288, %287 : vector<48x128xf32>
    %cst_78 = arith.constant 4.471500e-02 : f32
    %290 = vector.broadcast %cst_78 : f32 to vector<48x128xf32>
    %291 = arith.mulf %290, %287 : vector<48x128xf32>
    %292 = arith.mulf %291, %287 : vector<48x128xf32>
    %293 = arith.mulf %292, %287 : vector<48x128xf32>
    %294 = arith.addf %287, %293 : vector<48x128xf32>
    %cst_79 = arith.constant 0.797884583 : f32
    %295 = vector.broadcast %cst_79 : f32 to vector<48x128xf32>
    %296 = arith.mulf %295, %294 : vector<48x128xf32>
    %297 = math.tanh %296 : vector<48x128xf32>
    %cst_80 = arith.constant 1.000000e+00 : f32
    %298 = vector.broadcast %cst_80 : f32 to vector<48x128xf32>
    %299 = arith.addf %298, %297 : vector<48x128xf32>
    %300 = arith.mulf %289, %299 : vector<48x128xf32>
    %301 = arith.truncf %300 : vector<48x128xf32> to vector<48x128xbf16>
    %302 = arith.truncf %200 : vector<128x32xf32> to vector<128x32xbf16>
    %cst_81 = arith.constant dense<0.000000e+00> : vector<48x32xf32>
    %303 = tpu.matmul %301, %302, %cst_81 {dimension_numbers = #tpu.dot_dimension_numbers<[1], [0], [0], [1], [0, 0, 1, 1], [], []>} : vector<48x128xbf16>, vector<128x32xbf16>, vector<48x32xf32> -> vector<48x32xf32>
    %304 = vector.broadcast %201 : vector<1x32xf32> to vector<48x32xf32>
    %305 = arith.addf %303, %304 : vector<48x32xf32>
    %306 = arith.addf %282, %305 : vector<48x32xf32>
    %cst_82 = arith.constant dense<0.000000e+00> : vector<48xf32>
    %307 = vector.multi_reduction <add>, %306, %cst_82 [1] : vector<48x32xf32> to vector<48xf32>
    %308 = vector.shape_cast %307 : vector<48xf32> to vector<48x1xf32>
    %cst_83 = arith.constant 3.200000e+01 : f32
    %309 = vector.broadcast %cst_83 : f32 to vector<48x1xf32>
    %310 = arith.divf %308, %309 : vector<48x1xf32>
    %311 = vector.broadcast %310 : vector<48x1xf32> to vector<48x32xf32>
    %312 = arith.subf %306, %311 : vector<48x32xf32>
    %313 = arith.mulf %312, %312 : vector<48x32xf32>
    %cst_84 = arith.constant dense<0.000000e+00> : vector<48xf32>
    %314 = vector.multi_reduction <add>, %313, %cst_84 [1] : vector<48x32xf32> to vector<48xf32>
    %315 = vector.shape_cast %314 : vector<48xf32> to vector<48x1xf32>
    %cst_85 = arith.constant 3.200000e+01 : f32
    %316 = vector.broadcast %cst_85 : f32 to vector<48x1xf32>
    %317 = arith.divf %315, %316 : vector<48x1xf32>
    %318 = vector.broadcast %310 : vector<48x1xf32> to vector<48x32xf32>
    %319 = arith.subf %306, %318 : vector<48x32xf32>
    %cst_86 = arith.constant 9.99999996E-13 : f32
    %320 = vector.broadcast %cst_86 : f32 to vector<48x1xf32>
    %321 = arith.addf %317, %320 : vector<48x1xf32>
    %322 = math.rsqrt %321 : vector<48x1xf32>
    %323 = vector.broadcast %322 : vector<48x1xf32> to vector<48x32xf32>
    %324 = arith.mulf %319, %323 : vector<48x32xf32>
    %325 = vector.broadcast %202 : vector<1x32xf32> to vector<48x32xf32>
    %326 = arith.mulf %324, %325 : vector<48x32xf32>
    %327 = vector.broadcast %203 : vector<1x32xf32> to vector<48x32xf32>
    %328 = arith.addf %326, %327 : vector<48x32xf32>
    %329 = vector.shape_cast %328 : vector<48x32xf32> to vector<6x8x32xf32>
    %330 = vector.extract_strided_slice %329 {offsets = [0, 0, 0], sizes = [6, 1, 32], strides = [1, 1, 1]} : vector<6x8x32xf32> to vector<6x1x32xf32>
    %331 = vector.shape_cast %330 : vector<6x1x32xf32> to vector<6x32xf32>
    %c0_87 = arith.constant 0 : index
    %c0_88 = arith.constant 0 : index
    %c0_89 = arith.constant 0 : index
    %332 = vector.load %arg10[%c0_87, %c0_88, %c0_89] : memref<2x32x32xf32, #tpu.memory_space<vmem>>, vector<1x32x32xf32>
    %333 = vector.shape_cast %332 : vector<1x32x32xf32> to vector<32x32xf32>
    %334 = arith.truncf %331 : vector<6x32xf32> to vector<6x32xbf16>
    %335 = arith.truncf %333 : vector<32x32xf32> to vector<32x32xbf16>
    %cst_90 = arith.constant dense<0.000000e+00> : vector<6x32xf32>
    %336 = tpu.matmul %334, %335, %cst_90 {dimension_numbers = #tpu.dot_dimension_numbers<[1], [0], [0], [1], [0, 0, 1, 1], [], []>} : vector<6x32xbf16>, vector<32x32xbf16>, vector<6x32xf32> -> vector<6x32xf32>
    %c0_91 = arith.constant 0 : index
    %c0_92 = arith.constant 0 : index
    %337 = vector.load %arg11[%c0_91, %c0_92] : memref<1x32xf32, #tpu.memory_space<vmem>>, vector<1x32xf32>
    %338 = vector.broadcast %337 : vector<1x32xf32> to vector<6x32xf32>
    %339 = arith.addf %336, %338 : vector<6x32xf32>
    %340 = math.tanh %339 : vector<6x32xf32>
    %341 = vector.extract_strided_slice %340 {offsets = [0, 0], sizes = [2, 32], strides = [1, 1]} : vector<6x32xf32> to vector<2x32xf32>
    %342 = vector.extract_strided_slice %340 {offsets = [2, 0], sizes = [2, 32], strides = [1, 1]} : vector<6x32xf32> to vector<2x32xf32>
    %343 = vector.extract_strided_slice %340 {offsets = [4, 0], sizes = [2, 32], strides = [1, 1]} : vector<6x32xf32> to vector<2x32xf32>
    %c0_93 = arith.constant 0 : index
    %c0_94 = arith.constant 0 : index
    %344 = memref.load %arg12[%c0_93, %c0_94] : memref<1x1xf32, #tpu.memory_space<smem>>
    %c1_95 = arith.constant 1 : index
    %c0_96 = arith.constant 0 : index
    %c0_97 = arith.constant 0 : index
    %345 = vector.load %arg10[%c1_95, %c0_96, %c0_97] : memref<2x32x32xf32, #tpu.memory_space<vmem>>, vector<1x32x32xf32>
    %346 = vector.shape_cast %345 : vector<1x32x32xf32> to vector<32x32xf32>
    %347 = arith.truncf %341 : vector<2x32xf32> to vector<2x32xbf16>
    %348 = arith.truncf %346 : vector<32x32xf32> to vector<32x32xbf16>
    %cst_98 = arith.constant dense<0.000000e+00> : vector<2x32xf32>
    %349 = tpu.matmul %347, %348, %cst_98 {dimension_numbers = #tpu.dot_dimension_numbers<[1], [0], [0], [1], [0, 0, 1, 1], [], []>} : vector<2x32xbf16>, vector<32x32xbf16>, vector<2x32xf32> -> vector<2x32xf32>
    %350 = arith.mulf %349, %342 : vector<2x32xf32>
    %cst_99 = arith.constant dense<0.000000e+00> : vector<2xf32>
    %351 = vector.multi_reduction <add>, %350, %cst_99 [1] : vector<2x32xf32> to vector<2xf32>
    %352 = vector.shape_cast %351 : vector<2xf32> to vector<2x1xf32>
    %353 = vector.broadcast %344 : f32 to vector<2x1xf32>
    %354 = arith.addf %352, %353 : vector<2x1xf32>
    %355 = arith.mulf %349, %343 : vector<2x32xf32>
    %cst_100 = arith.constant dense<0.000000e+00> : vector<2xf32>
    %356 = vector.multi_reduction <add>, %355, %cst_100 [1] : vector<2x32xf32> to vector<2xf32>
    %357 = vector.shape_cast %356 : vector<2xf32> to vector<2x1xf32>
    %358 = vector.broadcast %344 : f32 to vector<2x1xf32>
    %359 = arith.addf %357, %358 : vector<2x1xf32>
    %360 = tpu.concatenate %354, %359 in 1 : vector<2x1xf32>, vector<2x1xf32> -> vector<2x2xf32>
    %c0_101 = arith.constant 0 : index
    %c0_102 = arith.constant 0 : index
    %361 = vector.load %arg13[%c0_101, %c0_102] : memref<2x2xf32, #tpu.memory_space<vmem>>, vector<2x2xf32>
    tpu.vector_store %arg13[%c0_101, %c0_102], %360 {strides = array<i32>} : memref<2x2xf32, #tpu.memory_space<vmem>>, vector<2x2xf32>,
    %cst_103 = arith.constant dense<0xFF800000> : vector<2xf32>
    %362 = vector.multi_reduction <maximumf>, %360, %cst_103 [1] : vector<2x2xf32> to vector<2xf32>
    %363 = vector.shape_cast %362 : vector<2xf32> to vector<2x1xf32>
    %364 = vector.broadcast %363 : vector<2x1xf32> to vector<2x2xf32>
    %365 = arith.subf %360, %364 : vector<2x2xf32>
    %366 = math.exp %365 : vector<2x2xf32>
    %cst_104 = arith.constant dense<0.000000e+00> : vector<2xf32>
    %367 = vector.multi_reduction <add>, %366, %cst_104 [1] : vector<2x2xf32> to vector<2xf32>
    %368 = vector.shape_cast %367 : vector<2xf32> to vector<2x1xf32>
    %369 = math.log %368 : vector<2x1xf32>
    %370 = arith.addf %363, %369 : vector<2x1xf32>
    %371 = vector.broadcast %370 : vector<2x1xf32> to vector<2x2xf32>
    %372 = arith.subf %360, %371 : vector<2x2xf32>
    %c0_105 = arith.constant 0 : index
    %c0_106 = arith.constant 0 : index
    %373 = vector.load %arg1[%c0_105, %c0_106] : memref<2x1xi32, #tpu.memory_space<vmem>>, vector<2x1xi32>
    %374 = tpu.iota {dimensions = array<i32: 1>} : vector<2x2xi32>
    %375 = vector.broadcast %373 : vector<2x1xi32> to vector<2x2xi32>
    %376 = arith.cmpi eq, %374, %375 : vector<2x2xi32>
    %cst_107 = arith.constant 0.000000e+00 : f32
    %377 = vector.broadcast %cst_107 : f32 to vector<2x2xf32>
    %378 = arith.select %376, %372, %377 : vector<2x2xi1>, vector<2x2xf32>
    %cst_108 = arith.constant dense<0.000000e+00> : vector<2xf32>
    %379 = vector.multi_reduction <add>, %378, %cst_108 [1] : vector<2x2xf32> to vector<2xf32>
    %380 = vector.shape_cast %379 : vector<2xf32> to vector<2x1xf32>
    %381 = vector.shape_cast %380 : vector<2x1xf32> to vector<1x2x1xf32>
    %cst_109 = arith.constant dense<0.000000e+00> : vector<1xf32>
    %382 = vector.multi_reduction <add>, %381, %cst_109 [1, 2] : vector<1x2x1xf32> to vector<1xf32>
    %383 = vector.shape_cast %382 : vector<1xf32> to vector<1x1x1xf32>
    %384 = vector.extract %383[0, 0, 0] : f32 from vector<1x1x1xf32>
    %cst_110 = arith.constant 2.000000e+00 : f32
    %385 = arith.divf %384, %cst_110 : f32
    %cst_111 = arith.constant 0.000000e+00 : f32
    %386 = arith.subf %cst_111, %385 : f32
    %c0_112 = arith.constant 0 : index
    %c0_113 = arith.constant 0 : index
    %387 = memref.load %arg14[%c0_112, %c0_113] : memref<1x1xf32, #tpu.memory_space<smem>>
    memref.store %386, %arg14[%c0_112, %c0_113] : memref<1x1xf32, #tpu.memory_space<smem>>
    %388 = vector.extract_strided_slice %360 {offsets = [0, 1], sizes = [2, 1], strides = [1, 1]} : vector<2x2xf32> to vector<2x1xf32>
    %389 = vector.extract_strided_slice %360 {offsets = [0, 0], sizes = [2, 1], strides = [1, 1]} : vector<2x2xf32> to vector<2x1xf32>
    %390 = arith.cmpf ogt, %388, %389 : vector<2x1xf32>
    %391 = arith.extui %390 : vector<2x1xi1> to vector<2x1xi32>
    %392 = arith.cmpi eq, %391, %373 : vector<2x1xi32>
    %393 = arith.extui %392 : vector<2x1xi1> to vector<2x1xi32>
    %394 = vector.shape_cast %393 : vector<2x1xi32> to vector<1x2x1xi32>
    %cst_114 = arith.constant dense<0> : vector<1xi32>
    %395 = vector.multi_reduction <add>, %394, %cst_114 [1, 2] : vector<1x2x1xi32> to vector<1xi32>
    %396 = vector.shape_cast %395 : vector<1xi32> to vector<1x1x1xi32>
    %397 = vector.extract %396[0, 0, 0] : i32 from vector<1x1x1xi32>
    %c0_115 = arith.constant 0 : index
    %c0_116 = arith.constant 0 : index
    %398 = memref.load %arg15[%c0_115, %c0_116] : memref<1x1xi32, #tpu.memory_space<smem>>
    memref.store %397, %arg15[%c0_115, %c0_116] : memref<1x1xi32, #tpu.memory_space<smem>>
    return
  }
}

</mosaic_0001>

<bundles_post_ra>
// kernel: scm_bert_forward.1
= control target key start
LH: loop header
LB: loop body
LE: loop exit
PB: predicated region body
PF: predicated region fallthrough
CT: control target
= control target key end

     0   :  { %22 = vsyncpa [#allocation4], 0  ;;  %s11735_s0 = inlined_call_operand.vmem [shape: s32[48,1], index: 0, kind: input, shape index: {}]   ;;  %s11736_s1 = inlined_call_operand.vmem [shape: s32[2,1], index: 1, kind: input, shape index: {}]   ;;  %s11737_s2 = inlined_call_operand.vmem [shape: f32[64,32], index: 2, kind: input, shape index: {}]   ;;  %s11738_s3 = inlined_call_operand.vmem [shape: f32[8,32], index: 3, kind: input, shape index: {}]   ;;  %s11739_s4 = inlined_call_operand.vmem [shape: f32[2,32], index: 4, kind: input, shape index: {}]   ;;  %s11740_s5 = inlined_call_operand.vmem [shape: f32[2,32,96], index: 5, kind: input, shape index: {}]   ;;  %s11741_s6 = inlined_call_operand.vmem [shape: f32[2,32,32], index: 6, kind: input, shape index: {}]   ;;  %s11742_s7 = inlined_call_operand.vmem [shape: f32[2,32,128], index: 7, kind: input, shape index: {}]   ;;  %s11743_s8 = inlined_call_operand.vmem [shape: f32[2,128,32], index: 8, kind: input, shape index: {}]   ;;  %s11744_s9 = inlined_call_operand.vmem [shape: f32[2,8,128], index: 9, kind: input, shape index: {}]   ;;  %s11745_s10 = inlined_call_operand.vmem [shape: f32[2,32,32], index: 10, kind: input, shape index: {}]   ;;  %s11746_s11 = inlined_call_operand.vmem [shape: f32[1,32], index: 11, kind: input, shape index: {}]   ;;  %s11747_s12 = inlined_call_operand.<no memory space> [shape: f32[1,1], index: 12, kind: input, shape index: {}]   ;;  %s11748_s13 = inlined_call_operand.hbm [shape: f32[2,2], index: 13, kind: output, shape index: {0}]   ;;  %s11749_s14 = inlined_call_operand.hbm [shape: f32[1,1], index: 14, kind: output, shape index: {1}]   ;;  %s11750_s15 = inlined_call_operand.hbm [shape: s32[1,1], index: 15, kind: output, shape index: {2}]  }
   0x1   :  { %23 = vsyncpa [#allocation5], 0  ;;  %v54_v0 = vld [vmem:[%s11735_s0 + $0x10] sm:$0xff]  ;;  %v52_v1 = vld [vmem:[%s11735_s0] sm:$0xff]  ;;  %v11751_v2 = vmov 0   ;;  %v11753_v8 = vmov 0.0  }
   0x2   :  { %8706 = vset.pattern.permute.xlu1 %v11751_v2  ;;  %8705 = vset.pattern.permute.xlu0 %v11751_v2  ;;  %v84_v3 = vld [vmem:[%s11737_s2] sm:$0xff]  ;;  %v85_v4 = vld [vmem:[%s11737_s2 + $0x8] sm:$0xff]  ;;  %v86_v5 = vld [vmem:[%s11737_s2 + $0x10] sm:$0xff] }
   0x3   :  { %67 = vperm.xlu1 %8706, %v54_v0   ;;  %61 = vperm.xlu0 %8705, %v52_v1   ;;  %v55_v6 = vld [vmem:[%s11735_s0 + $0x18] sm:$0xff]  ;;  %v53_v7 = vld [vmem:[%s11735_s0 + $0x8] sm:$0xff]  ;;  %v107_v9 = vpack.c.bf16 %v85_v4, %v84_v3 }
   0x4   :  { %7922 = vmatprep.subr.bf16.mxu0 %v11753_v8  ;;  %v87_v10 = vld [vmem:[%s11737_s2 + $0x18] sm:$0xff]  ;;  %7942 = vmatprep.subr.bf16.mxu1 %v11753_v8 }
   0x5   :  { %24 = vsyncpa [#allocation8], 0  ;;  %7923 = vmatpush3.bf16.msra.mxu0 %v107_v9  ;;  %v108_v11 = vpack.c.bf16 %v87_v10, %v86_v5  ;;  %v88_v12 = vld [vmem:[%s11737_s2 + $0x20] sm:$0xff]  ;;  %v89_v13 = vld [vmem:[%s11737_s2 + $0x28] sm:$0xff]  ;;  %vm9311_vm0 = vmmov 0   ;;  %v58_v20 = vlaneseq  ;;  %vm111_vm3 = vcmask 523264  }
   0x6   :  { %v57_v14 = vld [vmem:[%s11735_s0 + $0x28] sm:$0xff]  ;;  %v56_v15 = vld [vmem:[%s11735_s0 + $0x20] sm:$0xff]  ;;  %7924 = vmatprep.subr.bf16.mxu0 %v11753_v8  ;;  %v109_v16 = vpack.c.bf16 %v89_v13, %v88_v12  ;;  %7930 = vmatprep.mubr.msk.bf16.mxu0 %vm9311_vm0, %v11753_v8  ;;  %v90_v17 = vld [vmem:[%s11737_s2 + $0x30] sm:$0xff]  ;;  %vm186_vm8 = vcmask 261120   ;;  %s9312_s26 = smov 120   ;;  %s9313_s27 = smov 96  }
   0x7   :  { %70 = vperm.xlu1 %8706, %v55_v6   ;;  %64 = vperm.xlu0 %8705, %v53_v7   ;;  %v91_v18 = vld [vmem:[%s11737_s2 + $0x38] sm:$0xff]  ;;  %v9459_v21 = vand.u32 127, %v58_v20  ;;  %v178_v37 = vld [vmem:[%s11738_s3] sm:$0xff]  ;;  %s9314_s28 = smov 112   ;;  %s9315_s29 = smov 104   ;;  %vm567_vm9 = vcmask 64512  }
   0x8   :  { %7946 = vmatprep.mubr.msk.bf16.mxu1 %vm9311_vm0, %v11753_v8  ;;  %v110_v19 = vpack.c.bf16 %v91_v18, %v90_v17  ;;  %s9316_s30 = smov 64   ;;  %vm2034_vm10 = vcmask 1043456   ;;  %s9317_s0 = smov 8   ;;  %vm3260_vm11 = vcmask 130048   ;;  %vm3267_vm12 = vcmask 195584  }
   0x9   :  { %7925 = vmatpush3.bf16.msra.mxu0 %v108_v11  ;;  %11771 = vst [vmem:[#allocation12_spill] sm:$0xff] %v9459_v21  ;;  %s9318_s2 = smov 16   ;;  %s9319_s23 = smov 24   ;;  %vm7263_vm13 = vcmask 1041409   ;;  %vm7266_vm14 = vcmask 1042434   ;;  %vm7269_vm15 = vcmask 1043459  }
   0xa   :  { %7926 = vmatprep.subr.bf16.mxu0 %v11753_v8 }
   0xb   :  { %76 = vperm.xlu1 %8706, %v57_v14   ;;  %73 = vperm.xlu0 %8705, %v56_v15  }
   0xd   :  { %7927 = vmatpush3.bf16.msra.mxu0 %v109_v16 }
   0xe   :  { %7928 = vmatprep.subr.bf16.mxu0 %v11753_v8 }
  0x11   :  { %7929 = vmatpush3.bf16.msra.mxu0 %v110_v19 }
  0x12   :  { %7976 = vmatprep.subr.bf16.mxu0 %v11753_v8 }
  0x82   :  { %v62_v22 = vpop.permute.xlu0 %61  ;;  %v68_v23 = vpop.permute.xlu1 %67 }
  0x83   :  { %vm78_vm1 = vcmp.eq.s32.totalorder %v9459_v21, %v62_v22  ;;  %vm80_vm4 = vcmp.eq.s32.totalorder %v9459_v21, %v68_v23 }
  0x84   :  { %v7506_v25 = vsel %vm78_vm1, 1.0, %v11753_v8  ;;  %v7508_v29 = vsel %vm80_vm4, 1.0, %v11753_v8  ;;  %vm7272_vm1 = vcmask 1044484   ;;  %vm7393_vm4 = vcmask 9216  }
  0x86   :  { %v65_v24 = vpop.permute.xlu0 %64  ;;  %v71_v28 = vpop.permute.xlu1 %70 }
  0x87   :  { %vm79_vm2 = vcmp.eq.s32.totalorder %v9459_v21, %v65_v24  ;;  %vm81_vm5 = vcmp.eq.s32.totalorder %v9459_v21, %v71_v28 }
  0x88   :  { %v7507_v26 = vsel %vm79_vm2, 1.0, %v11753_v8  ;;  %v7509_v30 = vsel %vm81_vm5, 1.0, %v11753_v8  ;;  %vm7275_vm2 = vcmask 1045509  }
  0x89   :  { %v104_v27 = vpack.c.bf16 %v7507_v26, %v7506_v25  ;;  %v105_v33 = vpack.c.bf16 %v7509_v30, %v7508_v29 }
  0x8a   :  { %v77_v31 = vpop.permute.xlu1 %76  ;;  %v74_v32 = vpop.permute.xlu0 %73 }
  0x8b   :  { %7931 = vmatmul.mubr.msk.bf16.vlgmr.msra.gmra.mrb[0].mxu0 %vm111_vm3, %v104_v27  ;;  %vm83_vm6 = vcmp.eq.s32.totalorder %v9459_v21, %v77_v31  ;;  %vm82_vm7 = vcmp.eq.s32.totalorder %v9459_v21, %v74_v32  ;;  %v287_v32 = vld [vmem:[%s11740_s5] sm:$0xff] }
  0x8c   :  { %7934 = vmatprep.mubr.msk.bf16.mxu0 %vm9311_vm0, %v11753_v8  ;;  %v7511_v34 = vsel %vm83_vm6, 1.0, %v11753_v8  ;;  %v7510_v35 = vsel %vm82_vm7, 1.0, %v11753_v8  ;;  %vm7417_vm6 = vcmask 1024  }
  0x8d   :  { %v106_v36 = vpack.c.bf16 %v7511_v34, %v7510_v35  ;;  %v289_v35 = vld [vmem:[%s11740_s5 + $0x10] sm:$0xff] }
  0x93   :  { %7935 = vmatmul.mubr.msk.bf16.gmra.mrb[4].mxu0 %vm111_vm3, %v105_v33  ;;  %v288_v33 = vld [vmem:[%s11740_s5 + $0x8] sm:$0xff] }
  0x94   :  { %7938 = vmatprep.mubr.msk.bf16.mxu0 %vm9311_vm0, %v11753_v8  ;;  %v318_v34 = vpack.c.bf16 %v288_v33, %v287_v32 }
  0x96   :  { %7943 = vmatpush3.bf16.msra.mxu1 %v318_v34 }
  0x97   :  { %7944 = vmatprep.subr.bf16.mxu1 %v11753_v8 }
  0x9b   :  { %7939 = vmatmul.mubr.msk.bf16.gmra.mrb[8].mxu0 %vm111_vm3, %v106_v36  ;;  %v290_v36 = vld [vmem:[%s11740_s5 + $0x18] sm:$0xff]  ;;  %vm7391_vm3 = vcmask 7168  }
  0x9c   :  { %7978 = vmatprep.mubr.msk.bf16.mxu0 %vm9311_vm0, %v11753_v8 }
 0x15e   :  { %v155_v38 = vpop.f32.mrb[0].mxu0 }
 0x15f   :  { %v179_v39 = vadd.f32 %v178_v37, %v155_v38  ;;  %v7932_v40 = vpop.f32.mrb[1].mxu0 }
 0x160   :  { %v158_v41 = vpop.f32.mrb[2].mxu0 }
 0x161   :  { %v180_v42 = vadd.f32 %v178_v37, %v158_v41  ;;  %v7933_v43 = vpop.f32.mrb[3].mxu0  ;;  %v187_v44 = vsel %vm186_vm8, %v179_v39, 0.0 }
 0x162   :  { %188 = vadd.xlane.f32.xlu0 %v187_v44  ;;  %v9536_v44 = vshrl.u32 %v58_v20, 7 }
 0x163   :  { %v190_v45 = vsel %vm186_vm8, %v180_v42, 0.0 }
 0x164   :  { %191 = vadd.xlane.f32.xlu1 %v190_v45  ;;  %11772 = vst [vmem:[#allocation13_spill] sm:$0xff] %v9536_v44 }
 0x166   :  { %v163_v46 = vpop.f32.mrb[4].mxu0 }
 0x167   :  { %v181_v47 = vadd.f32 %v178_v37, %v163_v46  ;;  %v7936_v48 = vpop.f32.mrb[5].mxu0 }
 0x168   :  { %v166_v49 = vpop.f32.mrb[6].mxu0 }
 0x169   :  { %v182_v50 = vadd.f32 %v178_v37, %v166_v49  ;;  %v7937_v51 = vpop.f32.mrb[7].mxu0  ;;  %v193_v52 = vsel %vm186_vm8, %v181_v47, 0.0  ;;  %v185_v49 = vld [vmem:[%s11739_s4] sm:$0x3] }
 0x16a   :  { %194 = vadd.xlane.f32.xlu0 %v193_v52 }
 0x16b   :  { %v196_v53 = vsel %vm186_vm8, %v182_v50, 0.0 }
 0x16e   :  { %197 = vadd.xlane.f32.xlu0 %v196_v53  ;;  %v171_v54 = vpop.f32.mrb[8].mxu0  ;;  %v9546_v53 = vsub.s32 1, %v9536_v44 }
 0x16f   :  { %v183_v55 = vadd.f32 %v178_v37, %v171_v54  ;;  %v7940_v56 = vpop.f32.mrb[9].mxu0 }
 0x170   :  { %v174_v57 = vpop.f32.mrb[10].mxu0 }
 0x171   :  { %v184_v58 = vadd.f32 %v178_v37, %v174_v57  ;;  %v7941_v59 = vpop.f32.mrb[11].mxu0  ;;  %v199_v60 = vsel %vm186_vm8, %v183_v55, 0.0  ;;  %v319_v37 = vpack.c.bf16 %v290_v36, %v289_v35 }
 0x172   :  { %200 = vadd.xlane.f32.xlu1 %v199_v60 }
 0x173   :  { %v202_v61 = vsel %vm186_vm8, %v184_v58, 0.0  ;;  %7945 = vmatpush3.bf16.msra.mxu1 %v319_v37 }
 0x174   :  { %203 = vadd.xlane.f32.xlu0 %v202_v61  ;;  %7958 = vmatprep.subr.bf16.mxu1 %v11753_v8 }
 0x1ef   :  { %v189_v62 = vpop.xlane.xlu0 %188 }
 0x1f0   :  { %v206_v63 = vmul.f32 0.03125, %v189_v62  ;;  %v279_v62 = vrot.slane %v185_v49, %v9546_v53 }
 0x1f1   :  { %v192_v0 = vpop.xlane.xlu1 %191 }
 0x1f2   :  { %v9491_v1 = vsub.f32 %v179_v39, %v206_v63  ;;  %v207_v3 = vmul.f32 0.03125, %v192_v0 }
 0x1f4   :  { %v9493_v4 = vsub.f32 %v180_v42, %v207_v3  ;;  %v218_v5 = vmul.f32 %v9491_v1, %v9491_v1 }
 0x1f6   :  { %v224_v6 = vsel %vm186_vm8, %v218_v5, 0.0  ;;  %v219_v7 = vmul.f32 %v9493_v4, %v9493_v4 }
 0x1f7   :  { %225 = vadd.xlane.f32.xlu1 %v224_v6  ;;  %v195_v9 = vpop.xlane.xlu0 %194 }
 0x1f8   :  { %v208_v10 = vmul.f32 0.03125, %v195_v9  ;;  %v227_v11 = vsel %vm186_vm8, %v219_v7, 0.0 }
 0x1f9   :  { %228 = vadd.xlane.f32.xlu0 %v227_v11 }
 0x1fa   :  { %v9501_v12 = vsub.f32 %v181_v47, %v208_v10  ;;  %v9539_v47 = vsub.s32 0, %v9536_v44 }
 0x1fb   :  { %v198_v13 = vpop.xlane.xlu0 %197 }
 0x1fc   :  { %v209_v14 = vmul.f32 0.03125, %v198_v13  ;;  %v220_v15 = vmul.f32 %v9501_v12, %v9501_v12  ;;  %11773 = vst [vmem:[#allocation14_spill] sm:$0xff] %v9539_v47  ;;  %v269_v52 = vrot.slane %v185_v49, %v9539_v47 }
 0x1fe   :  { %v9505_v16 = vsub.f32 %v182_v50, %v209_v14  ;;  %v230_v17 = vsel %vm186_vm8, %v220_v15, 0.0 }
 0x1ff   :  { %v201_v18 = vpop.xlane.xlu1 %200  ;;  %231 = vadd.xlane.f32.xlu1 %v230_v17 }
 0x200   :  { %v210_v19 = vmul.f32 0.03125, %v201_v18  ;;  %v221_v22 = vmul.f32 %v9505_v16, %v9505_v16 }
 0x201   :  { %v204_v23 = vpop.xlane.xlu0 %203 }
 0x202   :  { %v9510_v24 = vsub.f32 %v183_v55, %v210_v19  ;;  %v211_v25 = vmul.f32 0.03125, %v204_v23  ;;  %v233_v26 = vsel %vm186_vm8, %v221_v22, 0.0 }
 0x203   :  { %234 = vadd.xlane.f32.xlu0 %v233_v26 }
 0x204   :  { %v9513_v27 = vsub.f32 %v184_v58, %v211_v25  ;;  %v222_v28 = vmul.f32 %v9510_v24, %v9510_v24 }
 0x206   :  { %v236_v29 = vsel %vm186_vm8, %v222_v28, 0.0  ;;  %v223_v30 = vmul.f32 %v9513_v27, %v9513_v27 }
 0x207   :  { %237 = vadd.xlane.f32.xlu1 %v236_v29 }
 0x208   :  { %v239_v31 = vsel %vm186_vm8, %v223_v30, 0.0 }
 0x209   :  { %240 = vadd.xlane.f32.xlu0 %v239_v31 }
 0x284   :  { %v226_v38 = vpop.xlane.xlu1 %225 }
 0x285   :  { %v242_v39 = vmul.f32 0.03125, %v226_v38 }
 0x286   :  { %v229_v40 = vpop.xlane.xlu0 %228 }
 0x287   :  { %v248_v41 = vadd.f32 1e-12, %v242_v39  ;;  %v243_v42 = vmul.f32 0.03125, %v229_v40 }
 0x289   :  { %8977 = vrsqrt.f32 %v248_v41  ;;  %v249_v43 = vadd.f32 1e-12, %v243_v42 }
 0x28b   :  { %8979 = vrsqrt.f32 %v249_v43 }
 0x28c   :  { %v232_v45 = vpop.xlane.xlu1 %231 }
 0x28d   :  { %v244_v46 = vmul.f32 0.03125, %v232_v45 }
 0x28f   :  { %v250_v48 = vadd.f32 1e-12, %v244_v46 }
 0x290   :  { %v235_v50 = vpop.xlane.xlu0 %234 }
 0x291   :  { %8981 = vrsqrt.f32 %v250_v48  ;;  %v245_v51 = vmul.f32 0.03125, %v235_v50 }
 0x293   :  { %v8978_v20 = vpop.eup %8977  ;;  %v251_v54 = vadd.f32 1e-12, %v245_v51 }
 0x294   :  { %v238_v55 = vpop.xlane.xlu1 %237  ;;  %v260_v56 = vmul.f32 %v8978_v20, %v9491_v1 }
 0x295   :  { %v8980_v57 = vpop.eup %8979  ;;  %8983 = vrsqrt.f32 %v251_v54  ;;  %v246_v58 = vmul.f32 0.03125, %v238_v55 }
 0x296   :  { %v241_v59 = vpop.xlane.xlu0 %240  ;;  %v261_v60 = vmul.f32 %v8980_v57, %v9493_v4  ;;  %v270_v61 = vmul.f32 %v269_v52, %v260_v56 }
 0x297   :  { %v252_v63 = vadd.f32 1e-12, %v246_v58  ;;  %v247_v0 = vmul.f32 0.03125, %v241_v59 }
 0x298   :  { %v271_v3 = vmul.f32 %v269_v52, %v261_v60  ;;  %v9551_v6 = vadd.f32 %v279_v62, %v270_v61 }
 0x299   :  { %8985 = vrsqrt.f32 %v252_v63  ;;  %v253_v5 = vadd.f32 1e-12, %v247_v0 }
 0x29a   :  { %v9553_v7 = vadd.f32 %v279_v62, %v271_v3 }
 0x29b   :  { %v8982_v9 = vpop.eup %8981  ;;  %8987 = vrsqrt.f32 %v253_v5 }
 0x29c   :  { %v315_v1 = vpack.c.bf16 %v9553_v7, %v9551_v6  ;;  %v262_v10 = vmul.f32 %v8982_v9, %v9501_v12 }
 0x29e   :  { %7947 = vmatmul.mubr.msk.bf16.vlgmr.msra.gmra.mrb[0].mxu1 %vm186_vm8, %v315_v1  ;;  %v272_v13 = vmul.f32 %v269_v52, %v262_v10 }
 0x29f   :  { %v8984_v4 = vpop.eup %8983  ;;  %7950 = vmatprep.mubr.msk.bf16.mxu1 %vm9311_vm0, %v11753_v8 }
 0x2a0   :  { %v263_v11 = vmul.f32 %v8984_v4, %v9505_v16  ;;  %v9562_v17 = vadd.f32 %v279_v62, %v272_v13 }
 0x2a2   :  { %v273_v14 = vmul.f32 %v269_v52, %v263_v11 }
 0x2a3   :  { %v8986_v15 = vpop.eup %8985 }
 0x2a4   :  { %v9564_v18 = vadd.f32 %v279_v62, %v273_v14  ;;  %v264_v19 = vmul.f32 %v8986_v15, %v9510_v24 }
 0x2a5   :  { %v8988_v22 = vpop.eup %8987 }
 0x2a6   :  { %11774 = vst [vmem:[#allocation15_spill] sm:$0xff] %v9564_v18  ;;  %v316_v12 = vpack.c.bf16 %v9564_v18, %v9562_v17  ;;  %v265_v23 = vmul.f32 %v8988_v22, %v9513_v27  ;;  %v274_v25 = vmul.f32 %v269_v52, %v264_v19  ;;  %v286_v27 = vld [vmem:[%s11744_s9] sm:$0xff] }
 0x2a7   :  { %v323_v29 = vrot.slane %v286_v27, %v9539_v47 }
 0x2a8   :  { %7951 = vmatmul.mubr.msk.bf16.gmra.mrb[4].mxu1 %vm186_vm8, %v316_v12  ;;  %v275_v26 = vmul.f32 %v269_v52, %v265_v23  ;;  %v9575_v28 = vadd.f32 %v279_v62, %v274_v25 }
 0x2a9   :  { %7954 = vmatprep.mubr.msk.bf16.mxu1 %vm9311_vm0, %v11753_v8 }
 0x2aa   :  { %v9573_v16 = vadd.f32 %v279_v62, %v275_v26  ;;  %11776 = vst [vmem:[#allocation17_spill] sm:$0xff] %v9575_v28 }
 0x2ac   :  { %11775 = vst [vmem:[#allocation16_spill] sm:$0xff] %v9573_v16  ;;  %v317_v24 = vpack.c.bf16 %v9573_v16, %v9575_v28 }
 0x2b0   :  { %7955 = vmatmul.mubr.msk.bf16.gmra.mrb[8].mxu1 %vm186_vm8, %v317_v24 }
 0x2b1   :  { %7960 = vmatprep.mubr.msk.bf16.mxu1 %vm9311_vm0, %v11753_v8 }
 0x371   :  { %v367_v30 = vpop.f32.mrb[0].mxu1 }
 0x372   :  { %v7948_v31 = vpop.f32.mrb[1].mxu1  ;;  %v368_v32 = vadd.f32 %v367_v30, %v323_v29 }
 0x373   :  { %v370_v33 = vpop.f32.mrb[2].mxu1 }
 0x374   :  { %v371_v34 = vadd.f32 %v370_v33, %v323_v29  ;;  %v7949_v35 = vpop.f32.mrb[3].mxu1  ;;  %v9586_v37 = vmul.f32 0.35355338, %v368_v32  ;;  %v9604_v54 = vpack.c.bf16 %v368_v32, %v368_v32 }
 0x376   :  { %v8707_v36 = vpack.i.bf16 %v371_v34, %v368_v32  ;;  %v9588_v38 = vmul.f32 0.35355338, %v371_v34  ;;  %v9608_v59 = vpack.c.bf16 %v371_v34, %v371_v34  ;;  %v516_v30 = vpack.c.bf16 %v9586_v37, %v9586_v37 }
 0x378   :  { %8708 = vrot.lane.b32.xlu1 %v8707_v36, %s9312_s26  ;;  %v9593_v39 = vpack.i.bf16 %v9588_v38, %v9586_v37 }
 0x37b   :  { %v375_v40 = vpop.f32.mrb[4].mxu1 }
 0x37c   :  { %v7952_v41 = vpop.f32.mrb[5].mxu1  ;;  %v376_v42 = vadd.f32 %v375_v40, %v323_v29 }
 0x37d   :  { %v378_v43 = vpop.f32.mrb[6].mxu1 }
 0x37e   :  { %v379_v45 = vadd.f32 %v378_v43, %v323_v29  ;;  %v7953_v46 = vpop.f32.mrb[7].mxu1  ;;  %v9595_v49 = vmul.f32 0.35355338, %v376_v42  ;;  %v9621_v0 = vpack.c.bf16 %v376_v42, %v376_v42  ;;  %v517_v43 = vpack.c.bf16 %v9588_v38, %v9588_v38 }
 0x380   :  { %v8712_v48 = vpack.i.bf16 %v379_v45, %v376_v42  ;;  %v9597_v50 = vmul.f32 0.35355338, %v379_v45  ;;  %v9633_v5 = vpack.c.bf16 %v379_v45, %v379_v45 }
 0x382   :  { %8713 = vrot.lane.b32.xlu0 %v8712_v48, %s9312_s26  ;;  %v9602_v52 = vpack.i.bf16 %v9597_v50, %v9595_v49 }
 0x383   :  { %v383_v51 = vpop.f32.mrb[8].mxu1 }
 0x384   :  { %v7956_v20 = vpop.f32.mrb[9].mxu1  ;;  %v384_v55 = vadd.f32 %v383_v51, %v323_v29 }
 0x385   :  { %v386_v56 = vpop.f32.mrb[10].mxu1 }
 0x386   :  { %v387_v57 = vadd.f32 %v386_v56, %v323_v29  ;;  %565 = vrot.lane.b32.xlu0 %v9604_v54, %s9313_s27  ;;  %v7957_v58 = vpop.f32.mrb[11].mxu1  ;;  %v9610_v61 = vmul.f32 0.35355338, %v384_v55  ;;  %v9637_v9 = vpack.c.bf16 %v384_v55, %v384_v55 }
 0x388   :  { %v8717_v60 = vpack.i.bf16 %v387_v57, %v384_v55  ;;  %v9612_v62 = vmul.f32 0.35355338, %v387_v57  ;;  %v9628_v3 = vpack.c.bf16 %v387_v57, %v387_v57 }
 0x38a   :  { %615 = vrot.lane.b32.xlu0 %v9608_v59, %s9313_s27  ;;  %8718 = vrot.lane.b32.xlu1 %v8717_v60, %s9312_s26  ;;  %v9619_v63 = vpack.i.bf16 %v9612_v62, %v9610_v61 }
 0x38e   :  { %664 = vrot.lane.b32.xlu0 %v9621_v0, %s9313_s27  ;;  %8723 = vrot.lane.b32.xlu1 %v8707_v36, %s9314_s28 }
 0x392   :  { %8738 = vrot.lane.b32.xlu0 %v8707_v36, %s9315_s29  ;;  %8728 = vrot.lane.b32.xlu1 %v8712_v48, %s9314_s28 }
 0x396   :  { %8733 = vrot.lane.b32.xlu1 %v8717_v60, %s9314_s28  ;;  %811 = vrot.lane.b32.xlu0 %v9628_v3, %s9313_s27 }
 0x39a   :  { %713 = vrot.lane.b32.xlu1 %v9633_v5, %s9313_s27 }
 0x39e   :  { %762 = vrot.lane.b32.xlu1 %v9637_v9, %s9313_s27 }
 0x3a2   :  { %8743 = vrot.lane.b32.xlu1 %v8712_v48, %s9315_s29 }
 0x3ea   :  { %v8709_v1 = vpop.permute.xlu1 %8708 }
 0x3eb   :  { %v8711_v10 = vunpack.i.h.bf16 %v8709_v1  ;;  %v8710_v4 = vunpack.i.l.bf16 %v8709_v1  ;;  %v518_v1 = vpack.c.bf16 %v9595_v49, %v9595_v49  ;;  %v519_v49 = vpack.c.bf16 %v9597_v50, %v9597_v50 }
 0x3ec   :  { %v520_v50 = vpack.c.bf16 %v9610_v61, %v9610_v61 }
 0x3ed   :  { %v9642_v11 = vpack.c.bf16 %v8711_v10, %v8711_v10  ;;  %v9644_v13 = vpack.c.bf16 %v8710_v4, %v8710_v4 }
 0x3ef   :  { %909 = vrot.lane.b32.xlu1 %v9642_v11, %s9313_s27  ;;  %860 = vrot.lane.b32.xlu0 %v9644_v13, %s9313_s27 }
 0x3f3   :  { %8753 = vrot.lane.b32.xlu1 %v9593_v39, %s9312_s26  ;;  %8748 = vrot.lane.b32.xlu0 %v8717_v60, %s9315_s29 }
 0x3f4   :  { %v8714_v14 = vpop.permute.xlu0 %8713 }
 0x3f5   :  { %v8716_v15 = vunpack.i.h.bf16 %v8714_v14  ;;  %v8715_v19 = vunpack.i.l.bf16 %v8714_v14 }
 0x3f7   :  { %v9653_v22 = vpack.c.bf16 %v8716_v15, %v8716_v15  ;;  %v9655_v12 = vpack.c.bf16 %v8715_v19, %v8715_v19 }
 0x3f8   :  { %v566_v23 = vpop.permute.xlu0 %565 }
 0x3f9   :  { %v572_v25 = vsel %vm567_vm9, %v566_v23, 0  ;;  %1007 = vrot.lane.b32.xlu1 %v9653_v22, %s9313_s27  ;;  %958 = vrot.lane.b32.xlu0 %v9655_v12, %s9313_s27 }
 0x3fa   :  { %7959 = vmatpush3.bf16.xpose.msra.mxu1 %v572_v25 }
 0x3fb   :  { %7964 = vmatprep.subr.bf16.mxu1 %v11753_v8 }
 0x3fc   :  { %v8719_v26 = vpop.permute.xlu1 %8718  ;;  %v616_v29 = vpop.permute.xlu0 %615 }
 0x3fd   :  { %v8721_v24 = vunpack.i.h.bf16 %v8719_v26  ;;  %v8720_v27 = vunpack.i.l.bf16 %v8719_v26  ;;  %8758 = vrot.lane.b32.xlu0 %v9602_v52, %s9312_s26  ;;  %v621_v34 = vsel %vm567_vm9, %v616_v29, 0 }
 0x3ff   :  { %v9667_v31 = vpack.c.bf16 %v8720_v27, %v8720_v27  ;;  %v9669_v32 = vpack.c.bf16 %v8721_v24, %v8721_v24 }
 0x400   :  { %v8724_v33 = vpop.permute.xlu1 %8723  ;;  %v665_v41 = vpop.permute.xlu0 %664 }
 0x401   :  { %v8725_v35 = vunpack.i.l.bf16 %v8724_v33  ;;  %7961 = vmatmul.mubr.msk.bf16.vlgmr.msra.gmra.mrb[12].mxu1 %vm567_vm9, %v516_v30  ;;  %1056 = vrot.lane.b32.xlu1 %v9667_v31, %s9313_s27  ;;  %v8726_v36 = vunpack.i.h.bf16 %v8724_v33  ;;  %v670_v51 = vsel %vm567_vm9, %v665_v41, 0  ;;  %v521_v33 = vpack.c.bf16 %v9612_v62, %v9612_v62 }
 0x402   :  { %1105 = vrot.lane.b32.xlu0 %v9669_v32, %s9313_s27  ;;  %7965 = vmatpush3.bf16.xpose.msra.mxu1 %v621_v34 }
 0x403   :  { %v9677_v40 = vpack.c.bf16 %v8725_v35, %v8725_v35  ;;  %7966 = vmatprep.mubr.msk.bf16.mxu1 %vm9311_vm0, %v11753_v8  ;;  %7970 = vmatprep.subr.bf16.mxu1 %v11753_v8  ;;  %v9688_v45 = vpack.c.bf16 %v8726_v36, %v8726_v36 }
 0x404   :  { %v8729_v37 = vpop.permute.xlu1 %8728  ;;  %v8739_v38 = vpop.permute.xlu0 %8738 }
 0x405   :  { %8763 = vrot.lane.b32.xlu1 %v9619_v63, %s9312_s26  ;;  %v8730_v42 = vunpack.i.l.bf16 %v8729_v37  ;;  %v8731_v46 = vunpack.i.h.bf16 %v8729_v37  ;;  %v8740_v19 = vunpack.i.l.bf16 %v8739_v38  ;;  %v8741_v25 = vunpack.i.h.bf16 %v8739_v38 }
 0x406   :  { %1154 = vrot.lane.b32.xlu0 %v9677_v40, %s9313_s27 }
 0x407   :  { %v9696_v20 = vpack.c.bf16 %v8730_v42, %v8730_v42  ;;  %v9701_v57 = vpack.c.bf16 %v8731_v46, %v8731_v46  ;;  %v9734_v27 = vpack.c.bf16 %v8740_v19, %v8740_v19  ;;  %v9739_v30 = vpack.c.bf16 %v8741_v25, %v8741_v25 }
 0x408   :  { %v8734_v48 = vpop.permute.xlu1 %8733  ;;  %v812_v15 = vpop.permute.xlu0 %811 }
 0x409   :  { %7967 = vmatmul.mubr.msk.bf16.vlgmr.msra.gmra.mrb[16].mxu1 %vm567_vm9, %v517_v43  ;;  %1203 = vrot.lane.b32.xlu1 %v9688_v45, %s9313_s27  ;;  %v8735_v55 = vunpack.i.l.bf16 %v8734_v48  ;;  %v8736_v60 = vunpack.i.h.bf16 %v8734_v48  ;;  %v817_v26 = vsel %vm567_vm9, %v812_v15, 0 }
 0x40a   :  { %8768 = vrot.lane.b32.xlu0 %v9593_v39, %s9314_s28  ;;  %7971 = vmatpush3.bf16.xpose.msra.mxu1 %v670_v51 }
 0x40b   :  { %7972 = vmatprep.mubr.msk.bf16.mxu1 %vm9311_vm0, %v11753_v8  ;;  %7982 = vmatprep.subr.bf16.mxu1 %v11753_v8  ;;  %v9711_v4 = vpack.c.bf16 %v8735_v55, %v8735_v55  ;;  %v9721_v23 = vpack.c.bf16 %v8736_v60, %v8736_v60 }
 0x40c   :  { %v714_v56 = vpop.permute.xlu1 %713 }
 0x40d   :  { %v719_v58 = vsel %vm567_vm9, %v714_v56, 0  ;;  %1252 = vrot.lane.b32.xlu1 %v9696_v20, %s9313_s27 }
 0x40e   :  { %1301 = vrot.lane.b32.xlu0 %v9701_v57, %s9313_s27  ;;  %7977 = vmatpush3.bf16.xpose.msra.mxu0 %v719_v58 }
 0x40f   :  { %7988 = vmatprep.subr.bf16.mxu0 %v11753_v8 }
 0x410   :  { %v763_v10 = vpop.permute.xlu1 %762 }
 0x411   :  { %v768_v14 = vsel %vm567_vm9, %v763_v10, 0  ;;  %7973 = vmatmul.mubr.msk.bf16.vlgmr.msra.gmra.mrb[20].mxu1 %vm567_vm9, %v518_v1  ;;  %8773 = vrot.lane.b32.xlu1 %v9602_v52, %s9314_s28 }
 0x412   :  { %1350 = vrot.lane.b32.xlu0 %v9711_v4, %s9313_s27  ;;  %7983 = vmatpush3.bf16.xpose.msra.mxu1 %v768_v14 }
 0x413   :  { %7984 = vmatprep.mubr.msk.bf16.mxu1 %vm9311_vm0, %v11753_v8  ;;  %7994 = vmatprep.subr.bf16.mxu1 %v11753_v8 }
 0x414   :  { %v8744_v24 = vpop.permute.xlu1 %8743 }
 0x415   :  { %7979 = vmatmul.mubr.msk.bf16.vlgmr.msra.gmra.mrb[12].mxu0 %vm567_vm9, %v519_v49  ;;  %1399 = vrot.lane.b32.xlu1 %v9721_v23, %s9313_s27  ;;  %v8745_v29 = vunpack.i.l.bf16 %v8744_v24  ;;  %v8746_v61 = vunpack.i.h.bf16 %v8744_v24 }
 0x416   :  { %8778 = vrot.lane.b32.xlu0 %v9619_v63, %s9314_s28  ;;  %7989 = vmatpush3.bf16.xpose.msra.mxu0 %v817_v26 }
 0x417   :  { %7990 = vmatprep.mubr.msk.bf16.mxu0 %vm9311_vm0, %v11753_v8  ;;  %8000 = vmatprep.subr.bf16.mxu0 %v11753_v8  ;;  %v9750_v34 = vpack.c.bf16 %v8745_v29, %v8745_v29  ;;  %v9759_v35 = vpack.c.bf16 %v8746_v61, %v8746_v61 }
 0x419   :  { %7985 = vmatmul.mubr.msk.bf16.vlgmr.msra.gmra.mrb[24].mxu1 %vm567_vm9, %v520_v50  ;;  %1448 = vrot.lane.b32.xlu1 %v9734_v27, %s9313_s27 }
 0x41a   :  { %1497 = vrot.lane.b32.xlu0 %v9739_v30, %s9313_s27  ;;  %7996 = vmatprep.mubr.msk.bf16.mxu1 %vm9311_vm0, %v11753_v8 }
 0x41d   :  { %7991 = vmatmul.mubr.msk.bf16.vlgmr.msra.gmra.mrb[16].mxu0 %vm567_vm9, %v521_v33  ;;  %8783 = vrot.lane.b32.xlu1 %v9593_v39, %s9315_s29 }
 0x41e   :  { %1546 = vrot.lane.b32.xlu0 %v9750_v34, %s9313_s27  ;;  %8002 = vmatprep.mubr.msk.bf16.mxu0 %vm9311_vm0, %v11753_v8 }
 0x421   :  { %1595 = vrot.lane.b32.xlu1 %v9759_v35, %s9313_s27 }
 0x422   :  { %8788 = vrot.lane.b32.xlu0 %v9602_v52, %s9315_s29 }
 0x461   :  { %v910_v62 = vpop.permute.xlu1 %909  ;;  %v861_v36 = vpop.permute.xlu0 %860 }
 0x462   :  { %v915_v37 = vsel %vm567_vm9, %v910_v62, 0  ;;  %v866_v39 = vsel %vm567_vm9, %v861_v36, 0 }
 0x463   :  { %7995 = vmatpush3.bf16.xpose.msra.mxu1 %v866_v39  ;;  %8001 = vmatpush3.bf16.xpose.msra.mxu0 %v915_v37 }
 0x464   :  { %8006 = vmatprep.subr.bf16.mxu1 %v11753_v8  ;;  %8012 = vmatprep.subr.bf16.mxu0 %v11753_v8 }
 0x465   :  { %v8754_v41 = vpop.permute.xlu1 %8753  ;;  %v8749_v42 = vpop.permute.xlu0 %8748 }
 0x466   :  { %v8756_v43 = vunpack.i.h.bf16 %v8754_v41  ;;  %v8755_v46 = vunpack.i.l.bf16 %v8754_v41  ;;  %v8751_v48 = vunpack.i.h.bf16 %v8749_v42  ;;  %v8750_v51 = vunpack.i.l.bf16 %v8749_v42 }
 0x468   :  { %v523_v38 = vpack.c.bf16 %v8756_v43, %v8756_v43  ;;  %v522_v52 = vpack.c.bf16 %v8755_v46, %v8755_v46  ;;  %v9769_v55 = vpack.c.bf16 %v8750_v51, %v8750_v51  ;;  %v9771_v56 = vpack.c.bf16 %v8751_v48, %v8751_v48 }
 0x46a   :  { %7997 = vmatmul.mubr.msk.bf16.vlgmr.msra.gmra.mrb[28].mxu1 %vm567_vm9, %v522_v52  ;;  %8003 = vmatmul.mubr.msk.bf16.vlgmr.msra.gmra.mrb[20].mxu0 %vm567_vm9, %v523_v38 }
 0x46b   :  { %1644 = vrot.lane.b32.xlu1 %v9769_v55, %s9313_s27  ;;  %1693 = vrot.lane.b32.xlu0 %v9771_v56, %s9313_s27  ;;  %v1008_v58 = vpop.permute.xlu1 %1007  ;;  %v959_v60 = vpop.permute.xlu0 %958 }
 0x46c   :  { %v1013_v1 = vsel %vm567_vm9, %v1008_v58, 0  ;;  %v964_v10 = vsel %vm567_vm9, %v959_v60, 0  ;;  %8008 = vmatprep.mubr.msk.bf16.mxu1 %vm9311_vm0, %v11753_v8  ;;  %8014 = vmatprep.mubr.msk.bf16.mxu0 %vm9311_vm0, %v11753_v8 }
 0x46d   :  { %8007 = vmatpush3.bf16.xpose.msra.mxu1 %v964_v10  ;;  %8013 = vmatpush3.bf16.xpose.msra.mxu0 %v1013_v1 }
 0x46e   :  { %8018 = vmatprep.subr.bf16.mxu1 %v11753_v8  ;;  %8024 = vmatprep.subr.bf16.mxu0 %v11753_v8 }
 0x46f   :  { %8793 = vrot.lane.b32.xlu1 %v9619_v63, %s9315_s29  ;;  %2078 = vrot.lane.b32.xlu0 %v9608_v59, %s9316_s30  ;;  %v8759_v14 = vpop.permute.xlu0 %8758 }
 0x470   :  { %v8761_v15 = vunpack.i.h.bf16 %v8759_v14  ;;  %v8760_v19 = vunpack.i.l.bf16 %v8759_v14 }
 0x472   :  { %v525_v49 = vpack.c.bf16 %v8761_v15, %v8761_v15  ;;  %v524_v25 = vpack.c.bf16 %v8760_v19, %v8760_v19 }
 0x473   :  { %2029 = vrot.lane.b32.xlu1 %v9604_v54, %s9316_s30  ;;  %2174 = vrot.lane.b32.xlu0 %v9633_v5, %s9316_s30  ;;  %v1057_v26 = vpop.permute.xlu1 %1056 }
 0x474   :  { %v1062_v24 = vsel %vm567_vm9, %v1057_v26, 0  ;;  %v1106_v50 = vpop.permute.xlu0 %1105  ;;  %8009 = vmatmul.mubr.msk.bf16.vlgmr.msra.gmra.mrb[32].mxu1 %vm567_vm9, %v524_v25  ;;  %8015 = vmatmul.mubr.msk.bf16.vlgmr.msra.gmra.mrb[24].mxu0 %vm567_vm9, %v525_v49 }
 0x475   :  { %v1111_v59 = vsel %vm567_vm9, %v1106_v50, 0  ;;  %8019 = vmatpush3.bf16.xpose.msra.mxu1 %v1062_v24  ;;  %8020 = vmatprep.mubr.msk.bf16.mxu1 %vm9311_vm0, %v11753_v8 }
 0x476   :  { %8025 = vmatpush3.bf16.xpose.msra.mxu0 %v1111_v59  ;;  %8026 = vmatprep.mubr.msk.bf16.mxu0 %vm9311_vm0, %v11753_v8 }
 0x477   :  { %2126 = vrot.lane.b32.xlu1 %v9621_v0, %s9316_s30  ;;  %2270 = vrot.lane.b32.xlu0 %v9628_v3, %s9316_s30  ;;  %v8764_v54 = vpop.permute.xlu1 %8763 }
 0x478   :  { %v8766_v63 = vunpack.i.h.bf16 %v8764_v54  ;;  %v8765_v5 = vunpack.i.l.bf16 %v8764_v54  ;;  %v1155_v29 = vpop.permute.xlu0 %1154  ;;  %8030 = vmatprep.subr.bf16.mxu1 %v11753_v8  ;;  %8036 = vmatprep.subr.bf16.mxu0 %v11753_v8 }
 0x479   :  { %v1160_v62 = vsel %vm567_vm9, %v1155_v29, 0 }
 0x47a   :  { %v527_v61 = vpack.c.bf16 %v8766_v63, %v8766_v63  ;;  %v526_v33 = vpack.c.bf16 %v8765_v5, %v8765_v5 }
 0x47b   :  { %2222 = vrot.lane.b32.xlu1 %v9637_v9, %s9316_s30  ;;  %2366 = vrot.lane.b32.xlu0 %v9642_v11, %s9316_s30  ;;  %v1204_v0 = vpop.permute.xlu1 %1203 }
 0x47c   :  { %v1209_v3 = vsel %vm567_vm9, %v1204_v0, 0  ;;  %v8769_v36 = vpop.permute.xlu0 %8768  ;;  %8021 = vmatmul.mubr.msk.bf16.vlgmr.msra.gmra.mrb[36].mxu1 %vm567_vm9, %v526_v33 }
 0x47d   :  { %8027 = vmatmul.mubr.msk.bf16.vlgmr.msra.gmra.mrb[28].mxu0 %vm567_vm9, %v527_v61  ;;  %8031 = vmatpush3.bf16.xpose.msra.mxu1 %v1160_v62  ;;  %v8770_v37 = vunpack.i.l.bf16 %v8769_v36  ;;  %v8771_v9 = vunpack.i.h.bf16 %v8769_v36 }
 0x47e   :  { %8037 = vmatpush3.bf16.xpose.msra.mxu0 %v1209_v3  ;;  %8032 = vmatprep.mubr.msk.bf16.mxu1 %vm9311_vm0, %v11753_v8 }
 0x47f   :  { %2318 = vrot.lane.b32.xlu1 %v9644_v13, %s9316_s30  ;;  %2462 = vrot.lane.b32.xlu0 %v9653_v22, %s9316_s30  ;;  %v1253_v11 = vpop.permute.xlu1 %1252  ;;  %v528_v41 = vpack.c.bf16 %v8770_v37, %v8770_v37  ;;  %v529_v42 = vpack.c.bf16 %v8771_v9, %v8771_v9 }
 0x480   :  { %v1302_v39 = vpop.permute.xlu0 %1301  ;;  %8038 = vmatprep.mubr.msk.bf16.mxu0 %vm9311_vm0, %v11753_v8  ;;  %8042 = vmatprep.subr.bf16.mxu1 %v11753_v8  ;;  %v1258_v22 = vsel %vm567_vm9, %v1253_v11, 0 }
 0x481   :  { %8048 = vmatprep.subr.bf16.mxu0 %v11753_v8  ;;  %v1307_v46 = vsel %vm567_vm9, %v1302_v39, 0 }
 0x483   :  { %2414 = vrot.lane.b32.xlu1 %v9655_v12, %s9316_s30  ;;  %2654 = vrot.lane.b32.xlu0 %v9688_v45, %s9316_s30  ;;  %v8774_v13 = vpop.permute.xlu1 %8773 }
 0x484   :  { %v1351_v43 = vpop.permute.xlu0 %1350  ;;  %8033 = vmatmul.mubr.msk.bf16.vlgmr.msra.gmra.mrb[40].mxu1 %vm567_vm9, %v528_v41  ;;  %v8775_v48 = vunpack.i.l.bf16 %v8774_v13  ;;  %v8776_v12 = vunpack.i.h.bf16 %v8774_v13 }
 0x485   :  { %8039 = vmatmul.mubr.msk.bf16.vlgmr.msra.gmra.mrb[32].mxu0 %vm567_vm9, %v529_v42  ;;  %8043 = vmatpush3.bf16.xpose.msra.mxu1 %v1258_v22 }
 0x486   :  { %8049 = vmatpush3.bf16.xpose.msra.mxu0 %v1307_v46  ;;  %8044 = vmatprep.mubr.msk.bf16.mxu1 %vm9311_vm0, %v11753_v8  ;;  %v530_v38 = vpack.c.bf16 %v8775_v48, %v8775_v48  ;;  %v531_v52 = vpack.c.bf16 %v8776_v12, %v8776_v12 }
 0x487   :  { %2510 = vrot.lane.b32.xlu1 %v9667_v31, %s9316_s30  ;;  %2750 = vrot.lane.b32.xlu0 %v9701_v57, %s9316_s30  ;;  %v1400_v45 = vpop.permute.xlu1 %1399  ;;  %v1356_v31 = vsel %vm567_vm9, %v1351_v43, 0 }
 0x488   :  { %8050 = vmatprep.mubr.msk.bf16.mxu0 %vm9311_vm0, %v11753_v8  ;;  %8054 = vmatprep.subr.bf16.mxu1 %v11753_v8  ;;  %v8779_v51 = vpop.permute.xlu0 %8778  ;;  %v1405_v57 = vsel %vm567_vm9, %v1400_v45, 0 }
 0x489   :  { %8060 = vmatprep.subr.bf16.mxu0 %v11753_v8  ;;  %v8780_v60 = vunpack.i.l.bf16 %v8779_v51  ;;  %v8781_v1 = vunpack.i.h.bf16 %v8779_v51 }
 0x48b   :  { %2606 = vrot.lane.b32.xlu1 %v9677_v40, %s9316_s30  ;;  %2558 = vrot.lane.b32.xlu0 %v9669_v32, %s9316_s30  ;;  %v1449_v58 = vpop.permute.xlu1 %1448  ;;  %v532_v32 = vpack.c.bf16 %v8780_v60, %v8780_v60  ;;  %v533_v10 = vpack.c.bf16 %v8781_v1, %v8781_v1 }
 0x48c   :  { %8045 = vmatmul.mubr.msk.bf16.vlgmr.msra.gmra.mrb[44].mxu1 %vm567_vm9, %v530_v38  ;;  %v1498_v40 = vpop.permute.xlu0 %1497  ;;  %v1454_v15 = vsel %vm567_vm9, %v1449_v58, 0 }
 0x48d   :  { %8051 = vmatmul.mubr.msk.bf16.vlgmr.msra.gmra.mrb[36].mxu0 %vm567_vm9, %v531_v52  ;;  %8055 = vmatpush3.bf16.xpose.msra.mxu1 %v1356_v31  ;;  %v1503_v19 = vsel %vm567_vm9, %v1498_v40, 0 }
 0x48e   :  { %8061 = vmatpush3.bf16.xpose.msra.mxu0 %v1405_v57  ;;  %8056 = vmatprep.mubr.msk.bf16.mxu1 %vm9311_vm0, %v11753_v8 }
 0x48f   :  { %2702 = vrot.lane.b32.xlu1 %v9696_v20, %s9316_s30  ;;  %8062 = vmatprep.mubr.msk.bf16.mxu0 %vm9311_vm0, %v11753_v8  ;;  %v8784_v14 = vpop.permute.xlu1 %8783 }
 0x490   :  { %8066 = vmatprep.subr.bf16.mxu1 %v11753_v8  ;;  %8072 = vmatprep.subr.bf16.mxu0 %v11753_v8  ;;  %v1547_v20 = vpop.permute.xlu0 %1546  ;;  %v8785_v49 = vunpack.i.l.bf16 %v8784_v14  ;;  %v8786_v25 = vunpack.i.h.bf16 %v8784_v14 }
 0x491   :  { %v1552_v59 = vsel %vm567_vm9, %v1547_v20, 0 }
 0x492   :  { %v535_v24 = vpack.c.bf16 %v8786_v25, %v8786_v25 }
 0x493   :  { %2798 = vrot.lane.b32.xlu1 %v9711_v4, %s9316_s30  ;;  %v534_v4 = vpack.c.bf16 %v8785_v49, %v8785_v49  ;;  %v1596_v26 = vpop.permute.xlu1 %1595 }
 0x494   :  { %8057 = vmatmul.mubr.msk.bf16.vlgmr.msra.gmra.mrb[48].mxu1 %vm567_vm9, %v532_v32  ;;  %v8789_v50 = vpop.permute.xlu0 %8788  ;;  %v1601_v54 = vsel %vm567_vm9, %v1596_v26, 0 }
 0x495   :  { %8063 = vmatmul.mubr.msk.bf16.vlgmr.msra.gmra.mrb[40].mxu0 %vm567_vm9, %v533_v10  ;;  %8067 = vmatpush3.bf16.xpose.msra.mxu1 %v1454_v15  ;;  %v8790_v63 = vunpack.i.l.bf16 %v8789_v50  ;;  %v8791_v5 = vunpack.i.h.bf16 %v8789_v50 }
 0x496   :  { %8073 = vmatpush3.bf16.xpose.msra.mxu0 %v1503_v19  ;;  %8068 = vmatprep.mubr.msk.bf16.mxu1 %vm9311_vm0, %v11753_v8 }
 0x497   :  { %8074 = vmatprep.mubr.msk.bf16.mxu0 %vm9311_vm0, %v11753_v8  ;;  %8078 = vmatprep.subr.bf16.mxu1 %v11753_v8  ;;  %v536_v29 = vpack.c.bf16 %v8790_v63, %v8790_v63  ;;  %v537_v61 = vpack.c.bf16 %v8791_v5, %v8791_v5 }
 0x498   :  { %8084 = vmatprep.subr.bf16.mxu0 %v11753_v8 }
 0x49c   :  { %8069 = vmatmul.mubr.msk.bf16.vlgmr.msra.gmra.mrb[52].mxu1 %vm567_vm9, %v534_v4 }
 0x49d   :  { %8075 = vmatmul.mubr.msk.bf16.vlgmr.msra.gmra.mrb[44].mxu0 %vm567_vm9, %v535_v24  ;;  %8079 = vmatpush3.bf16.xpose.msra.mxu1 %v1552_v59 }
 0x49e   :  { %8085 = vmatpush3.bf16.xpose.msra.mxu0 %v1601_v54  ;;  %8080 = vmatprep.mubr.msk.bf16.mxu1 %vm9311_vm0, %v11753_v8 }
 0x49f   :  { %8086 = vmatprep.mubr.msk.bf16.mxu0 %vm9311_vm0, %v11753_v8  ;;  %8090 = vmatprep.subr.bf16.mxu1 %v11753_v8 }
 0x4a0   :  { %8096 = vmatprep.subr.bf16.mxu0 %v11753_v8 }
 0x4a4   :  { %8081 = vmatmul.mubr.msk.bf16.vlgmr.msra.gmra.mrb[56].mxu1 %vm567_vm9, %v536_v29 }
 0x4a5   :  { %8087 = vmatmul.mubr.msk.bf16.vlgmr.msra.gmra.mrb[48].mxu0 %vm567_vm9, %v537_v61  ;;  %8092 = vmatprep.mubr.msk.bf16.mxu1 %vm9311_vm0, %v11753_v8 }
 0x4a6   :  { %8098 = vmatprep.mubr.msk.bf16.mxu0 %vm9311_vm0, %v11753_v8 }
 0x4d4   :  { %v9889_v33 = vpop.f32.mrb[12].mxu1 }
 0x4d5   :  { %v7962_v0 = vpop.f32.mrb[13].mxu1  ;;  %v1741_v62 = vsel %vm567_vm9, %v9889_v33, -inf }
 0x4d6   :  { %v611_v3 = vpop.f32.mrb[14].mxu1  ;;  %1742 = vmax.xlane.f32.xlu0 %v1741_v62 }
 0x4d7   :  { %v7963_v36 = vpop.f32.mrb[15].mxu1 }
 0x4dc   :  { %v9893_v37 = vpop.f32.mrb[16].mxu1 }
 0x4dd   :  { %v1645_v9 = vpop.permute.xlu1 %1644  ;;  %v1694_v11 = vpop.permute.xlu0 %1693  ;;  %v1744_v39 = vsel %vm567_vm9, %v9893_v37, -inf }
 0x4de   :  { %v1650_v41 = vsel %vm567_vm9, %v1645_v9, 0  ;;  %v1699_v42 = vsel %vm567_vm9, %v1694_v11, 0  ;;  %v7968_v13 = vpop.f32.mrb[17].mxu1  ;;  %1745 = vmax.xlane.f32.xlu1 %v1744_v39 }
 0x4df   :  { %v660_v22 = vpop.f32.mrb[18].mxu1  ;;  %8091 = vmatpush3.bf16.xpose.msra.mxu1 %v1650_v41  ;;  %8097 = vmatpush3.bf16.xpose.msra.mxu0 %v1699_v42 }
 0x4e0   :  { %v7969_v43 = vpop.f32.mrb[19].mxu1  ;;  %8102 = vmatprep.subr.bf16.mxu1 %v11753_v8  ;;  %8108 = vmatprep.subr.bf16.mxu0 %v11753_v8 }
 0x4e1   :  { %v8794_v46 = vpop.permute.xlu1 %8793  ;;  %v2079_v45 = vpop.permute.xlu0 %2078 }
 0x4e2   :  { %v8796_v48 = vunpack.i.h.bf16 %v8794_v46  ;;  %v8795_v12 = vunpack.i.l.bf16 %v8794_v46  ;;  %v2084_v57 = vsel %vm2034_vm10, %v2079_v45, 0 }
 0x4e4   :  { %v539_v51 = vpack.c.bf16 %v8796_v48, %v8796_v48  ;;  %v538_v38 = vpack.c.bf16 %v8795_v12, %v8795_v12  ;;  %v9901_v52 = vpop.f32.mrb[20].mxu1 }
 0x4e5   :  { %v2030_v31 = vpop.permute.xlu1 %2029  ;;  %v7974_v60 = vpop.f32.mrb[21].mxu1  ;;  %v1747_v25 = vsel %vm567_vm9, %v9901_v52, -inf }
 0x4e6   :  { %v2036_v58 = vsel %vm2034_vm10, %v2030_v31, 0  ;;  %8093 = vmatmul.mubr.msk.bf16.vlgmr.msra.gmra.mrb[60].mxu1 %vm567_vm9, %v538_v38  ;;  %8099 = vmatmul.mubr.msk.bf16.vlgmr.msra.gmra.mrb[52].mxu0 %vm567_vm9, %v539_v51  ;;  %v709_v1 = vpop.f32.mrb[22].mxu1  ;;  %v9943_v31 = vpop.permute.xlu0 %2174 }
 0x4e7   :  { %8103 = vmatpush3.bf16.msra.mxu1 %v2036_v58  ;;  %8109 = vmatpush3.bf16.msra.mxu0 %v2084_v57  ;;  %v7975_v40 = vpop.f32.mrb[23].mxu1 }
 0x4e8   :  { %v9907_v32 = vpop.f32.mrb[12].mxu0  ;;  %8104 = vmatprep.mubr.msk.bf16.mxu1 %vm9311_vm0, %v11753_v8  ;;  %8110 = vmatprep.mubr.msk.bf16.mxu0 %vm9311_vm0, %v11753_v8 }
 0x4e9   :  { %v1750_v10 = vsel %vm567_vm9, %v9907_v32, -inf  ;;  %8114 = vmatprep.subr.bf16.mxu1 %v11753_v8  ;;  %8120 = vmatprep.subr.bf16.mxu0 %v11753_v8  ;;  %v7980_v14 = vpop.f32.mrb[13].mxu0  ;;  %v9945_v57 = vpop.permute.xlu1 %2126 }
 0x4ea   :  { %1751 = vmax.xlane.f32.xlu0 %v1750_v10  ;;  %v758_v15 = vpop.f32.mrb[14].mxu0 }
 0x4eb   :  { %v7981_v19 = vpop.f32.mrb[15].mxu0 }
 0x4ec   :  { %v9917_v20 = vpop.f32.mrb[24].mxu1 }
 0x4ed   :  { %v1753_v49 = vsel %vm567_vm9, %v9917_v20, -inf  ;;  %v7986_v4 = vpop.f32.mrb[25].mxu1 }
 0x4ee   :  { %1754 = vmax.xlane.f32.xlu1 %v1753_v49  ;;  %1748 = vmax.xlane.f32.xlu0 %v1747_v25  ;;  %v807_v26 = vpop.f32.mrb[26].mxu1  ;;  %v9955_v4 = vpop.permute.xlu0 %2270 }
 0x4ef   :  { %v7987_v24 = vpop.f32.mrb[27].mxu1  ;;  %v9957_v26 = vpop.permute.xlu1 %2222 }
 0x4f0   :  { %v9923_v50 = vpop.f32.mrb[16].mxu0 }
 0x4f1   :  { %v1756_v59 = vsel %vm567_vm9, %v9923_v50, -inf  ;;  %v7992_v54 = vpop.f32.mrb[17].mxu0 }
 0x4f2   :  { %1757 = vmax.xlane.f32.xlu0 %v1756_v59  ;;  %v856_v63 = vpop.f32.mrb[18].mxu0 }
 0x4f3   :  { %v7993_v5 = vpop.f32.mrb[19].mxu0 }
 0x53d   :  { %v9927_v29 = vpop.f32.mrb[28].mxu1  ;;  %v9929_v61 = vpop.f32.mrb[20].mxu0 }
 0x53e   :  { %v7998_v0 = vpop.f32.mrb[29].mxu1  ;;  %v8004_v62 = vpop.f32.mrb[21].mxu0  ;;  %v1759_v3 = vsel %vm567_vm9, %v9927_v29, -inf  ;;  %v1762_v36 = vsel %vm567_vm9, %v9929_v61, -inf }
 0x53f   :  { %v905_v9 = vpop.f32.mrb[30].mxu1  ;;  %v954_v11 = vpop.f32.mrb[22].mxu0  ;;  %1760 = vmax.xlane.f32.xlu1 %v1759_v3  ;;  %1763 = vmax.xlane.f32.xlu0 %v1762_v36 }
 0x540   :  { %v7999_v39 = vpop.f32.mrb[31].mxu1  ;;  %v8005_v41 = vpop.f32.mrb[23].mxu0 }
 0x541   :  { %v9967_v11 = vpop.permute.xlu0 %2366  ;;  %v9969_v39 = vpop.permute.xlu1 %2318 }
 0x547   :  { %v9935_v42 = vpop.f32.mrb[32].mxu1  ;;  %v9937_v13 = vpop.f32.mrb[24].mxu0 }
 0x548   :  { %v8010_v22 = vpop.f32.mrb[33].mxu1  ;;  %v8016_v43 = vpop.f32.mrb[25].mxu0  ;;  %v1768_v46 = vsel %vm567_vm9, %v9937_v13, -inf  ;;  %v1765_v48 = vsel %vm567_vm9, %v9935_v42, -inf }
 0x549   :  { %1769 = vmax.xlane.f32.xlu0 %v1768_v46  ;;  %v1052_v12 = vpop.f32.mrb[26].mxu0  ;;  %1766 = vmax.xlane.f32.xlu1 %v1765_v48  ;;  %v1003_v45 = vpop.f32.mrb[34].mxu1 }
 0x54a   :  { %v8011_v51 = vpop.f32.mrb[35].mxu1  ;;  %v8017_v38 = vpop.f32.mrb[27].mxu0 }
 0x54f   :  { %v9947_v58 = vpop.f32.mrb[36].mxu1 }
 0x550   :  { %v9949_v60 = vpop.f32.mrb[28].mxu0  ;;  %v8022_v1 = vpop.f32.mrb[37].mxu1  ;;  %v1771_v40 = vsel %vm567_vm9, %v9947_v58, -inf }
 0x551   :  { %v8028_v10 = vpop.f32.mrb[29].mxu0  ;;  %v1774_v14 = vsel %vm567_vm9, %v9949_v60, -inf  ;;  %1772 = vmax.xlane.f32.xlu1 %v1771_v40  ;;  %v1101_v15 = vpop.f32.mrb[38].mxu1 }
 0x552   :  { %1775 = vmax.xlane.f32.xlu0 %v1774_v14  ;;  %v1150_v19 = vpop.f32.mrb[30].mxu0  ;;  %v8023_v49 = vpop.f32.mrb[39].mxu1 }
 0x553   :  { %v8029_v25 = vpop.f32.mrb[31].mxu0  ;;  %v9979_v40 = vpop.permute.xlu0 %2462 }
 0x554   :  { %v9981_v10 = vpop.permute.xlu1 %2414 }
 0x557   :  { %v9959_v24 = vpop.f32.mrb[40].mxu1 }
 0x558   :  { %v9961_v59 = vpop.f32.mrb[32].mxu0  ;;  %v8034_v54 = vpop.f32.mrb[41].mxu1  ;;  %v1777_v63 = vsel %vm567_vm9, %v9959_v24, -inf }
 0x559   :  { %v8040_v5 = vpop.f32.mrb[33].mxu0  ;;  %v1780_v0 = vsel %vm567_vm9, %v9961_v59, -inf  ;;  %1778 = vmax.xlane.f32.xlu1 %v1777_v63  ;;  %v1199_v62 = vpop.f32.mrb[42].mxu1 }
 0x55a   :  { %1781 = vmax.xlane.f32.xlu0 %v1780_v0  ;;  %v1248_v3 = vpop.f32.mrb[34].mxu0  ;;  %v8035_v36 = vpop.f32.mrb[43].mxu1 }
 0x55b   :  { %v8041_v9 = vpop.f32.mrb[35].mxu0  ;;  %v9987_v0 = vpop.permute.xlu0 %2654 }
 0x55c   :  { %v9989_v62 = vpop.permute.xlu1 %2510 }
 0x55f   :  { %v9971_v41 = vpop.f32.mrb[44].mxu1 }
 0x560   :  { %v9973_v22 = vpop.f32.mrb[36].mxu0  ;;  %v8046_v43 = vpop.f32.mrb[45].mxu1  ;;  %v1783_v46 = vsel %vm567_vm9, %v9971_v41, -inf }
 0x561   :  { %v8052_v48 = vpop.f32.mrb[37].mxu0  ;;  %v1786_v12 = vsel %vm567_vm9, %v9973_v22, -inf  ;;  %1784 = vmax.xlane.f32.xlu1 %v1783_v46  ;;  %v1297_v45 = vpop.f32.mrb[46].mxu1 }
 0x562   :  { %1787 = vmax.xlane.f32.xlu0 %v1786_v12  ;;  %v1346_v51 = vpop.f32.mrb[38].mxu0  ;;  %v8047_v38 = vpop.f32.mrb[47].mxu1 }
 0x563   :  { %v8053_v1 = vpop.f32.mrb[39].mxu0  ;;  %v9997_v51 = vpop.permute.xlu1 %2606 }
 0x564   :  { %v10001_v38 = vpop.permute.xlu0 %2750 }
 0x567   :  { %v9983_v14 = vpop.f32.mrb[48].mxu1 }
 0x568   :  { %v9985_v15 = vpop.f32.mrb[40].mxu0  ;;  %v8058_v19 = vpop.f32.mrb[49].mxu1 }
 0x569   :  { %v8064_v49 = vpop.f32.mrb[41].mxu0  ;;  %v1395_v25 = vpop.f32.mrb[50].mxu1  ;;  %v1792_v21 = vsel %vm567_vm9, %v9985_v15, -inf }
 0x56a   :  { %v1444_v54 = vpop.f32.mrb[42].mxu0  ;;  %v8059_v63 = vpop.f32.mrb[51].mxu1 }
 0x56b   :  { %v8065_v5 = vpop.f32.mrb[43].mxu0 }
 0x56f   :  { %v9991_v3 = vpop.f32.mrb[52].mxu1 }
 0x570   :  { %v9993_v36 = vpop.f32.mrb[44].mxu0  ;;  %v8070_v9 = vpop.f32.mrb[53].mxu1 }
 0x571   :  { %v8076_v43 = vpop.f32.mrb[45].mxu0  ;;  %v1493_v46 = vpop.f32.mrb[54].mxu1 }
 0x572   :  { %v1542_v48 = vpop.f32.mrb[46].mxu0  ;;  %2894 = vrot.lane.b32.xlu1 %v9734_v27, %s9316_s30  ;;  %v8071_v12 = vpop.f32.mrb[55].mxu1 }
 0x573   :  { %v8077_v45 = vpop.f32.mrb[47].mxu0  ;;  %v10009_v9 = vpop.permute.xlu1 %2702 }
 0x574   :  { %v10011_v43 = vpop.permute.xlu0 %2558 }
 0x576   :  { %2942 = vrot.lane.b32.xlu1 %v9739_v30, %s9316_s30 }
 0x577   :  { %v10003_v1 = vpop.f32.mrb[56].mxu1  ;;  %v10013_v30 = vpop.permute.xlu1 %2798 }
 0x578   :  { %2846 = vrot.lane.b32.xlu0 %v9721_v23, %s9316_s30  ;;  %v10007_v19 = vpop.f32.mrb[48].mxu0  ;;  %v8082_v49 = vpop.f32.mrb[57].mxu1 }
 0x579   :  { %v8088_v25 = vpop.f32.mrb[49].mxu0  ;;  %v1591_v54 = vpop.f32.mrb[58].mxu1 }
 0x57a   :  { %v1640_v27 = vpop.f32.mrb[50].mxu0  ;;  %v8083_v63 = vpop.f32.mrb[59].mxu1 }
 0x57b   :  { %v8089_v5 = vpop.f32.mrb[51].mxu0  ;;  %v1743_v46 = vpop.xlane.xlu0 %1742 }
 0x57c   :  { %v1746_v48 = vpop.xlane.xlu1 %1745  ;;  %v1813_v45 = vsub.f32 %v9889_v33, %v1743_v46  ;;  %v1789_v46 = vsel %vm567_vm9, %v9983_v14, -inf }
 0x57d   :  { %v1814_v23 = vsub.f32 %v9893_v37, %v1746_v48 }
 0x57e   :  { %v1837_v2 = vmul.f32 1.442695, %v1813_v45  ;;  %v1801_v45 = vsel %vm567_vm9, %v10003_v1, -inf }
 0x57f   :  { %v1752_v12 = vpop.xlane.xlu0 %1751  ;;  %v1839_v25 = vmul.f32 1.442695, %v1814_v23 }
 0x580   :  { %v1816_v54 = vsub.f32 %v9907_v32, %v1752_v12  ;;  %8989 = vpow2.f32 %v1837_v2  ;;  %v1798_v2 = vsel %vm567_vm9, %v9993_v36, -inf }
 0x581   :  { %8991 = vpow2.f32 %v1839_v25  ;;  %v1804_v25 = vsel %vm567_vm9, %v10007_v19, -inf }
 0x582   :  { %v1843_v27 = vmul.f32 1.442695, %v1816_v54 }
 0x583   :  { %v1749_v49 = vpop.xlane.xlu0 %1748 }
 0x584   :  { %v1815_v5 = vsub.f32 %v9901_v52, %v1749_v49  ;;  %8993 = vpow2.f32 %v1843_v27  ;;  %v1755_v49 = vpop.xlane.xlu1 %1754 }
 0x585   :  { %v1817_v27 = vsub.f32 %v9917_v20, %v1755_v49 }
 0x586   :  { %v1841_v33 = vmul.f32 1.442695, %v1815_v5 }
 0x587   :  { %v1758_v63 = vpop.xlane.xlu0 %1757 }
 0x588   :  { %v1818_v8 = vsub.f32 %v9923_v50, %v1758_v63  ;;  %8995 = vpow2.f32 %v1841_v33  ;;  %v1795_v50 = vsel %vm567_vm9, %v9991_v3, -inf  ;;  %v1845_v33 = vmul.f32 1.442695, %v1817_v27 }
 0x58a   :  { %v1847_v37 = vmul.f32 1.442695, %v1818_v8  ;;  %v10024_v48 = vpop.eup %8989 }
 0x58b   :  { %v10028_v32 = vpop.eup %8991  ;;  %v1885_v52 = vsel %vm567_vm9, %v10024_v48, 0.0 }
 0x58c   :  { %8997 = vpow2.f32 %v1847_v37  ;;  %v1888_v8 = vsel %vm567_vm9, %v10028_v32, 0.0 }
 0x58d   :  { %8999 = vpow2.f32 %v1845_v33 }
 0x597   :  { %1793 = vmax.xlane.f32.xlu0 %v1792_v21  ;;  %v10034_v21 = vpop.eup %8993 }
 0x598   :  { %v1894_v12 = vsel %vm567_vm9, %v10034_v21, 0.0  ;;  %v10042_v23 = vpop.eup %8995 }
 0x599   :  { %v10046_v54 = vpop.eup %8997  ;;  %v1891_v63 = vsel %vm567_vm9, %v10042_v23, 0.0 }
 0x59a   :  { %1790 = vmax.xlane.f32.xlu1 %v1789_v46  ;;  %v1900_v5 = vsel %vm567_vm9, %v10046_v54, 0.0 }
 0x59b   :  { %1799 = vmax.xlane.f32.xlu0 %v1798_v2 }
 0x59e   :  { %1886 = vadd.xlane.f32.xlu1 %v1885_v52 }
 0x59f   :  { %1889 = vadd.xlane.f32.xlu0 %v1888_v8 }
 0x5a2   :  { %1796 = vmax.xlane.f32.xlu1 %v1795_v50  ;;  %v10061_v50 = vpop.eup %8999 }
 0x5a3   :  { %1895 = vadd.xlane.f32.xlu0 %v1894_v12  ;;  %v1897_v27 = vsel %vm567_vm9, %v10061_v50, 0.0 }
 0x5a6   :  { %1802 = vmax.xlane.f32.xlu1 %v1801_v45 }
 0x5a7   :  { %1805 = vmax.xlane.f32.xlu0 %v1804_v25 }
 0x5aa   :  { %1892 = vadd.xlane.f32.xlu1 %v1891_v63 }
 0x5ab   :  { %1901 = vadd.xlane.f32.xlu0 %v1900_v5 }
 0x5b9   :  { %v10053_v37 = vpop.f32.mrb[60].mxu1  ;;  %v10055_v46 = vpop.f32.mrb[52].mxu0 }
 0x5ba   :  { %v8094_v2 = vpop.f32.mrb[61].mxu1  ;;  %v8100_v52 = vpop.f32.mrb[53].mxu0  ;;  %v1810_v8 = vsel %vm567_vm9, %v10055_v46, -inf  ;;  %v1807_v20 = vsel %vm567_vm9, %v10053_v37, -inf }
 0x5bb   :  { %1811 = vmax.xlane.f32.xlu0 %v1810_v8  ;;  %v1738_v12 = vpop.f32.mrb[54].mxu0  ;;  %1808 = vmax.xlane.f32.xlu1 %v1807_v20  ;;  %v1689_v45 = vpop.f32.mrb[62].mxu1 }
 0x5bc   :  { %v8095_v49 = vpop.f32.mrb[63].mxu1  ;;  %v8101_v25 = vpop.f32.mrb[55].mxu0 }
 0x5bf   :  { %1898 = vadd.xlane.f32.xlu1 %v1897_v27 }
 0x5cc   :  { %v1761_v63 = vpop.xlane.xlu1 %1760  ;;  %v1764_v5 = vpop.xlane.xlu0 %1763 }
 0x5cd   :  { %v1819_v33 = vsub.f32 %v9927_v29, %v1761_v63  ;;  %v1820_v2 = vsub.f32 %v9929_v61, %v1764_v5 }
 0x5cf   :  { %v1849_v52 = vmul.f32 1.442695, %v1819_v33  ;;  %v1851_v47 = vmul.f32 1.442695, %v1820_v2 }
 0x5d1   :  { %9001 = vpow2.f32 %v1849_v52 }
 0x5d2   :  { %9003 = vpow2.f32 %v1851_v47 }
 0x5d6   :  { %v1770_v8 = vpop.xlane.xlu0 %1769  ;;  %v1767_v12 = vpop.xlane.xlu1 %1766 }
 0x5d7   :  { %v1822_v20 = vsub.f32 %v9937_v13, %v1770_v8  ;;  %v1821_v45 = vsub.f32 %v9935_v42, %v1767_v12 }
 0x5d9   :  { %v1855_v49 = vmul.f32 1.442695, %v1822_v20  ;;  %v1853_v25 = vmul.f32 1.442695, %v1821_v45 }
 0x5db   :  { %v10069_v44 = vpop.eup %9001  ;;  %9005 = vpow2.f32 %v1855_v49 }
 0x5dc   :  { %v10071_v27 = vpop.eup %9003  ;;  %9007 = vpow2.f32 %v1853_v25  ;;  %v1903_v29 = vsel %vm567_vm9, %v10069_v44, 0.0 }
 0x5dd   :  { %v1906_v47 = vsel %vm567_vm9, %v10071_v27, 0.0  ;;  %1904 = vadd.xlane.f32.xlu1 %v1903_v29 }
 0x5de   :  { %1907 = vadd.xlane.f32.xlu0 %v1906_v47  ;;  %v1773_v61 = vpop.xlane.xlu1 %1772 }
 0x5df   :  { %v1776_v13 = vpop.xlane.xlu0 %1775  ;;  %v1823_v42 = vsub.f32 %v9947_v58, %v1773_v61 }
 0x5e0   :  { %v1824_v63 = vsub.f32 %v9949_v60, %v1776_v13 }
 0x5e1   :  { %v1857_v5 = vmul.f32 1.442695, %v1823_v42 }
 0x5e2   :  { %v1859_v33 = vmul.f32 1.442695, %v1824_v63 }
 0x5e3   :  { %9009 = vpow2.f32 %v1857_v5 }
 0x5e4   :  { %9011 = vpow2.f32 %v1859_v33 }
 0x5e5   :  { %v10079_v2 = vpop.eup %9005 }
 0x5e6   :  { %v10081_v52 = vpop.eup %9007  ;;  %v1779_v8 = vpop.xlane.xlu1 %1778  ;;  %v1912_v12 = vsel %vm567_vm9, %v10079_v2, 0.0 }
 0x5e7   :  { %v1782_v20 = vpop.xlane.xlu0 %1781  ;;  %v1825_v45 = vsub.f32 %v9959_v24, %v1779_v8  ;;  %1913 = vadd.xlane.f32.xlu0 %v1912_v12  ;;  %v1909_v58 = vsel %vm567_vm9, %v10081_v52, 0.0 }
 0x5e8   :  { %v1826_v60 = vsub.f32 %v9961_v59, %v1782_v20  ;;  %1910 = vadd.xlane.f32.xlu1 %v1909_v58 }
 0x5e9   :  { %v1861_v49 = vmul.f32 1.442695, %v1825_v45 }
 0x5ea   :  { %v1863_v25 = vmul.f32 1.442695, %v1826_v60 }
 0x5eb   :  { %9013 = vpow2.f32 %v1861_v49 }
 0x5ec   :  { %9015 = vpow2.f32 %v1863_v25 }
 0x5ed   :  { %v10089_v29 = vpop.eup %9009 }
 0x5ee   :  { %v10091_v47 = vpop.eup %9011  ;;  %v1785_v61 = vpop.xlane.xlu1 %1784  ;;  %v1915_v13 = vsel %vm567_vm9, %v10089_v29, 0.0 }
 0x5ef   :  { %v1788_v24 = vpop.xlane.xlu0 %1787  ;;  %v1827_v42 = vsub.f32 %v9971_v41, %v1785_v61  ;;  %v1918_v63 = vsel %vm567_vm9, %v10091_v47, 0.0  ;;  %1916 = vadd.xlane.f32.xlu1 %v1915_v13 }
 0x5f0   :  { %v1828_v59 = vsub.f32 %v9973_v22, %v1788_v24  ;;  %1919 = vadd.xlane.f32.xlu0 %v1918_v63 }
 0x5f1   :  { %v1865_v5 = vmul.f32 1.442695, %v1827_v42 }
 0x5f2   :  { %v1867_v33 = vmul.f32 1.442695, %v1828_v59  ;;  %v10115_v49 = vpop.permute.xlu1 %2894 }
 0x5f3   :  { %9017 = vpow2.f32 %v1865_v5  ;;  %v10117_v25 = vpop.permute.xlu0 %2846 }
 0x5f4   :  { %9019 = vpow2.f32 %v1867_v33 }
 0x5f5   :  { %v10099_v8 = vpop.eup %9013 }
 0x5f6   :  { %v10101_v12 = vpop.eup %9015  ;;  %v1921_v20 = vsel %vm567_vm9, %v10099_v8, 0.0  ;;  %v10119_v61 = vpop.permute.xlu1 %2942 }
 0x5f7   :  { %v1924_v41 = vsel %vm567_vm9, %v10101_v12, 0.0  ;;  %1922 = vadd.xlane.f32.xlu1 %v1921_v20 }
 0x5f8   :  { %1925 = vadd.xlane.f32.xlu0 %v1924_v41 }
 0x5fd   :  { %v10107_v45 = vpop.eup %9017 }
 0x5fe   :  { %v10109_v22 = vpop.eup %9019  ;;  %v1927_v58 = vsel %vm567_vm9, %v10107_v45, 0.0 }
 0x5ff   :  { %v1930_v60 = vsel %vm567_vm9, %v10109_v22, 0.0  ;;  %1928 = vadd.xlane.f32.xlu1 %v1927_v58 }
 0x600   :  { %1931 = vadd.xlane.f32.xlu0 %v1930_v60 }
 0x624   :  { %v1794_v13 = vpop.xlane.xlu0 %1793 }
 0x625   :  { %v1830_v24 = vsub.f32 %v9985_v15, %v1794_v13 }
 0x627   :  { %v1871_v42 = vmul.f32 1.442695, %v1830_v24  ;;  %v1791_v63 = vpop.xlane.xlu1 %1790 }
 0x628   :  { %v1800_v59 = vpop.xlane.xlu0 %1799  ;;  %v1829_v5 = vsub.f32 %v9983_v14, %v1791_v63 }
 0x629   :  { %9021 = vpow2.f32 %v1871_v42  ;;  %v1832_v33 = vsub.f32 %v9993_v36, %v1800_v59 }
 0x62a   :  { %v1869_v20 = vmul.f32 1.442695, %v1829_v5 }
 0x62b   :  { %v1875_v41 = vmul.f32 1.442695, %v1832_v33  ;;  %v1887_v58 = vpop.xlane.xlu1 %1886 }
 0x62c   :  { %9023 = vpow2.f32 %v1869_v20  ;;  %v1890_v60 = vpop.xlane.xlu0 %1889 }
 0x62d   :  { %9025 = vpow2.f32 %v1875_v41 }
 0x62e   :  { %9027 = vrcp.f32 %v1890_v60 }
 0x62f   :  { %9029 = vrcp.f32 %v1887_v58  ;;  %v1797_v16 = vpop.xlane.xlu1 %1796 }
 0x630   :  { %v1896_v28 = vpop.xlane.xlu0 %1895  ;;  %v1831_v15 = vsub.f32 %v9991_v3, %v1797_v16 }
 0x631   :  { %9031 = vrcp.f32 %v1896_v28 }
 0x632   :  { %v1873_v13 = vmul.f32 1.442695, %v1831_v15 }
 0x633   :  { %v10125_v24 = vpop.eup %9021  ;;  %v10127_v14 = vpop.xlane.xlu1 %1802 }
 0x634   :  { %9033 = vpow2.f32 %v1873_v13  ;;  %v10129_v36 = vpop.xlane.xlu0 %1805  ;;  %v1936_v42 = vsel %vm567_vm9, %v10125_v24, 0.0 }
 0x635   :  { %1937 = vadd.xlane.f32.xlu0 %v1936_v42  ;;  %v2180_v42 = vsel %vm2034_vm10, %v9943_v31, 0 }
 0x636   :  { %v10133_v63 = vpop.eup %9023 }
 0x637   :  { %v10135_v59 = vpop.eup %9025  ;;  %v1933_v16 = vsel %vm567_vm9, %v10133_v63, 0.0  ;;  %v1893_v5 = vpop.xlane.xlu1 %1892 }
 0x638   :  { %v9028_v28 = vpop.eup %9027  ;;  %v1902_v3 = vpop.xlane.xlu0 %1901  ;;  %v1942_v33 = vsel %vm567_vm9, %v10135_v59, 0.0  ;;  %1934 = vadd.xlane.f32.xlu1 %v1933_v16  ;;  %v2132_v16 = vsel %vm2034_vm10, %v9945_v57, 0 }
 0x639   :  { %v9030_v20 = vpop.eup %9029  ;;  %1943 = vadd.xlane.f32.xlu0 %v1942_v33  ;;  %v1982_v41 = vmul.f32 %v9028_v28, %v10028_v32  ;;  %9035 = vrcp.f32 %v1902_v3  ;;  %v11777_v32 = vmov 0.0  }
 0x63a   :  { %v1981_v58 = vmul.f32 %v9030_v20, %v10024_v48  ;;  %9037 = vrcp.f32 %v1893_v5  ;;  %v2276_v5 = vsel %vm2034_vm10, %v9955_v4, 0 }
 0x63b   :  { %v2006_v60 = vpack.c.bf16 %v1982_v41, %v1982_v41  ;;  %v9032_v15 = vpop.eup %9031 }
 0x63c   :  { %v2005_v13 = vpack.c.bf16 %v1981_v58, %v1981_v58  ;;  %v1984_v28 = vmul.f32 %v9032_v15, %v10034_v21  ;;  %v2228_v58 = vsel %vm2034_vm10, %v9957_v26, 0  ;;  %v1834_v26 = vsub.f32 %v10007_v19, %v10129_v36 }
 0x63d   :  { %8111 = vmatmul.mubr.msk.bf16.vlgmr.msra.gmra.mrb[56].mxu0 %vm567_vm9, %v2006_v60  ;;  %v2372_v60 = vsel %vm2034_vm10, %v9967_v11, 0 }
 0x63e   :  { %v10146_v18 = vpop.eup %9033  ;;  %8105 = vmatmul.mubr.msk.bf16.vlgmr.msra.gmra.mrb[64].mxu1 %vm567_vm9, %v2005_v13  ;;  %8121 = vmatpush3.bf16.msra.mxu0 %v2180_v42  ;;  %v2008_v31 = vpack.c.bf16 %v1984_v28, %v1984_v28  ;;  %v1879_v13 = vmul.f32 1.442695, %v1834_v26  ;;  %v2420_v26 = vsel %vm2034_vm10, %v9981_v10, 0 }
 0x63f   :  { %8115 = vmatpush3.bf16.msra.mxu1 %v2132_v16  ;;  %v1939_v48 = vsel %vm567_vm9, %v10146_v18, 0.0  ;;  %8122 = vmatprep.mubr.msk.bf16.mxu0 %vm9311_vm0, %v11777_v32 }
 0x640   :  { %1940 = vadd.xlane.f32.xlu1 %v1939_v48  ;;  %8132 = vmatprep.subr.bf16.mxu0 %v11777_v32  ;;  %v2324_v48 = vsel %vm2034_vm10, %v9969_v39, 0 }
 0x641   :  { %8116 = vmatprep.mubr.msk.bf16.mxu1 %vm9311_vm0, %v11777_v32  ;;  %8126 = vmatprep.subr.bf16.mxu1 %v11777_v32 }
 0x643   :  { %v9036_v57 = vpop.eup %9035 }
 0x644   :  { %v9038_v3 = vpop.eup %9037  ;;  %v1986_v21 = vmul.f32 %v9036_v57, %v10046_v54 }
 0x645   :  { %8123 = vmatmul.mubr.msk.bf16.vlgmr.msra.gmra.mrb[60].mxu0 %vm567_vm9, %v2008_v31  ;;  %v1983_v33 = vmul.f32 %v9038_v3, %v10042_v23 }
 0x646   :  { %8133 = vmatpush3.bf16.msra.mxu0 %v2276_v5  ;;  %8134 = vmatprep.mubr.msk.bf16.mxu0 %vm9311_vm0, %v11777_v32  ;;  %v2010_v4 = vpack.c.bf16 %v1986_v21, %v1986_v21 }
 0x647   :  { %8144 = vmatprep.subr.bf16.mxu0 %v11777_v32  ;;  %v2007_v20 = vpack.c.bf16 %v1983_v33, %v1983_v33 }
 0x648   :  { %v1809_v41 = vpop.xlane.xlu1 %1808  ;;  %v1812_v11 = vpop.xlane.xlu0 %1811 }
 0x649   :  { %8117 = vmatmul.mubr.msk.bf16.vlgmr.msra.gmra.mrb[68].mxu1 %vm567_vm9, %v2007_v20  ;;  %v1836_v42 = vsub.f32 %v10055_v46, %v1812_v11  ;;  %v1835_v19 = vsub.f32 %v10053_v37, %v1809_v41 }
 0x64a   :  { %8127 = vmatpush3.bf16.msra.mxu1 %v2228_v58  ;;  %8128 = vmatprep.mubr.msk.bf16.mxu1 %vm9311_vm0, %v11777_v32 }
 0x64b   :  { %8138 = vmatprep.subr.bf16.mxu1 %v11777_v32 }
 0x64c   :  { %v1899_v23 = vpop.xlane.xlu1 %1898 }
 0x64d   :  { %8135 = vmatmul.mubr.msk.bf16.vlgmr.msra.gmra.mrb[64].mxu0 %vm567_vm9, %v2010_v4  ;;  %9039 = vrcp.f32 %v1899_v23 }
 0x64e   :  { %8145 = vmatpush3.bf16.msra.mxu0 %v2372_v60  ;;  %8146 = vmatprep.mubr.msk.bf16.mxu0 %vm9311_vm0, %v11777_v32  ;;  %9041 = vpow2.f32 %v1879_v13 }
 0x64f   :  { %2990 = vrot.lane.b32.xlu0 %v9750_v34, %s9316_s30  ;;  %8156 = vmatprep.subr.bf16.mxu0 %v11777_v32  ;;  %v1833_v34 = vsub.f32 %v10003_v1, %v10127_v14 }
 0x651   :  { %3038 = vrot.lane.b32.xlu1 %v9759_v35, %s9316_s30  ;;  %v1883_v35 = vmul.f32 1.442695, %v1836_v42  ;;  %v1877_v46 = vmul.f32 1.442695, %v1833_v34  ;;  %v2516_v34 = vsel %vm2034_vm10, %v9989_v62, 0 }
 0x653   :  { %9043 = vpow2.f32 %v1883_v35 }
 0x654   :  { %9045 = vpow2.f32 %v1877_v46 }
 0x657   :  { %v9040_v54 = vpop.eup %9039 }
 0x658   :  { %v1985_v15 = vmul.f32 %v9040_v54, %v10061_v50  ;;  %v1881_v50 = vmul.f32 1.442695, %v1835_v19  ;;  %v10197_v39 = vpop.eup %9041  ;;  %v2468_v54 = vsel %vm2034_vm10, %v9979_v40, 0 }
 0x659   :  { %v1948_v1 = vsel %vm567_vm9, %v10197_v39, 0.0 }
 0x65a   :  { %v2009_v16 = vpack.c.bf16 %v1985_v15, %v1985_v15  ;;  %9047 = vpow2.f32 %v1881_v50 }
 0x65c   :  { %8129 = vmatmul.mubr.msk.bf16.vlgmr.msra.gmra.mrb[72].mxu1 %vm567_vm9, %v2009_v16  ;;  %v2564_v16 = vsel %vm2034_vm10, %v10011_v43, 0 }
 0x65d   :  { %8139 = vmatpush3.bf16.msra.mxu1 %v2324_v48  ;;  %8140 = vmatprep.mubr.msk.bf16.mxu1 %vm9311_vm0, %v11777_v32  ;;  %v10201_v14 = vpop.eup %9043 }
 0x65e   :  { %8150 = vmatprep.subr.bf16.mxu1 %v11777_v32  ;;  %v10203_v31 = vpop.eup %9045  ;;  %v1954_v37 = vsel %vm567_vm9, %v10201_v14, 0.0 }
 0x65f   :  { %v1945_v5 = vsel %vm567_vm9, %v10203_v31, 0.0 }
 0x664   :  { %v10207_v57 = vpop.eup %9047 }
 0x665   :  { %v1951_v4 = vsel %vm567_vm9, %v10207_v57, 0.0 }
 0x66a   :  { %v1905_v36 = vpop.xlane.xlu1 %1904 }
 0x66b   :  { %v1908_v28 = vpop.xlane.xlu0 %1907  ;;  %9049 = vrcp.f32 %v1905_v36  ;;  %v2660_v36 = vsel %vm2034_vm10, %v9987_v0, 0 }
 0x66c   :  { %9051 = vrcp.f32 %v1908_v28  ;;  %v2612_v28 = vsel %vm2034_vm10, %v9997_v51, 0 }
 0x66e   :  { %1949 = vadd.xlane.f32.xlu0 %v1948_v1 }
 0x672   :  { %1955 = vadd.xlane.f32.xlu0 %v1954_v37  ;;  %v2756_v37 = vsel %vm2034_vm10, %v10001_v38, 0 }
 0x674   :  { %v1914_v3 = vpop.xlane.xlu0 %1913 }
 0x675   :  { %v9050_v33 = vpop.eup %9049  ;;  %9053 = vrcp.f32 %v1914_v3  ;;  %v1911_v21 = vpop.xlane.xlu1 %1910  ;;  %1946 = vadd.xlane.f32.xlu1 %v1945_v5  ;;  %v2708_v3 = vsel %vm2034_vm10, %v10009_v9, 0 }
 0x676   :  { %v9052_v20 = vpop.eup %9051  ;;  %9055 = vrcp.f32 %v1911_v21  ;;  %v1987_v41 = vmul.f32 %v9050_v33, %v10069_v44  ;;  %v2804_v21 = vsel %vm2034_vm10, %v10013_v30, 0 }
 0x677   :  { %v1988_v58 = vmul.f32 %v9052_v20, %v10071_v27  ;;  %v2852_v20 = vsel %vm2034_vm10, %v10117_v25, 0 }
 0x678   :  { %v2011_v23 = vpack.c.bf16 %v1987_v41, %v1987_v41 }
 0x679   :  { %1952 = vadd.xlane.f32.xlu1 %v1951_v4  ;;  %v2012_v60 = vpack.c.bf16 %v1988_v58, %v1988_v58 }
 0x67a   :  { %8141 = vmatmul.mubr.msk.bf16.vlgmr.msra.gmra.mrb[76].mxu1 %vm567_vm9, %v2011_v23 }
 0x67b   :  { %8147 = vmatmul.mubr.msk.bf16.vlgmr.msra.gmra.mrb[68].mxu0 %vm567_vm9, %v2012_v60  ;;  %8151 = vmatpush3.bf16.msra.mxu1 %v2420_v26 }
 0x67c   :  { %8157 = vmatpush3.bf16.msra.mxu0 %v2468_v54  ;;  %v1917_v44 = vpop.xlane.xlu1 %1916  ;;  %8152 = vmatprep.mubr.msk.bf16.mxu1 %vm9311_vm0, %v11777_v32  ;;  %v2948_v54 = vsel %vm2034_vm10, %v10119_v61, 0 }
 0x67d   :  { %v1920_v27 = vpop.xlane.xlu0 %1919  ;;  %9057 = vrcp.f32 %v1917_v44  ;;  %8158 = vmatprep.mubr.msk.bf16.mxu0 %vm9311_vm0, %v11777_v32  ;;  %8162 = vmatprep.subr.bf16.mxu1 %v11777_v32 }
 0x67e   :  { %9059 = vrcp.f32 %v1920_v27  ;;  %8168 = vmatprep.subr.bf16.mxu0 %v11777_v32 }
 0x67f   :  { %v9054_v10 = vpop.eup %9053 }
 0x680   :  { %v9056_v40 = vpop.eup %9055  ;;  %v1990_v11 = vmul.f32 %v9054_v10, %v10079_v2 }
 0x681   :  { %v1989_v15 = vmul.f32 %v9056_v40, %v10081_v52 }
 0x682   :  { %v2014_v13 = vpack.c.bf16 %v1990_v11, %v1990_v11 }
 0x683   :  { %v2013_v42 = vpack.c.bf16 %v1989_v15, %v1989_v15 }
 0x684   :  { %8159 = vmatmul.mubr.msk.bf16.vlgmr.msra.gmra.mrb[72].mxu0 %vm567_vm9, %v2014_v13  ;;  %v1923_v48 = vpop.xlane.xlu1 %1922 }
 0x685   :  { %8169 = vmatpush3.bf16.msra.mxu0 %v2564_v16  ;;  %v1926_v35 = vpop.xlane.xlu0 %1925  ;;  %8153 = vmatmul.mubr.msk.bf16.vlgmr.msra.gmra.mrb[80].mxu1 %vm567_vm9, %v2013_v42  ;;  %9061 = vrcp.f32 %v1923_v48 }
 0x686   :  { %9063 = vrcp.f32 %v1926_v35  ;;  %8163 = vmatpush3.bf16.msra.mxu1 %v2516_v34  ;;  %8164 = vmatprep.mubr.msk.bf16.mxu1 %vm9311_vm0, %v11777_v32 }
 0x687   :  { %v9058_v2 = vpop.eup %9057  ;;  %8170 = vmatprep.mubr.msk.bf16.mxu0 %vm9311_vm0, %v11777_v32  ;;  %8174 = vmatprep.subr.bf16.mxu1 %v11777_v32 }
 0x688   :  { %v9060_v43 = vpop.eup %9059  ;;  %3086 = vrot.lane.b32.xlu0 %v9769_v55, %s9316_s30  ;;  %8180 = vmatprep.subr.bf16.mxu0 %v11777_v32  ;;  %v1991_v62 = vmul.f32 %v9058_v2, %v10089_v29 }
 0x689   :  { %v1992_v52 = vmul.f32 %v9060_v43, %v10091_v47 }
 0x68a   :  { %3134 = vrot.lane.b32.xlu1 %v9771_v56, %s9316_s30  ;;  %v2015_v19 = vpack.c.bf16 %v1991_v62, %v1991_v62 }
 0x68b   :  { %v2016_v46 = vpack.c.bf16 %v1992_v52, %v1992_v52 }
 0x68c   :  { %v1929_v50 = vpop.xlane.xlu1 %1928 }
 0x68d   :  { %8171 = vmatmul.mubr.msk.bf16.vlgmr.msra.gmra.mrb[76].mxu0 %vm567_vm9, %v2016_v46  ;;  %v1932_v55 = vpop.xlane.xlu0 %1931  ;;  %8165 = vmatmul.mubr.msk.bf16.vlgmr.msra.gmra.mrb[84].mxu1 %vm567_vm9, %v2015_v19  ;;  %9065 = vrcp.f32 %v1929_v50 }
 0x68e   :  { %8181 = vmatpush3.bf16.msra.mxu0 %v2660_v36  ;;  %9067 = vrcp.f32 %v1932_v55  ;;  %8175 = vmatpush3.bf16.msra.mxu1 %v2612_v28 }
 0x68f   :  { %v9062_v29 = vpop.eup %9061  ;;  %8176 = vmatprep.mubr.msk.bf16.mxu1 %vm9311_vm0, %v11777_v32  ;;  %8182 = vmatprep.mubr.msk.bf16.mxu0 %vm9311_vm0, %v11777_v32 }
 0x690   :  { %v9064_v56 = vpop.eup %9063  ;;  %8186 = vmatprep.subr.bf16.mxu1 %v11777_v32  ;;  %8192 = vmatprep.subr.bf16.mxu0 %v11777_v32  ;;  %v1993_v0 = vmul.f32 %v9062_v29, %v10099_v8 }
 0x691   :  { %v1994_v51 = vmul.f32 %v9064_v56, %v10101_v12 }
 0x692   :  { %v2017_v47 = vpack.c.bf16 %v1993_v0, %v1993_v0 }
 0x693   :  { %v2018_v1 = vpack.c.bf16 %v1994_v51, %v1994_v51 }
 0x695   :  { %8177 = vmatmul.mubr.msk.bf16.vlgmr.msra.gmra.mrb[88].mxu1 %vm567_vm9, %v2017_v47  ;;  %8183 = vmatmul.mubr.msk.bf16.vlgmr.msra.gmra.mrb[80].mxu0 %vm567_vm9, %v2018_v1 }
 0x696   :  { %8187 = vmatpush3.bf16.msra.mxu1 %v2708_v3  ;;  %8193 = vmatpush3.bf16.msra.mxu0 %v2756_v37 }
 0x697   :  { %v9066_v5 = vpop.eup %9065  ;;  %8188 = vmatprep.mubr.msk.bf16.mxu1 %vm9311_vm0, %v11777_v32  ;;  %8194 = vmatprep.mubr.msk.bf16.mxu0 %vm9311_vm0, %v11777_v32 }
 0x698   :  { %v9068_v8 = vpop.eup %9067  ;;  %8198 = vmatprep.subr.bf16.mxu1 %v11777_v32  ;;  %8204 = vmatprep.subr.bf16.mxu0 %v11777_v32  ;;  %v1995_v38 = vmul.f32 %v9066_v5, %v10107_v45 }
 0x699   :  { %v1996_v9 = vmul.f32 %v9068_v8, %v10109_v22 }
 0x69a   :  { %v2019_v12 = vpack.c.bf16 %v1995_v38, %v1995_v38 }
 0x69b   :  { %v2020_v33 = vpack.c.bf16 %v1996_v9, %v1996_v9 }
 0x69d   :  { %8189 = vmatmul.mubr.msk.bf16.vlgmr.msra.gmra.mrb[92].mxu1 %vm567_vm9, %v2019_v12  ;;  %8195 = vmatmul.mubr.msk.bf16.vlgmr.msra.gmra.mrb[84].mxu0 %vm567_vm9, %v2020_v33 }
 0x69e   :  { %8199 = vmatpush3.bf16.msra.mxu1 %v2804_v21  ;;  %8205 = vmatpush3.bf16.msra.mxu0 %v2852_v20 }
 0x69f   :  { %8206 = vmatprep.mubr.msk.bf16.mxu0 %vm9311_vm0, %v11777_v32  ;;  %8216 = vmatprep.subr.bf16.mxu0 %v11777_v32 }
 0x6a0   :  { %8200 = vmatprep.mubr.msk.bf16.mxu1 %vm9311_vm0, %v11777_v32  ;;  %8210 = vmatprep.subr.bf16.mxu1 %v11777_v32 }
 0x6c2   :  { %v1938_v30 = vpop.xlane.xlu0 %1937 }
 0x6c3   :  { %9069 = vrcp.f32 %v1938_v30 }
 0x6c5   :  { %v1935_v45 = vpop.xlane.xlu1 %1934 }
 0x6c6   :  { %v1944_v22 = vpop.xlane.xlu0 %1943  ;;  %9071 = vrcp.f32 %v1935_v45 }
 0x6c7   :  { %9073 = vrcp.f32 %v1944_v22 }
 0x6ca   :  { %v2991_v11 = vpop.permute.xlu0 %2990 }
 0x6cd   :  { %v9070_v25 = vpop.eup %9069  ;;  %v1941_v41 = vpop.xlane.xlu1 %1940 }
 0x6ce   :  { %9075 = vrcp.f32 %v1941_v41  ;;  %v1998_v58 = vmul.f32 %v9070_v25, %v10125_v24  ;;  %v2900_v24 = vsel %vm2034_vm10, %v10115_v49, 0 }
 0x6d0   :  { %v9072_v4 = vpop.eup %9071  ;;  %v2022_v23 = vpack.c.bf16 %v1998_v58, %v1998_v58 }
 0x6d1   :  { %v9074_v60 = vpop.eup %9073  ;;  %v1997_v26 = vmul.f32 %v9072_v4, %v10133_v63  ;;  %v3039_v61 = vpop.permute.xlu1 %3038 }
 0x6d2   :  { %8207 = vmatmul.mubr.msk.bf16.vlgmr.msra.gmra.mrb[88].mxu0 %vm567_vm9, %v2022_v23  ;;  %v2000_v27 = vmul.f32 %v9074_v60, %v10135_v59  ;;  %v3044_v15 = vsel %vm2034_vm10, %v3039_v61, 0  ;;  %v2996_v59 = vsel %vm2034_vm10, %v2991_v11, 0 }
 0x6d3   :  { %8217 = vmatpush3.bf16.msra.mxu0 %v2948_v54  ;;  %v2021_v44 = vpack.c.bf16 %v1997_v26, %v1997_v26  ;;  %8218 = vmatprep.mubr.msk.bf16.mxu0 %vm9311_vm0, %v11777_v32 }
 0x6d4   :  { %8228 = vmatprep.subr.bf16.mxu0 %v11777_v32  ;;  %v2024_v10 = vpack.c.bf16 %v2000_v27, %v2000_v27 }
 0x6d5   :  { %8201 = vmatmul.mubr.msk.bf16.vlgmr.msra.gmra.mrb[96].mxu1 %vm567_vm9, %v2021_v44 }
 0x6d6   :  { %8211 = vmatpush3.bf16.msra.mxu1 %v2900_v24  ;;  %8212 = vmatprep.mubr.msk.bf16.mxu1 %vm9311_vm0, %v11777_v32 }
 0x6d7   :  { %8222 = vmatprep.subr.bf16.mxu1 %v11777_v32 }
 0x6d8   :  { %v9076_v63 = vpop.eup %9075 }
 0x6d9   :  { %v1999_v40 = vmul.f32 %v9076_v63, %v10146_v18 }
 0x6da   :  { %8219 = vmatmul.mubr.msk.bf16.vlgmr.msra.gmra.mrb[92].mxu0 %vm567_vm9, %v2024_v10 }
 0x6db   :  { %8229 = vmatpush3.bf16.msra.mxu0 %v3044_v15  ;;  %v2023_v49 = vpack.c.bf16 %v1999_v40, %v1999_v40  ;;  %8230 = vmatprep.mubr.msk.bf16.mxu0 %vm9311_vm0, %v11777_v32 }
 0x6dc   :  { %8240 = vmatprep.subr.bf16.mxu0 %v11777_v32 }
 0x6dd   :  { %8213 = vmatmul.mubr.msk.bf16.vlgmr.msra.gmra.mrb[100].mxu1 %vm567_vm9, %v2023_v49 }
 0x6de   :  { %8223 = vmatpush3.bf16.msra.mxu1 %v2996_v59  ;;  %8224 = vmatprep.mubr.msk.bf16.mxu1 %vm9311_vm0, %v11777_v32 }
 0x6df   :  { %8234 = vmatprep.subr.bf16.mxu1 %v11777_v32 }
 0x6fb   :  { %v1950_v18 = vpop.xlane.xlu0 %1949 }
 0x6fc   :  { %9077 = vrcp.f32 %v1950_v18 }
 0x6ff   :  { %v1956_v13 = vpop.xlane.xlu0 %1955 }
 0x700   :  { %9079 = vrcp.f32 %v1956_v13 }
 0x702   :  { %v1947_v42 = vpop.xlane.xlu1 %1946 }
 0x703   :  { %9081 = vrcp.f32 %v1947_v42  ;;  %v3087_v50 = vpop.permute.xlu0 %3086 }
 0x704   :  { %v3092_v0 = vsel %vm2034_vm10, %v3087_v50, 0 }
 0x706   :  { %v9078_v16 = vpop.eup %9077  ;;  %v1953_v48 = vpop.xlane.xlu1 %1952 }
 0x707   :  { %9083 = vrcp.f32 %v1953_v48  ;;  %v2002_v34 = vmul.f32 %v9078_v16, %v10197_v39 }
 0x709   :  { %v2026_v35 = vpack.c.bf16 %v2002_v34, %v2002_v34 }
 0x70a   :  { %v9080_v2 = vpop.eup %9079  ;;  %v3135_v43 = vpop.permute.xlu1 %3134 }
 0x70b   :  { %8231 = vmatmul.mubr.msk.bf16.vlgmr.msra.gmra.mrb[96].mxu0 %vm567_vm9, %v2026_v35  ;;  %v3140_v62 = vsel %vm2034_vm10, %v3135_v43, 0  ;;  %v2004_v19 = vmul.f32 %v9080_v2, %v10201_v14 }
 0x70c   :  { %8241 = vmatpush3.bf16.msra.mxu0 %v3140_v62  ;;  %8242 = vmatprep.mubr.msk.bf16.mxu0 %vm9311_vm0, %v11777_v32 }
 0x70d   :  { %v9082_v52 = vpop.eup %9081  ;;  %8262 = vmatprep.subr.bf16.mxu0 %v11777_v32  ;;  %v2028_v56 = vpack.c.bf16 %v2004_v19, %v2004_v19 }
 0x70e   :  { %v2001_v46 = vmul.f32 %v9082_v52, %v10203_v31 }
 0x710   :  { %v10321_v39 = vpop.f32.mrb[56].mxu0  ;;  %v2025_v36 = vpack.c.bf16 %v2001_v46, %v2001_v46 }
 0x711   :  { %v9084_v28 = vpop.eup %9083  ;;  %v10323_v55 = vpop.f32.mrb[64].mxu1 }
 0x712   :  { %v8112_v29 = vpop.f32.mrb[57].mxu0  ;;  %v8106_v51 = vpop.f32.mrb[65].mxu1  ;;  %8225 = vmatmul.mubr.msk.bf16.vlgmr.msra.gmra.mrb[104].mxu1 %vm567_vm9, %v2025_v36  ;;  %v2003_v37 = vmul.f32 %v9084_v28, %v10207_v57 }
 0x713   :  { %v2123_v47 = vpop.f32.mrb[58].mxu0  ;;  %v2075_v14 = vpop.f32.mrb[66].mxu1  ;;  %8235 = vmatpush3.bf16.msra.mxu1 %v3092_v0  ;;  %8243 = vmatmul.mubr.msk.bf16.vlgmr.msra.gmra.mrb[100].mxu0 %vm567_vm9, %v2028_v56 }
 0x714   :  { %v8113_v1 = vpop.f32.mrb[59].mxu0  ;;  %v8107_v31 = vpop.f32.mrb[67].mxu1  ;;  %8236 = vmatprep.mubr.msk.bf16.mxu1 %vm9311_vm0, %v11777_v32  ;;  %8246 = vmatprep.subr.bf16.mxu1 %v11777_v32  ;;  %v2027_v5 = vpack.c.bf16 %v2003_v37, %v2003_v37  ;;  %v292_v37 = vld [vmem:[%s11741_s6 + $0x8] sm:$0xff] }
 0x715   :  { %8266 = vmatprep.mubr.msk.bf16.mxu0 %vm9311_vm0, %v11777_v32  ;;  %v291_v31 = vld [vmem:[%s11741_s6] sm:$0xff] }
 0x718   :  { %v10334_v3 = vpop.f32.mrb[60].mxu0 }
 0x719   :  { %v8124_v8 = vpop.f32.mrb[61].mxu0 }
 0x71a   :  { %v2219_v38 = vpop.f32.mrb[62].mxu0  ;;  %8237 = vmatmul.mubr.msk.bf16.vlgmr.msra.gmra.mrb[108].mxu1 %vm567_vm9, %v2027_v5 }
 0x71b   :  { %v8125_v9 = vpop.f32.mrb[63].mxu0  ;;  %8250 = vmatprep.mubr.msk.bf16.mxu1 %vm9311_vm0, %v11777_v32 }
 0x71c   :  { %v10339_v12 = vpop.f32.mrb[68].mxu1  ;;  %v3277_v9 = vpack.c.bf16 %v292_v37, %v291_v31 }
 0x71d   :  { %v8118_v33 = vpop.f32.mrb[69].mxu1 }
 0x71e   :  { %v2171_v57 = vpop.f32.mrb[70].mxu1  ;;  %8247 = vmatpush3.bf16.msra.mxu1 %v3277_v9 }
 0x71f   :  { %v8119_v21 = vpop.f32.mrb[71].mxu1  ;;  %8248 = vmatprep.subr.bf16.mxu1 %v11777_v32 }
 0x720   :  { %v10341_v20 = vpop.f32.mrb[64].mxu0 }
 0x721   :  { %v8136_v30 = vpop.f32.mrb[65].mxu0 }
 0x722   :  { %v2315_v45 = vpop.f32.mrb[66].mxu0 }
 0x723   :  { %v8137_v22 = vpop.f32.mrb[67].mxu0 }
 0x72f   :  { %v10343_v25 = vpop.f32.mrb[72].mxu1 }
 0x730   :  { %v8130_v41 = vpop.f32.mrb[73].mxu1 }
 0x731   :  { %v2267_v58 = vpop.f32.mrb[74].mxu1 }
 0x732   :  { %v8131_v4 = vpop.f32.mrb[75].mxu1 }
 0x74d   :  { %v2360_v23 = vpop.f32.mrb[76].mxu1 }
 0x74e   :  { %v2408_v60 = vpop.f32.mrb[68].mxu0  ;;  %v8142_v26 = vpop.f32.mrb[77].mxu1 }
 0x74f   :  { %v8797_v54 = vpack.i.bf16 %v2408_v60, %v2360_v23  ;;  %v8148_v44 = vpop.f32.mrb[69].mxu0  ;;  %v2363_v27 = vpop.f32.mrb[78].mxu1  ;;  %v293_v26 = vld [vmem:[%s11741_s6 + $0x10] sm:$0xff] }
 0x750   :  { %v2411_v24 = vpop.f32.mrb[70].mxu0  ;;  %v8143_v61 = vpop.f32.mrb[79].mxu1 }
 0x751   :  { %v8149_v63 = vpop.f32.mrb[71].mxu0  ;;  %8798 = vrot.lane.b32.xlu0 %v8797_v54, %s9317_s0  ;;  %v294_v54 = vld [vmem:[%s11741_s6 + $0x18] sm:$0xff] }
 0x752   :  { %v3278_v27 = vpack.c.bf16 %v294_v54, %v293_v26 }
 0x754   :  { %8249 = vmatpush3.bf16.msra.mxu1 %v3278_v27 }
 0x755   :  { %8278 = vmatprep.subr.bf16.mxu1 %v11777_v32 }
 0x757   :  { %v2504_v10 = vpop.f32.mrb[72].mxu0 }
 0x758   :  { %v2456_v40 = vpop.f32.mrb[80].mxu1  ;;  %v8160_v11 = vpop.f32.mrb[73].mxu0 }
 0x759   :  { %v8812_v15 = vpack.i.bf16 %v2504_v10, %v2456_v40  ;;  %v8154_v49 = vpop.f32.mrb[81].mxu1  ;;  %v2507_v59 = vpop.f32.mrb[74].mxu0 }
 0x75a   :  { %v2459_v18 = vpop.f32.mrb[82].mxu1  ;;  %v8161_v13 = vpop.f32.mrb[75].mxu0 }
 0x75b   :  { %v8155_v42 = vpop.f32.mrb[83].mxu1 }
 0x760   :  { %v2552_v16 = vpop.f32.mrb[84].mxu1  ;;  %v2600_v48 = vpop.f32.mrb[76].mxu0 }
 0x761   :  { %v8827_v34 = vpack.i.bf16 %v2600_v48, %v2552_v16  ;;  %v8166_v35 = vpop.f32.mrb[85].mxu1  ;;  %v8172_v2 = vpop.f32.mrb[77].mxu0 }
 0x762   :  { %v2555_v43 = vpop.f32.mrb[86].mxu1  ;;  %v2603_v62 = vpop.f32.mrb[78].mxu0 }
 0x763   :  { %v8167_v52 = vpop.f32.mrb[87].mxu1  ;;  %v8173_v19 = vpop.f32.mrb[79].mxu0 }
 0x768   :  { %v2648_v46 = vpop.f32.mrb[88].mxu1  ;;  %v2696_v50 = vpop.f32.mrb[80].mxu0 }
 0x769   :  { %v8802_v36 = vpack.i.bf16 %v2696_v50, %v2648_v46  ;;  %v8178_v28 = vpop.f32.mrb[89].mxu1  ;;  %v8184_v29 = vpop.f32.mrb[81].mxu0 }
 0x76a   :  { %v2651_v56 = vpop.f32.mrb[90].mxu1  ;;  %v2699_v0 = vpop.f32.mrb[82].mxu0 }
 0x76b   :  { %v8185_v51 = vpop.f32.mrb[83].mxu0  ;;  %8803 = vrot.lane.b32.xlu1 %v8802_v36, %s9318_s2  ;;  %v8179_v47 = vpop.f32.mrb[91].mxu1 }
 0x76f   :  { %8813 = vrot.lane.b32.xlu1 %v8812_v15, %s9317_s0 }
 0x770   :  { %v2744_v14 = vpop.f32.mrb[92].mxu1  ;;  %v2792_v1 = vpop.f32.mrb[84].mxu0 }
 0x771   :  { %v8817_v5 = vpack.i.bf16 %v2792_v1, %v2744_v14  ;;  %v8190_v8 = vpop.f32.mrb[93].mxu1  ;;  %v8196_v38 = vpop.f32.mrb[85].mxu0 }
 0x772   :  { %v2747_v33 = vpop.f32.mrb[94].mxu1  ;;  %v2795_v57 = vpop.f32.mrb[86].mxu0 }
 0x773   :  { %v8191_v21 = vpop.f32.mrb[95].mxu1  ;;  %v8197_v30 = vpop.f32.mrb[87].mxu0 }
 0x7a5   :  { %v2888_v45 = vpop.f32.mrb[88].mxu0 }
 0x7a6   :  { %v8208_v22 = vpop.f32.mrb[89].mxu0 }
 0x7a7   :  { %v2891_v41 = vpop.f32.mrb[90].mxu0 }
 0x7a8   :  { %v8209_v58 = vpop.f32.mrb[91].mxu0  ;;  %v2840_v4 = vpop.f32.mrb[96].mxu1 }
 0x7a9   :  { %v8832_v23 = vpack.i.bf16 %v2888_v45, %v2840_v4  ;;  %v8202_v60 = vpop.f32.mrb[97].mxu1 }
 0x7aa   :  { %v2843_v44 = vpop.f32.mrb[98].mxu1 }
 0x7ab   :  { %v8203_v24 = vpop.f32.mrb[99].mxu1 }
 0x7ad   :  { %v2984_v61 = vpop.f32.mrb[92].mxu0 }
 0x7ae   :  { %v8220_v63 = vpop.f32.mrb[93].mxu0 }
 0x7af   :  { %v2987_v10 = vpop.f32.mrb[94].mxu0 }
 0x7b0   :  { %v8221_v40 = vpop.f32.mrb[95].mxu0  ;;  %v2936_v11 = vpop.f32.mrb[100].mxu1 }
 0x7b1   :  { %v8807_v15 = vpack.i.bf16 %v2984_v61, %v2936_v11  ;;  %v8214_v49 = vpop.f32.mrb[101].mxu1 }
 0x7b2   :  { %v2939_v59 = vpop.f32.mrb[102].mxu1 }
 0x7b3   :  { %8808 = vrot.lane.b32.xlu0 %v8807_v15, %s9319_s23  ;;  %v8215_v18 = vpop.f32.mrb[103].mxu1 }
 0x7b7   :  { %8818 = vrot.lane.b32.xlu0 %v8817_v5, %s9318_s2 }
 0x7bb   :  { %8828 = vrot.lane.b32.xlu0 %v8827_v34, %s9317_s0 }
 0x7c3   :  { %v8799_v51 = vpop.permute.xlu0 %8798 }
 0x7c4   :  { %v8801_v14 = vunpack.i.h.bf16 %v8799_v51  ;;  %v8800_v1 = vunpack.i.l.bf16 %v8799_v51 }
 0x7c6   :  { %v3255_v8 = vsel %vm567_vm9, %v10321_v39, %v8801_v14  ;;  %v3254_v38 = vsel %vm567_vm9, %v10323_v55, %v8800_v1 }
 0x7dd   :  { %v8804_v47 = vpop.permute.xlu1 %8803 }
 0x7de   :  { %v3080_v13 = vpop.f32.mrb[96].mxu0  ;;  %v8806_v31 = vunpack.i.h.bf16 %v8804_v47  ;;  %v8805_v37 = vunpack.i.l.bf16 %v8804_v47 }
 0x7df   :  { %v8232_v42 = vpop.f32.mrb[97].mxu0 }
 0x7e0   :  { %v3083_v16 = vpop.f32.mrb[98].mxu0  ;;  %v3262_v57 = vsel %vm3260_vm11, %v3255_v8, %v8806_v31  ;;  %v3261_v21 = vsel %vm3260_vm11, %v3254_v38, %v8805_v37  ;;  %v11778_v38 = vld [vmem:[#allocation15_spill] sm:$0xff] }
 0x7e1   :  { %v8233_v48 = vpop.f32.mrb[99].mxu0  ;;  %v8814_v39 = vpop.permute.xlu1 %8813 }
 0x7e2   :  { %v8816_v58 = vunpack.i.h.bf16 %v8814_v39  ;;  %v8815_v55 = vunpack.i.l.bf16 %v8814_v39 }
 0x7e4   :  { %v3257_v26 = vsel %vm567_vm9, %v10334_v3, %v8816_v58  ;;  %v3256_v54 = vsel %vm567_vm9, %v10339_v12, %v8815_v55  ;;  %v11780_v58 = vld [vmem:[#allocation16_spill] sm:$0xff] }
 0x7e5   :  { %v3032_v35 = vpop.f32.mrb[104].mxu1 }
 0x7e6   :  { %v8822_v2 = vpack.i.bf16 %v3080_v13, %v3032_v35  ;;  %v3176_v43 = vpop.f32.mrb[100].mxu0  ;;  %v8226_v62 = vpop.f32.mrb[105].mxu1 }
 0x7e7   :  { %v8244_v52 = vpop.f32.mrb[101].mxu0  ;;  %v3035_v19 = vpop.f32.mrb[106].mxu1 }
 0x7e8   :  { %v3179_v46 = vpop.f32.mrb[102].mxu0  ;;  %8823 = vrot.lane.b32.xlu1 %v8822_v2, %s9319_s23  ;;  %v8227_v50 = vpop.f32.mrb[107].mxu1 }
 0x7e9   :  { %v8245_v36 = vpop.f32.mrb[103].mxu0 }
 0x7ec   :  { %8833 = vrot.lane.b32.xlu1 %v8832_v23, %s9318_s2 }
 0x7ed   :  { %v3128_v28 = vpop.f32.mrb[108].mxu1 }
 0x7ee   :  { %v8837_v29 = vpack.i.bf16 %v3176_v43, %v3128_v28  ;;  %v8238_v34 = vpop.f32.mrb[109].mxu1 }
 0x7ef   :  { %v3131_v56 = vpop.f32.mrb[110].mxu1 }
 0x7f0   :  { %8838 = vrot.lane.b32.xlu0 %v8837_v29, %s9319_s23  ;;  %v8239_v0 = vpop.f32.mrb[111].mxu1 }
 0x825   :  { %v8809_v5 = vpop.permute.xlu0 %8808 }
 0x826   :  { %v8811_v9 = vunpack.i.h.bf16 %v8809_v5  ;;  %v8810_v33 = vunpack.i.l.bf16 %v8809_v5 }
 0x828   :  { %v3269_v30 = vsel %vm3267_vm12, %v3262_v57, %v8811_v9  ;;  %v3268_v45 = vsel %vm3267_vm12, %v3261_v21, %v8810_v33 }
 0x829   :  { %v3274_v22 = vpack.c.bf16 %v3269_v30, %v3268_v45  ;;  %v8819_v41 = vpop.permute.xlu0 %8818  ;;  %v11779_v45 = vld [vmem:[#allocation17_spill] sm:$0xff] }
 0x82a   :  { %v8821_v4 = vunpack.i.h.bf16 %v8819_v41  ;;  %v8820_v23 = vunpack.i.l.bf16 %v8819_v41 }
 0x82b   :  { %8251 = vmatmul.mubr.msk.bf16.vlgmr.msra.gmra.mrb[112].mxu1 %vm186_vm8, %v3274_v22 }
 0x82c   :  { %8254 = vmatprep.mubr.msk.bf16.mxu1 %vm9311_vm0, %v11777_v32  ;;  %v3264_v24 = vsel %vm3260_vm11, %v3257_v26, %v8821_v4  ;;  %v3263_v61 = vsel %vm3260_vm11, %v3256_v54, %v8820_v23 }
 0x82d   :  { %v8829_v63 = vpop.permute.xlu0 %8828 }
 0x82e   :  { %v8831_v49 = vunpack.i.h.bf16 %v8829_v63  ;;  %v8830_v59 = vunpack.i.l.bf16 %v8829_v63 }
 0x830   :  { %v3259_v13 = vsel %vm567_vm9, %v10341_v20, %v8831_v49  ;;  %v3258_v42 = vsel %vm567_vm9, %v10343_v25, %v8830_v59  ;;  %v10404_v20 = vld [vmem:[%s11744_s9] sm:$0xff]  ;;  %v298_v59 = vld [vmem:[%s11742_s7 + $0x18] sm:$0xff] }
 0x831   :  { %v3282_v25 = vrot.slane %v10404_v20, %v9546_v53 }
 0x85a   :  { %v8824_v60 = vpop.permute.xlu1 %8823 }
 0x85b   :  { %v8826_v44 = vunpack.i.h.bf16 %v8824_v60  ;;  %v8825_v27 = vunpack.i.l.bf16 %v8824_v60 }
 0x85d   :  { %v3271_v10 = vsel %vm3267_vm12, %v3264_v24, %v8826_v44  ;;  %v3270_v40 = vsel %vm3267_vm12, %v3263_v61, %v8825_v27 }
 0x85e   :  { %v8834_v11 = vpop.permute.xlu1 %8833  ;;  %v3275_v15 = vpack.c.bf16 %v3271_v10, %v3270_v40  ;;  %v295_v40 = vld [vmem:[%s11742_s7] sm:$0xff] }
 0x85f   :  { %v8836_v18 = vunpack.i.h.bf16 %v8834_v11  ;;  %v8835_v3 = vunpack.i.l.bf16 %v8834_v11  ;;  %v296_v11 = vld [vmem:[%s11742_s7 + $0x8] sm:$0xff] }
 0x860   :  { %8255 = vmatmul.mubr.msk.bf16.gmra.mrb[116].mxu1 %vm186_vm8, %v3275_v15  ;;  %v297_v15 = vld [vmem:[%s11742_s7 + $0x10] sm:$0xff]  ;;  %v3456_v49 = vpack.c.bf16 %v296_v11, %v295_v40 }
 0x861   :  { %8258 = vmatprep.mubr.msk.bf16.mxu1 %vm9311_vm0, %v11777_v32  ;;  %v3266_v35 = vsel %vm3260_vm11, %v3259_v13, %v8836_v18  ;;  %v3265_v2 = vsel %vm3260_vm11, %v3258_v42, %v8835_v3  ;;  %v3457_v18 = vpack.c.bf16 %v298_v59, %v297_v15 }
 0x862   :  { %v8839_v12 = vpop.permute.xlu0 %8838  ;;  %8263 = vmatpush3.bf16.msra.mxu0 %v3456_v49 }
 0x863   :  { %v8841_v16 = vunpack.i.h.bf16 %v8839_v12  ;;  %v8840_v48 = vunpack.i.l.bf16 %v8839_v12  ;;  %8264 = vmatprep.subr.bf16.mxu0 %v11777_v32 }
 0x865   :  { %v3273_v43 = vsel %vm3267_vm12, %v3266_v35, %v8841_v16  ;;  %v3272_v62 = vsel %vm3267_vm12, %v3265_v2, %v8840_v48 }
 0x866   :  { %v3276_v52 = vpack.c.bf16 %v3273_v43, %v3272_v62  ;;  %8265 = vmatpush3.bf16.msra.mxu0 %v3457_v18 }
 0x867   :  { %8306 = vmatprep.subr.bf16.mxu0 %v11777_v32 }
 0x868   :  { %8259 = vmatmul.mubr.msk.bf16.gmra.mrb[120].mxu1 %vm186_vm8, %v3276_v52 }
 0x869   :  { %8294 = vmatprep.mubr.msk.bf16.mxu1 %vm9311_vm0, %v11777_v32 }
 0x8fe   :  { %v3326_v19 = vpop.f32.mrb[112].mxu1 }
 0x8ff   :  { %v3327_v46 = vadd.f32 %v3326_v19, %v3282_v25  ;;  %v8252_v50 = vpop.f32.mrb[113].mxu1 }
 0x900   :  { %v3329_v36 = vpop.f32.mrb[114].mxu1 }
 0x901   :  { %v3349_v28 = vadd.f32 %v3327_v46, %v9551_v6  ;;  %v3330_v29 = vadd.f32 %v3329_v36, %v3282_v25  ;;  %v8253_v34 = vpop.f32.mrb[115].mxu1 }
 0x903   :  { %v3350_v56 = vadd.f32 %v3330_v29, %v9553_v7  ;;  %v3355_v0 = vsel %vm186_vm8, %v3349_v28, 0.0 }
 0x904   :  { %3356 = vadd.xlane.f32.xlu1 %v3355_v0 }
 0x905   :  { %v3358_v51 = vsel %vm186_vm8, %v3350_v56, 0.0 }
 0x906   :  { %3359 = vadd.xlane.f32.xlu0 %v3358_v51 }
 0x933   :  { %v3334_v47 = vpop.f32.mrb[116].mxu1 }
 0x934   :  { %v3335_v14 = vadd.f32 %v3334_v47, %v3282_v25  ;;  %v8256_v1 = vpop.f32.mrb[117].mxu1 }
 0x935   :  { %v3337_v31 = vpop.f32.mrb[118].mxu1 }
 0x936   :  { %v3351_v37 = vadd.f32 %v3335_v14, %v9562_v17  ;;  %v3338_v5 = vadd.f32 %v3337_v31, %v3282_v25  ;;  %v8257_v8 = vpop.f32.mrb[119].mxu1 }
 0x938   :  { %v3352_v6 = vadd.f32 %v3338_v5, %v11778_v38  ;;  %v3361_v9 = vsel %vm186_vm8, %v3351_v37, 0.0 }
 0x939   :  { %3362 = vadd.xlane.f32.xlu0 %v3361_v9 }
 0x93a   :  { %v3364_v7 = vsel %vm186_vm8, %v3352_v6, 0.0 }
 0x93b   :  { %3365 = vadd.xlane.f32.xlu1 %v3364_v7  ;;  %v3342_v33 = vpop.f32.mrb[120].mxu1 }
 0x93c   :  { %v3343_v57 = vadd.f32 %v3342_v33, %v3282_v25  ;;  %v8260_v21 = vpop.f32.mrb[121].mxu1 }
 0x93d   :  { %v3345_v30 = vpop.f32.mrb[122].mxu1 }
 0x93e   :  { %v3353_v22 = vadd.f32 %v3343_v57, %v11779_v45  ;;  %v3346_v39 = vadd.f32 %v3345_v30, %v3282_v25  ;;  %v8261_v41 = vpop.f32.mrb[123].mxu1 }
 0x940   :  { %v3354_v17 = vadd.f32 %v3346_v39, %v11780_v58  ;;  %v3367_v55 = vsel %vm186_vm8, %v3353_v22, 0.0 }
 0x941   :  { %3368 = vadd.xlane.f32.xlu0 %v3367_v55 }
 0x942   :  { %v3370_v4 = vsel %vm186_vm8, %v3354_v17, 0.0 }
 0x943   :  { %3371 = vadd.xlane.f32.xlu1 %v3370_v4 }
 0x991   :  { %v3357_v23 = vpop.xlane.xlu1 %3356 }
 0x992   :  { %v3373_v60 = vmul.f32 0.03125, %v3357_v23 }
 0x993   :  { %v3360_v26 = vpop.xlane.xlu0 %3359 }
 0x994   :  { %v3379_v54 = vsub.f32 %v3349_v28, %v3373_v60  ;;  %v3374_v44 = vmul.f32 0.03125, %v3360_v26 }
 0x996   :  { %v3380_v27 = vsub.f32 %v3350_v56, %v3374_v44  ;;  %v3385_v24 = vmul.f32 %v3379_v54, %v3379_v54 }
 0x998   :  { %v3391_v61 = vsel %vm186_vm8, %v3385_v24, 0.0  ;;  %v3386_v63 = vmul.f32 %v3380_v27, %v3380_v27 }
 0x999   :  { %3392 = vadd.xlane.f32.xlu0 %v3391_v61 }
 0x99a   :  { %v3394_v10 = vsel %vm186_vm8, %v3386_v63, 0.0 }
 0x99b   :  { %3395 = vadd.xlane.f32.xlu1 %v3394_v10 }
 0x9c6   :  { %v3363_v3 = vpop.xlane.xlu0 %3362 }
 0x9c7   :  { %v3375_v12 = vmul.f32 0.03125, %v3363_v3 }
 0x9c8   :  { %v3366_v13 = vpop.xlane.xlu1 %3365 }
 0x9c9   :  { %v3381_v42 = vsub.f32 %v3351_v37, %v3375_v12  ;;  %v3376_v16 = vmul.f32 0.03125, %v3366_v13  ;;  %v11781_v37 = vld [vmem:[#allocation13_spill] sm:$0xff] }
 0x9ca   :  { %v11767_v5 = vsub.s32 2, %v11781_v37  ;;  %v11766_v38 = vsub.s32 3, %v11781_v37 }
 0x9cb   :  { %v3382_v48 = vsub.f32 %v3352_v6, %v3376_v16  ;;  %v3387_v35 = vmul.f32 %v3381_v42, %v3381_v42 }
 0x9cc   :  { %v3436_v8 = vrot.slane %v10404_v20, %v11767_v5  ;;  %v3446_v21 = vrot.slane %v10404_v20, %v11766_v38 }
 0x9cd   :  { %v3397_v2 = vsel %vm186_vm8, %v3387_v35, 0.0  ;;  %v3388_v43 = vmul.f32 %v3382_v48, %v3382_v48 }
 0x9ce   :  { %3398 = vadd.xlane.f32.xlu0 %v3397_v2  ;;  %v3369_v62 = vpop.xlane.xlu0 %3368 }
 0x9cf   :  { %v3377_v52 = vmul.f32 0.03125, %v3369_v62  ;;  %v3400_v25 = vsel %vm186_vm8, %v3388_v43, 0.0  ;;  %v299_v62 = vld [vmem:[%s11743_s8] sm:$0xff] }
 0x9d0   :  { %3401 = vadd.xlane.f32.xlu1 %v3400_v25  ;;  %v3372_v19 = vpop.xlane.xlu1 %3371 }
 0x9d1   :  { %v3383_v46 = vsub.f32 %v3353_v22, %v3377_v52  ;;  %v3378_v50 = vmul.f32 0.03125, %v3372_v19  ;;  %v300_v52 = vld [vmem:[%s11743_s8 + $0x8] sm:$0xff]  ;;  %v301_v19 = vld [vmem:[%s11743_s8 + $0x10] sm:$0xff] }
 0x9d2   :  { %v3585_v25 = vpack.c.bf16 %v300_v52, %v299_v62 }
 0x9d3   :  { %v3384_v36 = vsub.f32 %v3354_v17, %v3378_v50  ;;  %v3389_v28 = vmul.f32 %v3383_v46, %v3383_v46 }
 0x9d4   :  { %8279 = vmatpush3.bf16.msra.mxu1 %v3585_v25 }
 0x9d5   :  { %v3403_v29 = vsel %vm186_vm8, %v3389_v28, 0.0  ;;  %v3390_v34 = vmul.f32 %v3384_v36, %v3384_v36  ;;  %8280 = vmatprep.subr.bf16.mxu1 %v11777_v32  ;;  %v304_v28 = vld [vmem:[%s11743_s8 + $0x28] sm:$0xff] }
 0x9d6   :  { %3404 = vadd.xlane.f32.xlu0 %v3403_v29 }
 0x9d7   :  { %v3406_v56 = vsel %vm186_vm8, %v3390_v34, 0.0  ;;  %v305_v34 = vld [vmem:[%s11743_s8 + $0x30] sm:$0xff] }
 0x9d8   :  { %3407 = vadd.xlane.f32.xlu1 %v3406_v56  ;;  %v306_v56 = vld [vmem:[%s11743_s8 + $0x38] sm:$0xff] }
 0xa26   :  { %v3393_v0 = vpop.xlane.xlu0 %3392 }
 0xa27   :  { %v3409_v51 = vmul.f32 0.03125, %v3393_v0  ;;  %v3588_v0 = vpack.c.bf16 %v306_v56, %v305_v34 }
 0xa28   :  { %v3396_v47 = vpop.xlane.xlu1 %3395 }
 0xa29   :  { %v3415_v14 = vadd.f32 1e-12, %v3409_v51  ;;  %v3410_v1 = vmul.f32 0.03125, %v3396_v47  ;;  %v307_v51 = vld [vmem:[%s11743_s8 + $0x40] sm:$0xff]  ;;  %v308_v47 = vld [vmem:[%s11743_s8 + $0x48] sm:$0xff] }
 0xa2b   :  { %9085 = vrsqrt.f32 %v3415_v14  ;;  %v3416_v31 = vadd.f32 1e-12, %v3410_v1  ;;  %v3589_v14 = vpack.c.bf16 %v308_v47, %v307_v51  ;;  %v309_v1 = vld [vmem:[%s11743_s8 + $0x50] sm:$0xff] }
 0xa2d   :  { %9087 = vrsqrt.f32 %v3416_v31  ;;  %v310_v31 = vld [vmem:[%s11743_s8 + $0x58] sm:$0xff] }
 0xa35   :  { %v9086_v6 = vpop.eup %9085 }
 0xa36   :  { %v3427_v9 = vmul.f32 %v9086_v6, %v3379_v54  ;;  %v311_v6 = vld [vmem:[%s11743_s8 + $0x60] sm:$0xff] }
 0xa37   :  { %v9088_v7 = vpop.eup %9087 }
 0xa38   :  { %v3437_v33 = vmul.f32 %v3436_v8, %v3427_v9  ;;  %v3428_v57 = vmul.f32 %v9088_v7, %v3380_v27  ;;  %v312_v9 = vld [vmem:[%s11743_s8 + $0x68] sm:$0xff] }
 0xa39   :  { %v3591_v7 = vpack.c.bf16 %v312_v9, %v311_v6 }
 0xa3a   :  { %v3438_v30 = vmul.f32 %v3436_v8, %v3428_v57  ;;  %v10448_v45 = vadd.f32 %v3446_v21, %v3437_v33  ;;  %v313_v33 = vld [vmem:[%s11743_s8 + $0x70] sm:$0xff]  ;;  %v314_v57 = vld [vmem:[%s11743_s8 + $0x78] sm:$0xff] }
 0xa3c   :  { %v10450_v22 = vadd.f32 %v3446_v21, %v3438_v30  ;;  %v11765_v30 = vsub.s32 4, %v11781_v37 }
 0xa3e   :  { %v3453_v39 = vpack.c.bf16 %v10450_v22, %v10448_v45 }
 0xa40   :  { %8267 = vmatmul.mubr.msk.bf16.vlgmr.msra.gmra.mrb[104].mxu0 %vm186_vm8, %v3453_v39  ;;  %v3461_v39 = vrot.slane %v10404_v20, %v11765_v30 }
 0xa41   :  { %8270 = vmatprep.mubr.msk.bf16.mxu0 %vm9311_vm0, %v11777_v32 }
 0xa5b   :  { %v3399_v41 = vpop.xlane.xlu0 %3398 }
 0xa5c   :  { %v3411_v58 = vmul.f32 0.03125, %v3399_v41 }
 0xa5d   :  { %v3402_v17 = vpop.xlane.xlu1 %3401 }
 0xa5e   :  { %v3417_v55 = vadd.f32 1e-12, %v3411_v58  ;;  %v3412_v4 = vmul.f32 0.03125, %v3402_v17 }
 0xa60   :  { %9089 = vrsqrt.f32 %v3417_v55  ;;  %v3418_v23 = vadd.f32 1e-12, %v3412_v4 }
 0xa62   :  { %9091 = vrsqrt.f32 %v3418_v23 }
 0xa63   :  { %v3405_v60 = vpop.xlane.xlu0 %3404 }
 0xa64   :  { %v3413_v26 = vmul.f32 0.03125, %v3405_v60 }
 0xa65   :  { %v3408_v54 = vpop.xlane.xlu1 %3407 }
 0xa66   :  { %v3419_v44 = vadd.f32 1e-12, %v3413_v26  ;;  %v3414_v27 = vmul.f32 0.03125, %v3408_v54 }
 0xa68   :  { %9093 = vrsqrt.f32 %v3419_v44  ;;  %v3420_v24 = vadd.f32 1e-12, %v3414_v27 }
 0xa6a   :  { %v9090_v61 = vpop.eup %9089  ;;  %9095 = vrsqrt.f32 %v3420_v24 }
 0xa6b   :  { %v3429_v63 = vmul.f32 %v9090_v61, %v3381_v42 }
 0xa6c   :  { %v9092_v10 = vpop.eup %9091 }
 0xa6d   :  { %v3430_v40 = vmul.f32 %v9092_v10, %v3382_v48  ;;  %v3439_v11 = vmul.f32 %v3436_v8, %v3429_v63 }
 0xa6f   :  { %v3440_v15 = vmul.f32 %v3436_v8, %v3430_v40  ;;  %v10457_v49 = vadd.f32 %v3446_v21, %v3439_v11 }
 0xa71   :  { %v10459_v59 = vadd.f32 %v3446_v21, %v3440_v15 }
 0xa72   :  { %v9094_v18 = vpop.eup %9093 }
 0xa73   :  { %v3454_v3 = vpack.c.bf16 %v10459_v59, %v10457_v49  ;;  %v3431_v12 = vmul.f32 %v9094_v18, %v3383_v46  ;;  %v302_v46 = vld [vmem:[%s11743_s8 + $0x18] sm:$0xff] }
 0xa74   :  { %v9096_v13 = vpop.eup %9095  ;;  %v3586_v50 = vpack.c.bf16 %v302_v46, %v301_v19 }
 0xa75   :  { %8271 = vmatmul.mubr.msk.bf16.gmra.mrb[108].mxu0 %vm186_vm8, %v3454_v3  ;;  %v3432_v16 = vmul.f32 %v9096_v13, %v3384_v36  ;;  %v3441_v35 = vmul.f32 %v3436_v8, %v3431_v12  ;;  %v303_v36 = vld [vmem:[%s11743_s8 + $0x20] sm:$0xff] }
 0xa76   :  { %8274 = vmatprep.mubr.msk.bf16.mxu0 %vm9311_vm0, %v11777_v32  ;;  %8281 = vmatpush3.bf16.msra.mxu1 %v3586_v50  ;;  %v3587_v29 = vpack.c.bf16 %v304_v28, %v303_v36 }
 0xa77   :  { %v3442_v42 = vmul.f32 %v3436_v8, %v3432_v16  ;;  %v10466_v48 = vadd.f32 %v3446_v21, %v3441_v35  ;;  %8282 = vmatprep.subr.bf16.mxu1 %v11777_v32  ;;  %v3590_v8 = vpack.c.bf16 %v310_v31, %v309_v1 }
 0xa79   :  { %v10468_v2 = vadd.f32 %v3446_v21, %v3442_v42  ;;  %v3592_v21 = vpack.c.bf16 %v314_v57, %v313_v33 }
 0xa7a   :  { %8283 = vmatpush3.bf16.msra.mxu1 %v3587_v29 }
 0xa7b   :  { %v3455_v43 = vpack.c.bf16 %v10468_v2, %v10466_v48  ;;  %8284 = vmatprep.subr.bf16.mxu1 %v11777_v32 }
 0xa7d   :  { %8275 = vmatmul.mubr.msk.bf16.gmra.mrb[112].mxu0 %vm186_vm8, %v3455_v43 }
 0xa7e   :  { %8310 = vmatprep.mubr.msk.bf16.mxu0 %vm9311_vm0, %v11777_v32  ;;  %8285 = vmatpush3.bf16.msra.mxu1 %v3588_v0 }
 0xa7f   :  { %8286 = vmatprep.subr.bf16.mxu1 %v11777_v32 }
 0xa82   :  { %8287 = vmatpush3.bf16.msra.mxu1 %v3589_v14 }
 0xa83   :  { %8288 = vmatprep.subr.bf16.mxu1 %v11777_v32 }
 0xa86   :  { %8289 = vmatpush3.bf16.msra.mxu1 %v3590_v8 }
 0xa87   :  { %8290 = vmatprep.subr.bf16.mxu1 %v11777_v32 }
 0xa8a   :  { %8291 = vmatpush3.bf16.msra.mxu1 %v3591_v7 }
 0xa8b   :  { %8292 = vmatprep.subr.bf16.mxu1 %v11777_v32 }
 0xa8e   :  { %8293 = vmatpush3.bf16.msra.mxu1 %v3592_v21 }
 0xa8f   :  { %8328 = vmatprep.subr.bf16.mxu1 %v11777_v32 }
 0xb13   :  { %v3505_v41 = vpop.f32.mrb[104].mxu0 }
 0xb14   :  { %v3506_v58 = vadd.f32 %v3505_v41, %v3461_v39  ;;  %v8268_v17 = vpop.f32.mrb[105].mxu0 }
 0xb15   :  { %v3508_v55 = vpop.f32.mrb[106].mxu0 }
 0xb16   :  { %v3534_v4 = vmul.f32 0.044715, %v3506_v58  ;;  %v3509_v23 = vadd.f32 %v3508_v55, %v3461_v39  ;;  %v8269_v60 = vpop.f32.mrb[107].mxu0  ;;  %v3528_v3 = vmul.f32 0.5, %v3506_v58 }
 0xb18   :  { %v3540_v26 = vmul.f32 %v3534_v4, %v3506_v58  ;;  %v3535_v54 = vmul.f32 0.044715, %v3509_v23  ;;  %v3529_v12 = vmul.f32 0.5, %v3509_v23 }
 0xb1a   :  { %v3546_v44 = vmul.f32 %v3540_v26, %v3506_v58  ;;  %v3541_v27 = vmul.f32 %v3535_v54, %v3509_v23 }
 0xb1c   :  { %v3552_v24 = vadd.f32 %v3546_v44, %v3506_v58  ;;  %v3547_v61 = vmul.f32 %v3541_v27, %v3509_v23 }
 0xb1e   :  { %v3558_v63 = vmul.f32 0.7978846, %v3552_v24  ;;  %v3553_v10 = vadd.f32 %v3547_v61, %v3509_v23 }
 0xb20   :  { %9097 = vtanh.f32 %v3558_v63  ;;  %v3559_v40 = vmul.f32 0.7978846, %v3553_v10 }
 0xb22   :  { %9099 = vtanh.f32 %v3559_v40 }
 0xb2a   :  { %v9098_v11 = vpop.eup %9097 }
 0xb2b   :  { %v3570_v15 = vadd.f32 1.0, %v9098_v11 }
 0xb2c   :  { %v9100_v18 = vpop.eup %9099 }
 0xb2d   :  { %v3571_v13 = vadd.f32 1.0, %v9100_v18  ;;  %v3576_v16 = vmul.f32 %v3570_v15, %v3528_v3 }
 0xb2f   :  { %v3577_v35 = vmul.f32 %v3571_v13, %v3529_v12 }
 0xb31   :  { %v3582_v42 = vpack.c.bf16 %v3577_v35, %v3576_v16 }
 0xb33   :  { %8295 = vmatmul.mubr.bf16.vlgmr.msra.gmra.mrb[124].mxu1 %v3582_v42  ;;  %v11764_v42 = vsub.s32 5, %v11781_v37 }
 0xb34   :  { %8298 = vmatprep.mubr.msk.bf16.mxu1 %vm9311_vm0, %v11777_v32 }
 0xb48   :  { %v3513_v43 = vpop.f32.mrb[108].mxu0 }
 0xb49   :  { %v3514_v62 = vadd.f32 %v3513_v43, %v3461_v39  ;;  %v8272_v52 = vpop.f32.mrb[109].mxu0  ;;  %v3596_v43 = vrot.slane %v10404_v20, %v11764_v42 }
 0xb4a   :  { %v3516_v25 = vpop.f32.mrb[110].mxu0 }
 0xb4b   :  { %v3536_v19 = vmul.f32 0.044715, %v3514_v62  ;;  %v3517_v46 = vadd.f32 %v3516_v25, %v3461_v39  ;;  %v8273_v50 = vpop.f32.mrb[111].mxu0  ;;  %v3530_v44 = vmul.f32 0.5, %v3514_v62 }
 0xb4d   :  { %v3542_v36 = vmul.f32 %v3536_v19, %v3514_v62  ;;  %v3537_v28 = vmul.f32 0.044715, %v3517_v46  ;;  %v3531_v27 = vmul.f32 0.5, %v3517_v46 }
 0xb4f   :  { %v3548_v29 = vmul.f32 %v3542_v36, %v3514_v62  ;;  %v3543_v34 = vmul.f32 %v3537_v28, %v3517_v46 }
 0xb50   :  { %v3521_v56 = vpop.f32.mrb[112].mxu0 }
 0xb51   :  { %v3549_v0 = vmul.f32 %v3543_v34, %v3517_v46  ;;  %v3522_v51 = vadd.f32 %v3521_v56, %v3461_v39  ;;  %v8276_v47 = vpop.f32.mrb[113].mxu0  ;;  %v3554_v14 = vadd.f32 %v3548_v29, %v3514_v62 }
 0xb52   :  { %v3524_v1 = vpop.f32.mrb[114].mxu0 }
 0xb53   :  { %v3538_v31 = vmul.f32 0.044715, %v3522_v51  ;;  %v3525_v8 = vadd.f32 %v3524_v1, %v3461_v39  ;;  %v8277_v6 = vpop.f32.mrb[115].mxu0  ;;  %v3555_v9 = vadd.f32 %v3549_v0, %v3517_v46  ;;  %v3560_v7 = vmul.f32 0.7978846, %v3554_v14 }
 0xb54   :  { %v3532_v18 = vmul.f32 0.5, %v3522_v51 }
 0xb55   :  { %v3544_v33 = vmul.f32 %v3538_v31, %v3522_v51  ;;  %v3539_v57 = vmul.f32 0.044715, %v3525_v8  ;;  %v3561_v21 = vmul.f32 0.7978846, %v3555_v9  ;;  %9101 = vtanh.f32 %v3560_v7 }
 0xb56   :  { %v3533_v3 = vmul.f32 0.5, %v3525_v8 }
 0xb57   :  { %v3550_v41 = vmul.f32 %v3544_v33, %v3522_v51  ;;  %v3545_v58 = vmul.f32 %v3539_v57, %v3525_v8  ;;  %9103 = vtanh.f32 %v3561_v21 }
 0xb59   :  { %v3551_v17 = vmul.f32 %v3545_v58, %v3525_v8  ;;  %v3556_v55 = vadd.f32 %v3550_v41, %v3522_v51 }
 0xb5b   :  { %v3557_v4 = vadd.f32 %v3551_v17, %v3525_v8  ;;  %v3562_v23 = vmul.f32 0.7978846, %v3556_v55 }
 0xb5d   :  { %v3563_v60 = vmul.f32 0.7978846, %v3557_v4  ;;  %9105 = vtanh.f32 %v3562_v23 }
 0xb5f   :  { %v9102_v26 = vpop.eup %9101  ;;  %9107 = vtanh.f32 %v3563_v60 }
 0xb60   :  { %v3572_v54 = vadd.f32 1.0, %v9102_v26 }
 0xb61   :  { %v9104_v39 = vpop.eup %9103 }
 0xb62   :  { %v3573_v24 = vadd.f32 1.0, %v9104_v39  ;;  %v3578_v61 = vmul.f32 %v3572_v54, %v3530_v44 }
 0xb64   :  { %v3579_v63 = vmul.f32 %v3573_v24, %v3531_v27  ;;  %v7574_v27 = vld [vmem:[%s11740_s5 + $0x28] sm:$0xff] }
 0xb66   :  { %v3583_v10 = vpack.c.bf16 %v3579_v63, %v3578_v61  ;;  %v7575_v61 = vld [vmem:[%s11740_s5 + $0x30] sm:$0xff]  ;;  %v7576_v63 = vld [vmem:[%s11740_s5 + $0x38] sm:$0xff] }
 0xb67   :  { %v9106_v40 = vpop.eup %9105 }
 0xb68   :  { %8299 = vmatmul.mubr.bf16.gmra.mrb[128].mxu1 %v3583_v10  ;;  %v3574_v11 = vadd.f32 1.0, %v9106_v40  ;;  %v3796_v10 = vpack.c.bf16 %v7576_v63, %v7575_v61 }
 0xb69   :  { %v9108_v15 = vpop.eup %9107  ;;  %8302 = vmatprep.mubr.msk.bf16.mxu1 %vm9311_vm0, %v11777_v32 }
 0xb6a   :  { %v3575_v12 = vadd.f32 1.0, %v9108_v15  ;;  %v3580_v13 = vmul.f32 %v3574_v11, %v3532_v18 }
 0xb6c   :  { %v3581_v16 = vmul.f32 %v3575_v12, %v3533_v3 }
 0xb6e   :  { %v3584_v35 = vpack.c.bf16 %v3581_v16, %v3580_v13 }
 0xb70   :  { %8303 = vmatmul.mubr.bf16.gmra.mrb[132].mxu1 %v3584_v35 }
 0xb71   :  { %8330 = vmatprep.mubr.msk.bf16.mxu1 %vm9311_vm0, %v11777_v32 }
 0xc06   :  { %v3631_v62 = vpop.f32.mrb[124].mxu1 }
 0xc07   :  { %v3632_v52 = vadd.f32 %v3631_v62, %v3596_v43  ;;  %v8296_v25 = vpop.f32.mrb[125].mxu1 }
 0xc08   :  { %v3634_v19 = vpop.f32.mrb[126].mxu1 }
 0xc09   :  { %v3654_v46 = vadd.f32 %v3632_v52, %v10448_v45  ;;  %v3635_v50 = vadd.f32 %v3634_v19, %v3596_v43  ;;  %v8297_v36 = vpop.f32.mrb[127].mxu1 }
 0xc0b   :  { %v3655_v28 = vadd.f32 %v3635_v50, %v10450_v22  ;;  %v3660_v29 = vsel %vm186_vm8, %v3654_v46, 0.0 }
 0xc0c   :  { %3661 = vadd.xlane.f32.xlu0 %v3660_v29 }
 0xc0d   :  { %v3663_v34 = vsel %vm186_vm8, %v3655_v28, 0.0 }
 0xc0e   :  { %3664 = vadd.xlane.f32.xlu1 %v3663_v34 }
 0xc3b   :  { %v3639_v56 = vpop.f32.mrb[128].mxu1 }
 0xc3c   :  { %v3640_v0 = vadd.f32 %v3639_v56, %v3596_v43  ;;  %v8300_v51 = vpop.f32.mrb[129].mxu1 }
 0xc3d   :  { %v3642_v47 = vpop.f32.mrb[130].mxu1 }
 0xc3e   :  { %v3656_v14 = vadd.f32 %v3640_v0, %v10457_v49  ;;  %v3643_v1 = vadd.f32 %v3642_v47, %v3596_v43  ;;  %v8301_v31 = vpop.f32.mrb[131].mxu1 }
 0xc3f   :  { %v11763_v31 = vsub.s32 6, %v11781_v37 }
 0xc40   :  { %v3657_v45 = vadd.f32 %v3643_v1, %v10459_v59  ;;  %v3666_v8 = vsel %vm186_vm8, %v3656_v14, 0.0 }
 0xc41   :  { %3667 = vadd.xlane.f32.xlu0 %v3666_v8  ;;  %v11762_v8 = vsub.s32 7, %v11781_v37 }
 0xc42   :  { %v3669_v22 = vsel %vm186_vm8, %v3657_v45, 0.0 }
 0xc43   :  { %3670 = vadd.xlane.f32.xlu1 %v3669_v22  ;;  %v3647_v6 = vpop.f32.mrb[132].mxu1 }
 0xc44   :  { %v3648_v9 = vadd.f32 %v3647_v6, %v3596_v43  ;;  %v8304_v7 = vpop.f32.mrb[133].mxu1 }
 0xc45   :  { %v3650_v33 = vpop.f32.mrb[134].mxu1  ;;  %v3751_v7 = vrot.slane %v10404_v20, %v11762_v8 }
 0xc46   :  { %v3658_v57 = vadd.f32 %v3648_v9, %v10466_v48  ;;  %v3651_v21 = vadd.f32 %v3650_v33, %v3596_v43  ;;  %v8305_v41 = vpop.f32.mrb[135].mxu1 }
 0xc48   :  { %v3659_v49 = vadd.f32 %v3651_v21, %v10468_v2  ;;  %v3672_v58 = vsel %vm186_vm8, %v3658_v57, 0.0  ;;  %v7573_v2 = vld [vmem:[%s11740_s5 + $0x20] sm:$0xff] }
 0xc49   :  { %3673 = vadd.xlane.f32.xlu0 %v3672_v58  ;;  %v3795_v24 = vpack.c.bf16 %v7574_v27, %v7573_v2 }
 0xc4a   :  { %v3675_v59 = vsel %vm186_vm8, %v3659_v49, 0.0 }
 0xc4b   :  { %3676 = vadd.xlane.f32.xlu1 %v3675_v59  ;;  %8307 = vmatpush3.bf16.msra.mxu0 %v3795_v24 }
 0xc4c   :  { %8308 = vmatprep.subr.bf16.mxu0 %v11777_v32 }
 0xc4f   :  { %8309 = vmatpush3.bf16.msra.mxu0 %v3796_v10 }
 0xc50   :  { %8322 = vmatprep.subr.bf16.mxu0 %v11777_v32 }
 0xc99   :  { %v3662_v17 = vpop.xlane.xlu0 %3661 }
 0xc9a   :  { %v3678_v55 = vmul.f32 0.03125, %v3662_v17 }
 0xc9b   :  { %v3665_v4 = vpop.xlane.xlu1 %3664 }
 0xc9c   :  { %v3684_v23 = vsub.f32 %v3654_v46, %v3678_v55  ;;  %v3679_v60 = vmul.f32 0.03125, %v3665_v4 }
 0xc9e   :  { %v3685_v26 = vsub.f32 %v3655_v28, %v3679_v60  ;;  %v3690_v54 = vmul.f32 %v3684_v23, %v3684_v23 }
 0xca0   :  { %v3696_v39 = vsel %vm186_vm8, %v3690_v54, 0.0  ;;  %v3691_v48 = vmul.f32 %v3685_v26, %v3685_v26 }
 0xca1   :  { %3697 = vadd.xlane.f32.xlu0 %v3696_v39 }
 0xca2   :  { %v3699_v44 = vsel %vm186_vm8, %v3691_v48, 0.0 }
 0xca3   :  { %3700 = vadd.xlane.f32.xlu1 %v3699_v44 }
 0xcce   :  { %v3668_v40 = vpop.xlane.xlu0 %3667 }
 0xccf   :  { %v3680_v11 = vmul.f32 0.03125, %v3668_v40 }
 0xcd0   :  { %v3671_v15 = vpop.xlane.xlu1 %3670 }
 0xcd1   :  { %v3686_v18 = vsub.f32 %v3656_v14, %v3680_v11  ;;  %v3681_v3 = vmul.f32 0.03125, %v3671_v15 }
 0xcd3   :  { %v3687_v12 = vsub.f32 %v3657_v45, %v3681_v3  ;;  %v3692_v13 = vmul.f32 %v3686_v18, %v3686_v18  ;;  %v3741_v45 = vrot.slane %v10404_v20, %v11763_v31 }
 0xcd5   :  { %v3702_v16 = vsel %vm186_vm8, %v3692_v13, 0.0  ;;  %v3693_v35 = vmul.f32 %v3687_v12, %v3687_v12 }
 0xcd6   :  { %3703 = vadd.xlane.f32.xlu0 %v3702_v16  ;;  %v3674_v43 = vpop.xlane.xlu0 %3673 }
 0xcd7   :  { %v3682_v62 = vmul.f32 0.03125, %v3674_v43  ;;  %v3705_v52 = vsel %vm186_vm8, %v3693_v35, 0.0 }
 0xcd8   :  { %3706 = vadd.xlane.f32.xlu1 %v3705_v52  ;;  %v3677_v25 = vpop.xlane.xlu1 %3676 }
 0xcd9   :  { %v3688_v19 = vsub.f32 %v3658_v57, %v3682_v62  ;;  %v3683_v46 = vmul.f32 0.03125, %v3677_v25  ;;  %v7572_v25 = vld [vmem:[%s11744_s9 + $0x8] sm:$0xff] }
 0xcdb   :  { %v3689_v50 = vsub.f32 %v3659_v49, %v3683_v46  ;;  %v3694_v36 = vmul.f32 %v3688_v19, %v3688_v19 }
 0xcdd   :  { %v3708_v28 = vsel %vm186_vm8, %v3694_v36, 0.0  ;;  %v3695_v29 = vmul.f32 %v3689_v50, %v3689_v50 }
 0xcde   :  { %3709 = vadd.xlane.f32.xlu0 %v3708_v28 }
 0xcdf   :  { %v3711_v34 = vsel %vm186_vm8, %v3695_v29, 0.0 }
 0xce0   :  { %3712 = vadd.xlane.f32.xlu1 %v3711_v34 }
 0xd2e   :  { %v3698_v56 = vpop.xlane.xlu0 %3697 }
 0xd2f   :  { %v3714_v0 = vmul.f32 0.03125, %v3698_v56 }
 0xd30   :  { %v3701_v51 = vpop.xlane.xlu1 %3700 }
 0xd31   :  { %v3720_v47 = vadd.f32 1e-12, %v3714_v0  ;;  %v3715_v14 = vmul.f32 0.03125, %v3701_v51 }
 0xd33   :  { %9109 = vrsqrt.f32 %v3720_v47  ;;  %v3721_v1 = vadd.f32 1e-12, %v3715_v14 }
 0xd35   :  { %9111 = vrsqrt.f32 %v3721_v1 }
 0xd3d   :  { %v9110_v22 = vpop.eup %9109 }
 0xd3e   :  { %v3732_v6 = vmul.f32 %v9110_v22, %v3684_v23 }
 0xd3f   :  { %v9112_v9 = vpop.eup %9111 }
 0xd40   :  { %v3742_v33 = vmul.f32 %v3741_v45, %v3732_v6  ;;  %v3733_v57 = vmul.f32 %v9112_v9, %v3685_v26 }
 0xd42   :  { %v3743_v21 = vmul.f32 %v3741_v45, %v3733_v57  ;;  %v10585_v41 = vadd.f32 %v3751_v7, %v3742_v33 }
 0xd44   :  { %v10587_v49 = vadd.f32 %v3751_v7, %v3743_v21 }
 0xd46   :  { %v3792_v58 = vpack.c.bf16 %v10587_v49, %v10585_v41 }
 0xd48   :  { %8311 = vmatmul.mubr.msk.bf16.vlgmr.msra.gmra.mrb[116].mxu0 %vm186_vm8, %v3792_v58 }
 0xd49   :  { %8314 = vmatprep.mubr.msk.bf16.mxu0 %vm9311_vm0, %v11777_v32 }
 0xd63   :  { %v3704_v59 = vpop.xlane.xlu0 %3703 }
 0xd64   :  { %v3716_v17 = vmul.f32 0.03125, %v3704_v59 }
 0xd65   :  { %v3707_v55 = vpop.xlane.xlu1 %3706 }
 0xd66   :  { %v3722_v4 = vadd.f32 1e-12, %v3716_v17  ;;  %v3717_v20 = vmul.f32 0.03125, %v3707_v55 }
 0xd68   :  { %9113 = vrsqrt.f32 %v3722_v4  ;;  %v3723_v23 = vadd.f32 1e-12, %v3717_v20 }
 0xd6a   :  { %9115 = vrsqrt.f32 %v3723_v23 }
 0xd6b   :  { %v3710_v60 = vpop.xlane.xlu0 %3709 }
 0xd6c   :  { %v3718_v26 = vmul.f32 0.03125, %v3710_v60 }
 0xd6d   :  { %v3713_v54 = vpop.xlane.xlu1 %3712 }
 0xd6e   :  { %v3724_v39 = vadd.f32 1e-12, %v3718_v26  ;;  %v3719_v48 = vmul.f32 0.03125, %v3713_v54 }
 0xd70   :  { %9117 = vrsqrt.f32 %v3724_v39  ;;  %v3725_v44 = vadd.f32 1e-12, %v3719_v48 }
 0xd72   :  { %v9114_v2 = vpop.eup %9113  ;;  %9119 = vrsqrt.f32 %v3725_v44 }
 0xd73   :  { %v3734_v27 = vmul.f32 %v9114_v2, %v3686_v18 }
 0xd74   :  { %v9116_v24 = vpop.eup %9115 }
 0xd75   :  { %v3735_v61 = vmul.f32 %v9116_v24, %v3687_v12  ;;  %v3744_v63 = vmul.f32 %v3741_v45, %v3734_v27 }
 0xd77   :  { %v3745_v10 = vmul.f32 %v3741_v45, %v3735_v61  ;;  %v10594_v40 = vadd.f32 %v3751_v7, %v3744_v63 }
 0xd79   :  { %v10596_v11 = vadd.f32 %v3751_v7, %v3745_v10 }
 0xd7a   :  { %v9118_v15 = vpop.eup %9117 }
 0xd7b   :  { %v3793_v3 = vpack.c.bf16 %v10596_v11, %v10594_v40  ;;  %v3736_v13 = vmul.f32 %v9118_v15, %v3688_v19  ;;  %v11784_v19 = vld [vmem:[#allocation14_spill] sm:$0xff] }
 0xd7c   :  { %v9120_v16 = vpop.eup %9119  ;;  %v3800_v46 = vrot.slane %v7572_v25, %v11784_v19 }
 0xd7d   :  { %8315 = vmatmul.mubr.msk.bf16.gmra.mrb[120].mxu0 %vm186_vm8, %v3793_v3  ;;  %v3737_v35 = vmul.f32 %v9120_v16, %v3689_v50  ;;  %v3746_v43 = vmul.f32 %v3741_v45, %v3736_v13 }
 0xd7e   :  { %8318 = vmatprep.mubr.msk.bf16.mxu0 %vm9311_vm0, %v11777_v32 }
 0xd7f   :  { %v3747_v18 = vmul.f32 %v3741_v45, %v3737_v35  ;;  %v10603_v12 = vadd.f32 %v3751_v7, %v3746_v43 }
 0xd81   :  { %11782 = vst [vmem:[#allocation15_spill] sm:$0xff] %v10603_v12  ;;  %v10605_v62 = vadd.f32 %v3751_v7, %v3747_v18 }
 0xd83   :  { %11783 = vst [vmem:[#allocation17_spill] sm:$0xff] %v10605_v62  ;;  %v3794_v52 = vpack.c.bf16 %v10605_v62, %v10603_v12 }
 0xd85   :  { %8319 = vmatmul.mubr.msk.bf16.gmra.mrb[124].mxu0 %vm186_vm8, %v3794_v52 }
 0xd86   :  { %8324 = vmatprep.mubr.msk.bf16.mxu0 %vm9311_vm0, %v11777_v32 }
 0xe1b   :  { %v3844_v50 = vpop.f32.mrb[116].mxu0 }
 0xe1c   :  { %v3845_v36 = vadd.f32 %v3844_v50, %v3800_v46  ;;  %v8312_v28 = vpop.f32.mrb[117].mxu0 }
 0xe1d   :  { %v3847_v29 = vpop.f32.mrb[118].mxu0 }
 0xe1e   :  { %v3848_v34 = vadd.f32 %v3847_v29, %v3800_v46  ;;  %v8313_v56 = vpop.f32.mrb[119].mxu0  ;;  %v3867_v0 = vmul.f32 0.35355338, %v3845_v36  ;;  %v10623_v1 = vpack.c.bf16 %v3845_v36, %v3845_v36 }
 0xe20   :  { %v10616_v51 = vmul.f32 0.35355338, %v3848_v34  ;;  %v8842_v47 = vpack.i.bf16 %v3848_v34, %v3845_v36  ;;  %v10653_v27 = vpack.c.bf16 %v3848_v34, %v3848_v34  ;;  %v3993_v18 = vpack.c.bf16 %v3867_v0, %v3867_v0 }
 0xe22   :  { %8843 = vrot.lane.b32.xlu0 %v8842_v47, %s9312_s26  ;;  %v10620_v14 = vpack.i.bf16 %v10616_v51, %v3867_v0 }
 0xe26   :  { %8858 = vrot.lane.b32.xlu0 %v8842_v47, %s9314_s28 }
 0xe2a   :  { %4042 = vrot.lane.b32.xlu0 %v10623_v1, %s9313_s27 }
 0xe50   :  { %v3852_v45 = vpop.f32.mrb[120].mxu0 }
 0xe51   :  { %v3853_v22 = vadd.f32 %v3852_v45, %v3800_v46  ;;  %v8316_v6 = vpop.f32.mrb[121].mxu0 }
 0xe52   :  { %v3855_v9 = vpop.f32.mrb[122].mxu0 }
 0xe53   :  { %v3856_v7 = vadd.f32 %v3855_v9, %v3800_v46  ;;  %v8317_v33 = vpop.f32.mrb[123].mxu0  ;;  %v10627_v57 = vmul.f32 0.35355338, %v3853_v22  ;;  %v10659_v24 = vpack.c.bf16 %v3853_v22, %v3853_v22 }
 0xe55   :  { %v10629_v21 = vmul.f32 0.35355338, %v3856_v7  ;;  %v8847_v58 = vpack.i.bf16 %v3856_v7, %v3853_v22  ;;  %v10646_v44 = vpack.c.bf16 %v3856_v7, %v3856_v7 }
 0xe57   :  { %8848 = vrot.lane.b32.xlu1 %v8847_v58, %s9312_s26  ;;  %v10634_v59 = vpack.i.bf16 %v10629_v21, %v10627_v57 }
 0xe58   :  { %v3860_v17 = vpop.f32.mrb[124].mxu0 }
 0xe59   :  { %v3861_v55 = vadd.f32 %v3860_v17, %v3800_v46  ;;  %v8320_v4 = vpop.f32.mrb[125].mxu0 }
 0xe5a   :  { %v3863_v20 = vpop.f32.mrb[126].mxu0 }
 0xe5b   :  { %v3864_v23 = vadd.f32 %v3863_v20, %v3800_v46  ;;  %v8321_v60 = vpop.f32.mrb[127].mxu0  ;;  %v10636_v26 = vmul.f32 0.35355338, %v3861_v55  ;;  %v10651_v2 = vpack.c.bf16 %v3861_v55, %v3861_v55 }
 0xe5c   :  { %v3994_v60 = vpack.c.bf16 %v10616_v51, %v10616_v51  ;;  %v3995_v51 = vpack.c.bf16 %v10627_v57, %v10627_v57 }
 0xe5d   :  { %v10638_v54 = vmul.f32 0.35355338, %v3864_v23  ;;  %v8867_v39 = vpack.i.bf16 %v3864_v23, %v3861_v55  ;;  %v10665_v61 = vpack.c.bf16 %v3864_v23, %v3864_v23 }
 0xe5f   :  { %8868 = vrot.lane.b32.xlu0 %v8867_v39, %s9314_s28  ;;  %8853 = vrot.lane.b32.xlu1 %v8867_v39, %s9312_s26  ;;  %v10644_v48 = vpack.i.bf16 %v10638_v54, %v10636_v26 }
 0xe63   :  { %4189 = vrot.lane.b32.xlu0 %v10646_v44, %s9313_s27  ;;  %8863 = vrot.lane.b32.xlu1 %v8847_v58, %s9314_s28 }
 0xe67   :  { %4238 = vrot.lane.b32.xlu0 %v10651_v2, %s9313_s27  ;;  %4091 = vrot.lane.b32.xlu1 %v10653_v27, %s9313_s27 }
 0xe6b   :  { %8878 = vrot.lane.b32.xlu0 %v8847_v58, %s9315_s29  ;;  %4140 = vrot.lane.b32.xlu1 %v10659_v24, %s9313_s27 }
 0xe6f   :  { %8873 = vrot.lane.b32.xlu1 %v8842_v47, %s9315_s29 }
 0xe73   :  { %4287 = vrot.lane.b32.xlu1 %v10665_v61, %s9313_s27 }
 0xe94   :  { %v8844_v63 = vpop.permute.xlu0 %8843 }
 0xe95   :  { %v8846_v10 = vunpack.i.h.bf16 %v8844_v63  ;;  %v8845_v15 = vunpack.i.l.bf16 %v8844_v63 }
 0xe97   :  { %v10669_v3 = vpack.c.bf16 %v8846_v10, %v8846_v10  ;;  %v10671_v13 = vpack.c.bf16 %v8845_v15, %v8845_v15 }
 0xe98   :  { %v8859_v16 = vpop.permute.xlu0 %8858 }
 0xe99   :  { %4385 = vrot.lane.b32.xlu0 %v10669_v3, %s9313_s27  ;;  %4336 = vrot.lane.b32.xlu1 %v10671_v13, %s9313_s27  ;;  %v8860_v34 = vunpack.i.l.bf16 %v8859_v16  ;;  %v8861_v22 = vunpack.i.h.bf16 %v8859_v16 }
 0xe9b   :  { %v10703_v6 = vpack.c.bf16 %v8860_v34, %v8860_v34  ;;  %v10710_v33 = vpack.c.bf16 %v8861_v22, %v8861_v22  ;;  %v3998_v22 = vpack.c.bf16 %v10638_v54, %v10638_v54 }
 0xe9c   :  { %v4043_v35 = vpop.permute.xlu0 %4042 }
 0xe9d   :  { %v4048_v43 = vsel %vm567_vm9, %v4043_v35, 0  ;;  %8888 = vrot.lane.b32.xlu0 %v10620_v14, %s9312_s26  ;;  %8883 = vrot.lane.b32.xlu1 %v8867_v39, %s9315_s29 }
 0xe9e   :  { %8323 = vmatpush3.bf16.xpose.msra.mxu0 %v4048_v43 }
 0xe9f   :  { %8334 = vmatprep.subr.bf16.mxu0 %v11777_v32 }
 0xea5   :  { %8325 = vmatmul.mubr.msk.bf16.vlgmr.msra.gmra.mrb[128].mxu0 %vm567_vm9, %v3993_v18 }
 0xea6   :  { %8336 = vmatprep.mubr.msk.bf16.mxu0 %vm9311_vm0, %v11777_v32 }
 0xec9   :  { %v8849_v52 = vpop.permute.xlu1 %8848 }
 0xeca   :  { %v8851_v25 = vunpack.i.h.bf16 %v8849_v52  ;;  %v8850_v19 = vunpack.i.l.bf16 %v8849_v52 }
 0xecc   :  { %v10685_v46 = vpack.c.bf16 %v8851_v25, %v8851_v25  ;;  %v10687_v50 = vpack.c.bf16 %v8850_v19, %v8850_v19  ;;  %v3996_v19 = vpack.c.bf16 %v10629_v21, %v10629_v21  ;;  %v3997_v21 = vpack.c.bf16 %v10636_v26, %v10636_v26 }
 0xece   :  { %4483 = vrot.lane.b32.xlu0 %v10685_v46, %s9313_s27  ;;  %4434 = vrot.lane.b32.xlu1 %v10687_v50, %s9313_s27 }
 0xed1   :  { %v8854_v36 = vpop.permute.xlu1 %8853  ;;  %v8869_v45 = vpop.permute.xlu0 %8868 }
 0xed2   :  { %v8856_v28 = vunpack.i.h.bf16 %v8854_v36  ;;  %v8855_v29 = vunpack.i.l.bf16 %v8854_v36  ;;  %8893 = vrot.lane.b32.xlu1 %v10634_v59, %s9312_s26  ;;  %v8870_v39 = vunpack.i.l.bf16 %v8869_v45  ;;  %v8871_v35 = vunpack.i.h.bf16 %v8869_v45 }
 0xed4   :  { %v10695_v56 = vpack.c.bf16 %v8856_v28, %v8856_v28  ;;  %v10697_v0 = vpack.c.bf16 %v8855_v29, %v8855_v29  ;;  %v10736_v43 = vpack.c.bf16 %v8870_v39, %v8870_v39  ;;  %v10744_v57 = vpack.c.bf16 %v8871_v35, %v8871_v35 }
 0xed5   :  { %v8864_v47 = vpop.permute.xlu1 %8863  ;;  %v4190_v17 = vpop.permute.xlu0 %4189 }
 0xed6   :  { %4532 = vrot.lane.b32.xlu0 %v10697_v0, %s9313_s27  ;;  %4581 = vrot.lane.b32.xlu1 %v10695_v56, %s9313_s27  ;;  %v8865_v58 = vunpack.i.l.bf16 %v8864_v47  ;;  %v8866_v55 = vunpack.i.h.bf16 %v8864_v47  ;;  %v4195_v15 = vsel %vm567_vm9, %v4190_v17, 0 }
 0xed8   :  { %v10718_v23 = vpack.c.bf16 %v8865_v58, %v8865_v58  ;;  %v10723_v63 = vpack.c.bf16 %v8866_v55, %v8866_v55 }
 0xed9   :  { %v4092_v9 = vpop.permute.xlu1 %4091  ;;  %v4239_v16 = vpop.permute.xlu0 %4238 }
 0xeda   :  { %v4097_v7 = vsel %vm567_vm9, %v4092_v9, 0  ;;  %8898 = vrot.lane.b32.xlu0 %v10644_v48, %s9312_s26  ;;  %4630 = vrot.lane.b32.xlu1 %v10703_v6, %s9313_s27  ;;  %v4244_v18 = vsel %vm567_vm9, %v4239_v16, 0 }
 0xedb   :  { %8329 = vmatpush3.bf16.xpose.msra.mxu1 %v4097_v7 }
 0xedc   :  { %8340 = vmatprep.subr.bf16.mxu1 %v11777_v32 }
 0xedd   :  { %v4141_v4 = vpop.permute.xlu1 %4140  ;;  %v8879_v28 = vpop.permute.xlu0 %8878 }
 0xede   :  { %v4146_v20 = vsel %vm567_vm9, %v4141_v4, 0  ;;  %4679 = vrot.lane.b32.xlu0 %v10710_v33, %s9313_s27  ;;  %8903 = vrot.lane.b32.xlu1 %v10620_v14, %s9314_s28  ;;  %v8880_v47 = vunpack.i.l.bf16 %v8879_v28  ;;  %v8881_v26 = vunpack.i.h.bf16 %v8879_v28 }
 0xedf   :  { %8335 = vmatpush3.bf16.xpose.msra.mxu0 %v4146_v20 }
 0xee0   :  { %8346 = vmatprep.subr.bf16.mxu0 %v11777_v32  ;;  %v10775_v9 = vpack.c.bf16 %v8880_v47, %v8880_v47  ;;  %v10784_v7 = vpack.c.bf16 %v8881_v26, %v8881_v26 }
 0xee1   :  { %v8874_v10 = vpop.permute.xlu1 %8873 }
 0xee2   :  { %8331 = vmatmul.mubr.msk.bf16.vlgmr.msra.gmra.mrb[136].mxu1 %vm567_vm9, %v3994_v60  ;;  %4728 = vrot.lane.b32.xlu0 %v10718_v23, %s9313_s27  ;;  %v8875_v25 = vunpack.i.l.bf16 %v8874_v10  ;;  %v8876_v36 = vunpack.i.h.bf16 %v8874_v10 }
 0xee3   :  { %4777 = vrot.lane.b32.xlu1 %v10723_v63, %s9313_s27  ;;  %8341 = vmatpush3.bf16.xpose.msra.mxu1 %v4195_v15 }
 0xee4   :  { %8342 = vmatprep.mubr.msk.bf16.mxu1 %vm9311_vm0, %v11777_v32  ;;  %8352 = vmatprep.subr.bf16.mxu1 %v11777_v32  ;;  %v10757_v34 = vpack.c.bf16 %v8875_v25, %v8875_v25  ;;  %v10764_v45 = vpack.c.bf16 %v8876_v36, %v8876_v36 }
 0xee5   :  { %v4288_v52 = vpop.permute.xlu1 %4287 }
 0xee6   :  { %8337 = vmatmul.mubr.msk.bf16.vlgmr.msra.gmra.mrb[132].mxu0 %vm567_vm9, %v3995_v51  ;;  %8908 = vrot.lane.b32.xlu0 %v10634_v59, %s9314_s28  ;;  %v4293_v29 = vsel %vm567_vm9, %v4288_v52, 0 }
 0xee7   :  { %4826 = vrot.lane.b32.xlu1 %v10736_v43, %s9313_s27  ;;  %8347 = vmatpush3.bf16.xpose.msra.mxu0 %v4244_v18 }
 0xee8   :  { %8348 = vmatprep.mubr.msk.bf16.mxu0 %vm9311_vm0, %v11777_v32  ;;  %8358 = vmatprep.subr.bf16.mxu0 %v11777_v32 }
 0xeea   :  { %8343 = vmatmul.mubr.msk.bf16.vlgmr.msra.gmra.mrb[140].mxu1 %vm567_vm9, %v3996_v19  ;;  %4875 = vrot.lane.b32.xlu0 %v10744_v57, %s9313_s27 }
 0xeeb   :  { %8913 = vrot.lane.b32.xlu1 %v10644_v48, %s9314_s28  ;;  %8353 = vmatpush3.bf16.xpose.msra.mxu1 %v4293_v29 }
 0xeec   :  { %8354 = vmatprep.mubr.msk.bf16.mxu1 %vm9311_vm0, %v11777_v32  ;;  %8364 = vmatprep.subr.bf16.mxu1 %v11777_v32 }
 0xeee   :  { %8349 = vmatmul.mubr.msk.bf16.vlgmr.msra.gmra.mrb[136].mxu0 %vm567_vm9, %v3997_v21  ;;  %4924 = vrot.lane.b32.xlu0 %v10757_v34, %s9313_s27 }
 0xeef   :  { %4973 = vrot.lane.b32.xlu1 %v10764_v45, %s9313_s27  ;;  %8360 = vmatprep.mubr.msk.bf16.mxu0 %vm9311_vm0, %v11777_v32 }
 0xef2   :  { %8355 = vmatmul.mubr.msk.bf16.vlgmr.msra.gmra.mrb[144].mxu1 %vm567_vm9, %v3998_v22  ;;  %8918 = vrot.lane.b32.xlu0 %v10620_v14, %s9315_s29 }
 0xef3   :  { %5022 = vrot.lane.b32.xlu1 %v10775_v9, %s9313_s27  ;;  %8366 = vmatprep.mubr.msk.bf16.mxu1 %vm9311_vm0, %v11777_v32 }
 0xef6   :  { %5071 = vrot.lane.b32.xlu0 %v10784_v7, %s9313_s27 }
 0xef7   :  { %8923 = vrot.lane.b32.xlu1 %v10634_v59, %s9315_s29 }
 0xf0b   :  { %v4386_v54 = vpop.permute.xlu0 %4385  ;;  %v4337_v58 = vpop.permute.xlu1 %4336 }
 0xf0c   :  { %v4391_v17 = vsel %vm567_vm9, %v4386_v54, 0  ;;  %v4342_v14 = vsel %vm567_vm9, %v4337_v58, 0 }
 0xf0d   :  { %8359 = vmatpush3.bf16.xpose.msra.mxu0 %v4342_v14  ;;  %8365 = vmatpush3.bf16.xpose.msra.mxu1 %v4391_v17 }
 0xf0e   :  { %8370 = vmatprep.subr.bf16.mxu0 %v11777_v32  ;;  %8376 = vmatprep.subr.bf16.mxu1 %v11777_v32 }
 0xf0f   :  { %v8889_v55 = vpop.permute.xlu0 %8888  ;;  %v8884_v4 = vpop.permute.xlu1 %8883 }
 0xf10   :  { %v8891_v20 = vunpack.i.h.bf16 %v8889_v55  ;;  %v8890_v60 = vunpack.i.l.bf16 %v8889_v55  ;;  %v8886_v39 = vunpack.i.h.bf16 %v8884_v4  ;;  %v8885_v10 = vunpack.i.l.bf16 %v8884_v4 }
 0xf12   :  { %v4000_v15 = vpack.c.bf16 %v8891_v20, %v8891_v20  ;;  %v3999_v59 = vpack.c.bf16 %v8890_v60, %v8890_v60  ;;  %v10794_v16 = vpack.c.bf16 %v8886_v39, %v8886_v39  ;;  %v10796_v35 = vpack.c.bf16 %v8885_v10, %v8885_v10 }
 0xf14   :  { %8361 = vmatmul.mubr.msk.bf16.vlgmr.msra.gmra.mrb[140].mxu0 %vm567_vm9, %v3999_v59  ;;  %8367 = vmatmul.mubr.msk.bf16.vlgmr.msra.gmra.mrb[148].mxu1 %vm567_vm9, %v4000_v15 }
 0xf15   :  { %5120 = vrot.lane.b32.xlu0 %v10796_v35, %s9313_s27  ;;  %5169 = vrot.lane.b32.xlu1 %v10794_v16, %s9313_s27 }
 0xf16   :  { %8372 = vmatprep.mubr.msk.bf16.mxu0 %vm9311_vm0, %v11777_v32  ;;  %8378 = vmatprep.mubr.msk.bf16.mxu1 %vm9311_vm0, %v11777_v32 }
 0xf19   :  { %8928 = vrot.lane.b32.xlu0 %v10644_v48, %s9315_s29  ;;  %5553 = vrot.lane.b32.xlu1 %v10653_v27, %s9316_s30 }
 0xf1d   :  { %5505 = vrot.lane.b32.xlu0 %v10623_v1, %s9316_s30  ;;  %5649 = vrot.lane.b32.xlu1 %v10646_v44, %s9316_s30 }
 0xf21   :  { %5601 = vrot.lane.b32.xlu0 %v10659_v24, %s9316_s30  ;;  %5745 = vrot.lane.b32.xlu1 %v10665_v61, %s9316_s30 }
 0xf25   :  { %5697 = vrot.lane.b32.xlu0 %v10651_v2, %s9316_s30  ;;  %5841 = vrot.lane.b32.xlu1 %v10669_v3, %s9316_s30 }
 0xf29   :  { %5793 = vrot.lane.b32.xlu0 %v10671_v13, %s9316_s30  ;;  %5937 = vrot.lane.b32.xlu1 %v10685_v46, %s9316_s30 }
 0xf2d   :  { %5889 = vrot.lane.b32.xlu0 %v10687_v50, %s9316_s30  ;;  %6129 = vrot.lane.b32.xlu1 %v10710_v33, %s9316_s30 }
 0xf31   :  { %5985 = vrot.lane.b32.xlu0 %v10697_v0, %s9316_s30  ;;  %6225 = vrot.lane.b32.xlu1 %v10723_v63, %s9316_s30 }
 0xf35   :  { %6081 = vrot.lane.b32.xlu0 %v10703_v6, %s9316_s30  ;;  %6033 = vrot.lane.b32.xlu1 %v10695_v56, %s9316_s30 }
 0xf39   :  { %6177 = vrot.lane.b32.xlu0 %v10718_v23, %s9316_s30  ;;  %6321 = vrot.lane.b32.xlu1 %v10744_v57, %s9316_s30 }
 0xf3d   :  { %6273 = vrot.lane.b32.xlu0 %v10736_v43, %s9316_s30 }
 0xf40   :  { %v4484_v1 = vpop.permute.xlu0 %4483  ;;  %v4435_v48 = vpop.permute.xlu1 %4434 }
 0xf41   :  { %v4489_v44 = vsel %vm567_vm9, %v4484_v1, 0  ;;  %v4440_v2 = vsel %vm567_vm9, %v4435_v48, 0 }
 0xf42   :  { %8371 = vmatpush3.bf16.xpose.msra.mxu0 %v4440_v2  ;;  %8377 = vmatpush3.bf16.xpose.msra.mxu1 %v4489_v44 }
 0xf43   :  { %8382 = vmatprep.subr.bf16.mxu0 %v11777_v32  ;;  %8388 = vmatprep.subr.bf16.mxu1 %v11777_v32 }
 0xf44   :  { %v8894_v27 = vpop.permute.xlu1 %8893 }
 0xf45   :  { %v8896_v24 = vunpack.i.h.bf16 %v8894_v27  ;;  %v8895_v61 = vunpack.i.l.bf16 %v8894_v27 }
 0xf47   :  { %v4002_v3 = vpack.c.bf16 %v8896_v24, %v8896_v24  ;;  %v4001_v13 = vpack.c.bf16 %v8895_v61, %v8895_v61 }
 0xf48   :  { %v4533_v46 = vpop.permute.xlu0 %4532  ;;  %v4582_v50 = vpop.permute.xlu1 %4581 }
 0xf49   :  { %v4538_v56 = vsel %vm567_vm9, %v4533_v46, 0  ;;  %v4587_v0 = vsel %vm567_vm9, %v4582_v50, 0  ;;  %8373 = vmatmul.mubr.msk.bf16.vlgmr.msra.gmra.mrb[144].mxu0 %vm567_vm9, %v4001_v13  ;;  %8379 = vmatmul.mubr.msk.bf16.vlgmr.msra.gmra.mrb[152].mxu1 %vm567_vm9, %v4002_v3 }
 0xf4a   :  { %8383 = vmatpush3.bf16.xpose.msra.mxu0 %v4538_v56  ;;  %8389 = vmatpush3.bf16.xpose.msra.mxu1 %v4587_v0 }
 0xf4b   :  { %8384 = vmatprep.mubr.msk.bf16.mxu0 %vm9311_vm0, %v11777_v32  ;;  %8390 = vmatprep.mubr.msk.bf16.mxu1 %vm9311_vm0, %v11777_v32 }
 0xf4c   :  { %v8899_v6 = vpop.permute.xlu0 %8898  ;;  %v4631_v33 = vpop.permute.xlu1 %4630  ;;  %8394 = vmatprep.subr.bf16.mxu0 %v11777_v32  ;;  %8400 = vmatprep.subr.bf16.mxu1 %v11777_v32 }
 0xf4d   :  { %v8901_v23 = vunpack.i.h.bf16 %v8899_v6  ;;  %v8900_v63 = vunpack.i.l.bf16 %v8899_v6  ;;  %v4636_v57 = vsel %vm567_vm9, %v4631_v33, 0 }
 0xf4f   :  { %v4004_v51 = vpack.c.bf16 %v8901_v23, %v8901_v23  ;;  %v4003_v43 = vpack.c.bf16 %v8900_v63, %v8900_v63 }
 0xf50   :  { %v4680_v18 = vpop.permute.xlu0 %4679  ;;  %v8904_v52 = vpop.permute.xlu1 %8903 }
 0xf51   :  { %v4685_v25 = vsel %vm567_vm9, %v4680_v18, 0  ;;  %8385 = vmatmul.mubr.msk.bf16.vlgmr.msra.gmra.mrb[148].mxu0 %vm567_vm9, %v4003_v43  ;;  %8391 = vmatmul.mubr.msk.bf16.vlgmr.msra.gmra.mrb[156].mxu1 %vm567_vm9, %v4004_v51  ;;  %v8906_v19 = vunpack.i.h.bf16 %v8904_v52  ;;  %v8905_v36 = vunpack.i.l.bf16 %v8904_v52 }
 0xf52   :  { %8395 = vmatpush3.bf16.xpose.msra.mxu0 %v4636_v57  ;;  %8401 = vmatpush3.bf16.xpose.msra.mxu1 %v4685_v25 }
 0xf53   :  { %8396 = vmatprep.mubr.msk.bf16.mxu0 %vm9311_vm0, %v11777_v32  ;;  %8402 = vmatprep.mubr.msk.bf16.mxu1 %vm9311_vm0, %v11777_v32  ;;  %v4006_v21 = vpack.c.bf16 %v8906_v19, %v8906_v19  ;;  %v4005_v47 = vpack.c.bf16 %v8905_v36, %v8905_v36 }
 0xf54   :  { %v4729_v28 = vpop.permute.xlu0 %4728  ;;  %8406 = vmatprep.subr.bf16.mxu0 %v11777_v32  ;;  %8412 = vmatprep.subr.bf16.mxu1 %v11777_v32 }
 0xf55   :  { %v4778_v29 = vpop.permute.xlu1 %4777  ;;  %v4734_v22 = vsel %vm567_vm9, %v4729_v28, 0 }
 0xf56   :  { %v4783_v54 = vsel %vm567_vm9, %v4778_v29, 0 }
 0xf58   :  { %v8909_v26 = vpop.permute.xlu0 %8908 }
 0xf59   :  { %v4827_v58 = vpop.permute.xlu1 %4826  ;;  %8397 = vmatmul.mubr.msk.bf16.vlgmr.msra.gmra.mrb[152].mxu0 %vm567_vm9, %v4005_v47  ;;  %8403 = vmatmul.mubr.msk.bf16.vlgmr.msra.gmra.mrb[160].mxu1 %vm567_vm9, %v4006_v21  ;;  %v8911_v17 = vunpack.i.h.bf16 %v8909_v26  ;;  %v8910_v14 = vunpack.i.l.bf16 %v8909_v26 }
 0xf5a   :  { %8407 = vmatpush3.bf16.xpose.msra.mxu0 %v4734_v22  ;;  %8413 = vmatpush3.bf16.xpose.msra.mxu1 %v4783_v54  ;;  %v4832_v39 = vsel %vm567_vm9, %v4827_v58, 0 }
 0xf5b   :  { %8408 = vmatprep.mubr.msk.bf16.mxu0 %vm9311_vm0, %v11777_v32  ;;  %8414 = vmatprep.mubr.msk.bf16.mxu1 %vm9311_vm0, %v11777_v32  ;;  %v4008_v20 = vpack.c.bf16 %v8911_v17, %v8911_v17  ;;  %v4007_v60 = vpack.c.bf16 %v8910_v14, %v8910_v14 }
 0xf5c   :  { %v4876_v55 = vpop.permute.xlu0 %4875  ;;  %8418 = vmatprep.subr.bf16.mxu0 %v11777_v32  ;;  %8424 = vmatprep.subr.bf16.mxu1 %v11777_v32 }
 0xf5d   :  { %v8914_v4 = vpop.permute.xlu1 %8913  ;;  %v4881_v10 = vsel %vm567_vm9, %v4876_v55, 0 }
 0xf5e   :  { %v8916_v59 = vunpack.i.h.bf16 %v8914_v4  ;;  %v8915_v1 = vunpack.i.l.bf16 %v8914_v4 }
 0xf60   :  { %v4925_v15 = vpop.permute.xlu0 %4924  ;;  %v4010_v44 = vpack.c.bf16 %v8916_v59, %v8916_v59  ;;  %v4009_v2 = vpack.c.bf16 %v8915_v1, %v8915_v1 }
 0xf61   :  { %8409 = vmatmul.mubr.msk.bf16.vlgmr.msra.gmra.mrb[156].mxu0 %vm567_vm9, %v4007_v60  ;;  %8415 = vmatmul.mubr.msk.bf16.vlgmr.msra.gmra.mrb[164].mxu1 %vm567_vm9, %v4008_v20  ;;  %v4974_v48 = vpop.permute.xlu1 %4973  ;;  %v4930_v24 = vsel %vm567_vm9, %v4925_v15, 0 }
 0xf62   :  { %8419 = vmatpush3.bf16.xpose.msra.mxu0 %v4832_v39  ;;  %8425 = vmatpush3.bf16.xpose.msra.mxu1 %v4881_v10  ;;  %v4979_v61 = vsel %vm567_vm9, %v4974_v48, 0 }
 0xf63   :  { %8420 = vmatprep.mubr.msk.bf16.mxu0 %vm9311_vm0, %v11777_v32  ;;  %8426 = vmatprep.mubr.msk.bf16.mxu1 %vm9311_vm0, %v11777_v32 }
 0xf64   :  { %8430 = vmatprep.subr.bf16.mxu0 %v11777_v32  ;;  %8436 = vmatprep.subr.bf16.mxu1 %v11777_v32  ;;  %v8919_v27 = vpop.permute.xlu0 %8918 }
 0xf65   :  { %v5023_v3 = vpop.permute.xlu1 %5022  ;;  %v8921_v13 = vunpack.i.h.bf16 %v8919_v27  ;;  %v8920_v46 = vunpack.i.l.bf16 %v8919_v27 }
 0xf66   :  { %v5028_v33 = vsel %vm567_vm9, %v5023_v3, 0 }
 0xf67   :  { %v4012_v56 = vpack.c.bf16 %v8921_v13, %v8921_v13  ;;  %v4011_v0 = vpack.c.bf16 %v8920_v46, %v8920_v46 }
 0xf68   :  { %v5072_v50 = vpop.permute.xlu0 %5071 }
 0xf69   :  { %8421 = vmatmul.mubr.msk.bf16.vlgmr.msra.gmra.mrb[160].mxu0 %vm567_vm9, %v4009_v2  ;;  %8427 = vmatmul.mubr.msk.bf16.vlgmr.msra.gmra.mrb[168].mxu1 %vm567_vm9, %v4010_v44  ;;  %v8924_v6 = vpop.permute.xlu1 %8923  ;;  %v5077_v23 = vsel %vm567_vm9, %v5072_v50, 0 }
 0xf6a   :  { %8431 = vmatpush3.bf16.xpose.msra.mxu0 %v4930_v24  ;;  %8437 = vmatpush3.bf16.xpose.msra.mxu1 %v4979_v61  ;;  %v8926_v63 = vunpack.i.h.bf16 %v8924_v6  ;;  %v8925_v51 = vunpack.i.l.bf16 %v8924_v6 }
 0xf6b   :  { %8432 = vmatprep.mubr.msk.bf16.mxu0 %vm9311_vm0, %v11777_v32  ;;  %8438 = vmatprep.mubr.msk.bf16.mxu1 %vm9311_vm0, %v11777_v32 }
 0xf6c   :  { %8442 = vmatprep.subr.bf16.mxu0 %v11777_v32  ;;  %8448 = vmatprep.subr.bf16.mxu1 %v11777_v32  ;;  %v4014_v43 = vpack.c.bf16 %v8926_v63, %v8926_v63  ;;  %v4013_v18 = vpack.c.bf16 %v8925_v51, %v8925_v51 }
 0xf71   :  { %8433 = vmatmul.mubr.msk.bf16.vlgmr.msra.gmra.mrb[164].mxu0 %vm567_vm9, %v4011_v0  ;;  %8439 = vmatmul.mubr.msk.bf16.vlgmr.msra.gmra.mrb[172].mxu1 %vm567_vm9, %v4012_v56 }
 0xf72   :  { %8443 = vmatpush3.bf16.xpose.msra.mxu0 %v5028_v33  ;;  %8449 = vmatpush3.bf16.xpose.msra.mxu1 %v5077_v23 }
 0xf73   :  { %8444 = vmatprep.mubr.msk.bf16.mxu0 %vm9311_vm0, %v11777_v32  ;;  %8450 = vmatprep.mubr.msk.bf16.mxu1 %vm9311_vm0, %v11777_v32 }
 0xf74   :  { %8454 = vmatprep.subr.bf16.mxu0 %v11777_v32  ;;  %8460 = vmatprep.subr.bf16.mxu1 %v11777_v32 }
 0xf78   :  { %v10910_v52 = vpop.f32.mrb[128].mxu0 }
 0xf79   :  { %v8326_v57 = vpop.f32.mrb[129].mxu0  ;;  %8445 = vmatmul.mubr.msk.bf16.vlgmr.msra.gmra.mrb[168].mxu0 %vm567_vm9, %v4013_v18  ;;  %8451 = vmatmul.mubr.msk.bf16.vlgmr.msra.gmra.mrb[176].mxu1 %vm567_vm9, %v4014_v43  ;;  %v5217_v25 = vsel %vm567_vm9, %v10910_v52, -inf }
 0xf7a   :  { %v4087_v19 = vpop.f32.mrb[130].mxu0  ;;  %5218 = vmax.xlane.f32.xlu1 %v5217_v25  ;;  %8456 = vmatprep.mubr.msk.bf16.mxu0 %vm9311_vm0, %v11777_v32 }
 0xf7b   :  { %v8327_v36 = vpop.f32.mrb[131].mxu0  ;;  %8462 = vmatprep.mubr.msk.bf16.mxu1 %vm9311_vm0, %v11777_v32 }
 0xf87   :  { %v5121_v28 = vpop.permute.xlu0 %5120  ;;  %v5170_v29 = vpop.permute.xlu1 %5169 }
 0xf88   :  { %v5126_v21 = vsel %vm567_vm9, %v5121_v28, 0  ;;  %v5175_v47 = vsel %vm567_vm9, %v5170_v29, 0 }
 0xf89   :  { %8455 = vmatpush3.bf16.xpose.msra.mxu0 %v5126_v21  ;;  %8461 = vmatpush3.bf16.xpose.msra.mxu1 %v5175_v47 }
 0xf8a   :  { %8466 = vmatprep.subr.bf16.mxu0 %v11777_v32  ;;  %8472 = vmatprep.subr.bf16.mxu1 %v11777_v32 }
 0xf8b   :  { %v8929_v26 = vpop.permute.xlu0 %8928  ;;  %v5554_v58 = vpop.permute.xlu1 %5553 }
 0xf8c   :  { %v8931_v22 = vunpack.i.h.bf16 %v8929_v26  ;;  %v8930_v54 = vunpack.i.l.bf16 %v8929_v26  ;;  %v5559_v4 = vsel %vm2034_vm10, %v5554_v58, 0 }
 0xf8e   :  { %v4016_v17 = vpack.c.bf16 %v8931_v22, %v8931_v22  ;;  %v4015_v14 = vpack.c.bf16 %v8930_v54, %v8930_v54 }
 0xf8f   :  { %v5506_v55 = vpop.permute.xlu0 %5505  ;;  %v10962_v54 = vpop.permute.xlu1 %5649 }
 0xf90   :  { %v5511_v20 = vsel %vm2034_vm10, %v5506_v55, 0  ;;  %8457 = vmatmul.mubr.msk.bf16.vlgmr.msra.gmra.mrb[172].mxu0 %vm567_vm9, %v4015_v14  ;;  %8463 = vmatmul.mubr.msk.bf16.vlgmr.msra.gmra.mrb[180].mxu1 %vm567_vm9, %v4016_v17 }
 0xf91   :  { %8467 = vmatpush3.bf16.msra.mxu0 %v5511_v20  ;;  %8473 = vmatpush3.bf16.msra.mxu1 %v5559_v4 }
 0xf92   :  { %8474 = vmatprep.mubr.msk.bf16.mxu1 %vm9311_vm0, %v11777_v32  ;;  %8484 = vmatprep.subr.bf16.mxu1 %v11777_v32 }
 0xf93   :  { %8468 = vmatprep.mubr.msk.bf16.mxu0 %vm9311_vm0, %v11777_v32  ;;  %8478 = vmatprep.subr.bf16.mxu0 %v11777_v32  ;;  %v10964_v58 = vpop.permute.xlu0 %5601  ;;  %v10966_v17 = vpop.permute.xlu1 %5745 }
 0xf97   :  { %v10968_v14 = vpop.permute.xlu0 %5697 }
 0xfb5   :  { %v10934_v60 = vpop.f32.mrb[136].mxu1 }
 0xfb6   :  { %v8332_v39 = vpop.f32.mrb[137].mxu1  ;;  %v5220_v10 = vsel %vm567_vm9, %v10934_v60, -inf }
 0xfb7   :  { %5221 = vmax.xlane.f32.xlu0 %v5220_v10  ;;  %v4136_v15 = vpop.f32.mrb[138].mxu1 }
 0xfb8   :  { %v8333_v59 = vpop.f32.mrb[139].mxu1 }
 0xfb9   :  { %v10938_v1 = vpop.f32.mrb[132].mxu0 }
 0xfba   :  { %v8338_v48 = vpop.f32.mrb[133].mxu0  ;;  %v5223_v44 = vsel %vm567_vm9, %v10938_v1, -inf }
 0xfbb   :  { %v4185_v2 = vpop.f32.mrb[134].mxu0  ;;  %5224 = vmax.xlane.f32.xlu0 %v5223_v44 }
 0xfbc   :  { %v8339_v27 = vpop.f32.mrb[135].mxu0 }
 0xfbd   :  { %v10942_v24 = vpop.f32.mrb[140].mxu1  ;;  %v10978_v27 = vpop.permute.xlu1 %5841 }
 0xfbe   :  { %v8344_v61 = vpop.f32.mrb[141].mxu1  ;;  %v5226_v3 = vsel %vm567_vm9, %v10942_v24, -inf }
 0xfbf   :  { %5227 = vmax.xlane.f32.xlu1 %v5226_v3  ;;  %v4234_v13 = vpop.f32.mrb[142].mxu1  ;;  %v10980_v61 = vpop.permute.xlu0 %5793 }
 0xfc0   :  { %v8345_v46 = vpop.f32.mrb[143].mxu1 }
 0xfc1   :  { %v10946_v50 = vpop.f32.mrb[136].mxu0 }
 0xfc2   :  { %v8350_v56 = vpop.f32.mrb[137].mxu0  ;;  %v5229_v0 = vsel %vm567_vm9, %v10946_v50, -inf }
 0xfc3   :  { %v4283_v6 = vpop.f32.mrb[138].mxu0  ;;  %5230 = vmax.xlane.f32.xlu0 %v5229_v0 }
 0xfc4   :  { %v8351_v33 = vpop.f32.mrb[139].mxu0 }
 0xfc5   :  { %v10950_v23 = vpop.f32.mrb[144].mxu1 }
 0xfc6   :  { %v8356_v63 = vpop.f32.mrb[145].mxu1  ;;  %v5232_v51 = vsel %vm567_vm9, %v10950_v23, -inf }
 0xfc7   :  { %5233 = vmax.xlane.f32.xlu1 %v5232_v51  ;;  %v4332_v43 = vpop.f32.mrb[146].mxu1 }
 0xfc8   :  { %v8357_v18 = vpop.f32.mrb[147].mxu1 }
 0xfc9   :  { %v10990_v18 = vpop.permute.xlu1 %5937 }
 0xfe7   :  { %v10954_v57 = vpop.f32.mrb[140].mxu0  ;;  %v10956_v25 = vpop.f32.mrb[148].mxu1 }
 0xfe8   :  { %v8362_v19 = vpop.f32.mrb[141].mxu0  ;;  %v8368_v36 = vpop.f32.mrb[149].mxu1  ;;  %v5235_v28 = vsel %vm567_vm9, %v10954_v57, -inf  ;;  %v5238_v29 = vsel %vm567_vm9, %v10956_v25, -inf }
 0xfe9   :  { %v4381_v21 = vpop.f32.mrb[142].mxu0  ;;  %5236 = vmax.xlane.f32.xlu0 %v5235_v28  ;;  %5239 = vmax.xlane.f32.xlu1 %v5238_v29  ;;  %v4430_v47 = vpop.f32.mrb[150].mxu1 }
 0xfea   :  { %v8363_v26 = vpop.f32.mrb[143].mxu0  ;;  %v8369_v22 = vpop.f32.mrb[151].mxu1 }
 0xfeb   :  { %v10992_v19 = vpop.permute.xlu0 %5889 }
0x101c   :  { %v10970_v55 = vpop.f32.mrb[144].mxu0  ;;  %v10972_v4 = vpop.f32.mrb[152].mxu1 }
0x101d   :  { %v8374_v20 = vpop.f32.mrb[145].mxu0  ;;  %v8380_v39 = vpop.f32.mrb[153].mxu1  ;;  %v5241_v10 = vsel %vm567_vm9, %v10970_v55, -inf  ;;  %v5244_v15 = vsel %vm567_vm9, %v10972_v4, -inf }
0x101e   :  { %v4479_v59 = vpop.f32.mrb[146].mxu0  ;;  %5242 = vmax.xlane.f32.xlu0 %v5241_v10  ;;  %5245 = vmax.xlane.f32.xlu1 %v5244_v15  ;;  %v4528_v48 = vpop.f32.mrb[154].mxu1 }
0x101f   :  { %v8375_v44 = vpop.f32.mrb[147].mxu0  ;;  %v8381_v2 = vpop.f32.mrb[155].mxu1 }
0x1020   :  { %v11000_v10 = vpop.permute.xlu1 %6129  ;;  %v11002_v15 = vpop.permute.xlu0 %5985 }
0x1024   :  { %v10982_v3 = vpop.f32.mrb[148].mxu0  ;;  %v10984_v13 = vpop.f32.mrb[156].mxu1 }
0x1025   :  { %v8386_v46 = vpop.f32.mrb[149].mxu0  ;;  %v8392_v56 = vpop.f32.mrb[157].mxu1  ;;  %v5247_v0 = vsel %vm567_vm9, %v10982_v3, -inf  ;;  %v5250_v6 = vsel %vm567_vm9, %v10984_v13, -inf }
0x1026   :  { %v4577_v33 = vpop.f32.mrb[150].mxu0  ;;  %5248 = vmax.xlane.f32.xlu0 %v5247_v0  ;;  %5251 = vmax.xlane.f32.xlu1 %v5250_v6  ;;  %v4626_v63 = vpop.f32.mrb[158].mxu1 }
0x1027   :  { %v8387_v51 = vpop.f32.mrb[151].mxu0  ;;  %v8393_v43 = vpop.f32.mrb[159].mxu1 }
0x1028   :  { %v11012_v63 = vpop.permute.xlu1 %6225  ;;  %v11014_v51 = vpop.permute.xlu0 %6081 }
0x102c   :  { %v10994_v36 = vpop.f32.mrb[152].mxu0  ;;  %v10996_v28 = vpop.f32.mrb[160].mxu1 }
0x102d   :  { %v8398_v29 = vpop.f32.mrb[153].mxu0  ;;  %v8404_v21 = vpop.f32.mrb[161].mxu1  ;;  %v5253_v47 = vsel %vm567_vm9, %v10994_v36, -inf }
0x102e   :  { %v4675_v26 = vpop.f32.mrb[154].mxu0  ;;  %5254 = vmax.xlane.f32.xlu0 %v5253_v47  ;;  %v4724_v22 = vpop.f32.mrb[162].mxu1 }
0x102f   :  { %v8399_v20 = vpop.f32.mrb[155].mxu0  ;;  %v8405_v39 = vpop.f32.mrb[163].mxu1 }
0x1034   :  { %v11004_v59 = vpop.f32.mrb[156].mxu0  ;;  %v11006_v48 = vpop.f32.mrb[164].mxu1 }
0x1035   :  { %v8410_v44 = vpop.f32.mrb[157].mxu0  ;;  %v8416_v2 = vpop.f32.mrb[165].mxu1  ;;  %v5259_v46 = vsel %vm567_vm9, %v11004_v59, -inf }
0x1036   :  { %v4773_v56 = vpop.f32.mrb[158].mxu0  ;;  %5260 = vmax.xlane.f32.xlu0 %v5259_v46  ;;  %v4822_v0 = vpop.f32.mrb[166].mxu1 }
0x1037   :  { %v8411_v6 = vpop.f32.mrb[159].mxu0  ;;  %6369 = vrot.lane.b32.xlu1 %v10757_v34, %s9316_s30  ;;  %v8417_v33 = vpop.f32.mrb[167].mxu1 }
0x1038   :  { %v11020_v44 = vpop.permute.xlu0 %6177  ;;  %v11022_v2 = vpop.permute.xlu1 %6033 }
0x103c   :  { %v11016_v43 = vpop.f32.mrb[160].mxu0  ;;  %v11018_v29 = vpop.f32.mrb[168].mxu1 }
0x103d   :  { %v8422_v21 = vpop.f32.mrb[161].mxu0  ;;  %v8428_v47 = vpop.f32.mrb[169].mxu1 }
0x103e   :  { %v4871_v26 = vpop.f32.mrb[162].mxu0  ;;  %v4920_v22 = vpop.f32.mrb[170].mxu1 }
0x103f   :  { %v8423_v20 = vpop.f32.mrb[163].mxu0  ;;  %v8429_v39 = vpop.f32.mrb[171].mxu1 }
0x1040   :  { %v11028_v31 = vpop.permute.xlu0 %6273  ;;  %v11030_v47 = vpop.permute.xlu1 %6321 }
0x1044   :  { %v11024_v34 = vpop.f32.mrb[164].mxu0  ;;  %v11026_v46 = vpop.f32.mrb[172].mxu1 }
0x1045   :  { %v8434_v56 = vpop.f32.mrb[165].mxu0  ;;  %v8440_v0 = vpop.f32.mrb[173].mxu1 }
0x1046   :  { %v4969_v6 = vpop.f32.mrb[166].mxu0  ;;  %v5018_v33 = vpop.f32.mrb[174].mxu1 }
0x1047   :  { %v8435_v8 = vpop.f32.mrb[167].mxu0  ;;  %v8441_v21 = vpop.f32.mrb[175].mxu1 }
0x1048   :  { %v5222_v26 = vpop.xlane.xlu0 %5221  ;;  %v5219_v30 = vpop.xlane.xlu1 %5218 }
0x1049   :  { %v5290_v8 = vsub.f32 %v10934_v60, %v5222_v26  ;;  %v5289_v5 = vsub.f32 %v10910_v52, %v5219_v30 }
0x104b   :  { %v5315_v21 = vmul.f32 1.442695, %v5290_v8 }
0x104c   :  { %v11032_v22 = vpop.f32.mrb[168].mxu0  ;;  %6417 = vrot.lane.b32.xlu0 %v10764_v45, %s9316_s30  ;;  %v11036_v20 = vpop.f32.mrb[176].mxu1  ;;  %v5256_v45 = vsel %vm567_vm9, %v10996_v28, -inf }
0x104d   :  { %v8446_v39 = vpop.f32.mrb[169].mxu0  ;;  %v8452_v42 = vpop.f32.mrb[177].mxu1  ;;  %9121 = vpow2.f32 %v5315_v21 }
0x104e   :  { %v5067_v56 = vpop.f32.mrb[170].mxu0  ;;  %v5116_v0 = vpop.f32.mrb[178].mxu1  ;;  %v5313_v39 = vmul.f32 1.442695, %v5289_v5 }
0x104f   :  { %v8447_v6 = vpop.f32.mrb[171].mxu0  ;;  %v8453_v33 = vpop.f32.mrb[179].mxu1 }
0x1050   :  { %v5228_v38 = vpop.xlane.xlu1 %5227  ;;  %v5225_v42 = vpop.xlane.xlu0 %5224  ;;  %v5262_v6 = vsel %vm567_vm9, %v11006_v48, -inf  ;;  %9123 = vpow2.f32 %v5313_v39 }
0x1051   :  { %v5292_v37 = vsub.f32 %v10942_v24, %v5228_v38  ;;  %v5291_v60 = vsub.f32 %v10938_v1, %v5225_v42  ;;  %v5268_v38 = vsel %vm567_vm9, %v11018_v29, -inf }
0x1053   :  { %v5319_v56 = vmul.f32 1.442695, %v5292_v37  ;;  %v5317_v26 = vmul.f32 1.442695, %v5291_v60  ;;  %v5274_v60 = vsel %vm567_vm9, %v11026_v46, -inf }
0x1054   :  { %v5234_v0 = vpop.xlane.xlu1 %5233  ;;  %v5231_v52 = vpop.xlane.xlu0 %5230 }
0x1055   :  { %9125 = vpow2.f32 %v5319_v56  ;;  %v5294_v30 = vsub.f32 %v10950_v23, %v5234_v0  ;;  %v5293_v56 = vsub.f32 %v10946_v50, %v5231_v52 }
0x1056   :  { %9127 = vpow2.f32 %v5317_v26  ;;  %v5271_v26 = vsel %vm567_vm9, %v11024_v34, -inf }
0x1057   :  { %v11049_v24 = vpop.eup %9121  ;;  %v5323_v21 = vmul.f32 1.442695, %v5294_v30 }
0x1058   :  { %v5364_v23 = vsel %vm567_vm9, %v11049_v24, 0.0 }
0x1059   :  { %9129 = vpow2.f32 %v5323_v21 }
0x105a   :  { %v11058_v0 = vpop.eup %9123 }
0x105b   :  { %5257 = vmax.xlane.f32.xlu1 %v5256_v45 }
0x105f   :  { %5263 = vmax.xlane.f32.xlu1 %v5262_v6  ;;  %v5265_v6 = vsel %vm567_vm9, %v11016_v43, -inf  ;;  %v11064_v30 = vpop.eup %9125 }
0x1060   :  { %v5370_v50 = vsel %vm567_vm9, %v11064_v30, 0.0  ;;  %v11070_v52 = vpop.eup %9127 }
0x1063   :  { %v11051_v5 = vpop.f32.mrb[172].mxu0  ;;  %v11053_v37 = vpop.f32.mrb[180].mxu1  ;;  %5269 = vmax.xlane.f32.xlu1 %v5268_v38  ;;  %v5321_v38 = vmul.f32 1.442695, %v5293_v56 }
0x1064   :  { %v8458_v33 = vpop.f32.mrb[173].mxu0  ;;  %v8464_v8 = vpop.f32.mrb[181].mxu1 }
0x1065   :  { %v5165_v45 = vpop.f32.mrb[174].mxu0  ;;  %v5214_v1 = vpop.f32.mrb[182].mxu1  ;;  %v5361_v33 = vsel %vm567_vm9, %v11058_v0, 0.0  ;;  %9131 = vpow2.f32 %v5321_v38  ;;  %v5280_v8 = vsel %vm567_vm9, %v11036_v20, -inf  ;;  %v5277_v38 = vsel %vm567_vm9, %v11032_v22, -inf }
0x1066   :  { %v8459_v39 = vpop.f32.mrb[175].mxu0  ;;  %v8465_v42 = vpop.f32.mrb[183].mxu1 }
0x1067   :  { %5365 = vadd.xlane.f32.xlu1 %v5364_v23  ;;  %v11076_v21 = vpop.eup %9129  ;;  %v5367_v39 = vsel %vm567_vm9, %v11070_v52, 0.0 }
0x1068   :  { %v5376_v42 = vsel %vm567_vm9, %v11076_v21, 0.0 }
0x106b   :  { %5266 = vmax.xlane.f32.xlu0 %v5265_v6  ;;  %5275 = vmax.xlane.f32.xlu1 %v5274_v60 }
0x106f   :  { %5362 = vadd.xlane.f32.xlu0 %v5361_v33  ;;  %5371 = vadd.xlane.f32.xlu1 %v5370_v50  ;;  %v5286_v33 = vsel %vm567_vm9, %v11053_v37, -inf  ;;  %v11088_v50 = vpop.eup %9131 }
0x1073   :  { %5272 = vmax.xlane.f32.xlu0 %v5271_v26  ;;  %5281 = vmax.xlane.f32.xlu1 %v5280_v8 }
0x1076   :  { %v5237_v45 = vpop.xlane.xlu0 %5236  ;;  %v5240_v1 = vpop.xlane.xlu1 %5239 }
0x1077   :  { %v5295_v23 = vsub.f32 %v10954_v57, %v5237_v45  ;;  %v5296_v56 = vsub.f32 %v10956_v25, %v5240_v1  ;;  %5368 = vadd.xlane.f32.xlu0 %v5367_v39  ;;  %5377 = vadd.xlane.f32.xlu1 %v5376_v42  ;;  %v5373_v57 = vsel %vm567_vm9, %v11088_v50, 0.0  ;;  %v5283_v25 = vsel %vm567_vm9, %v11051_v5, -inf }
0x1079   :  { %v5325_v6 = vmul.f32 1.442695, %v5295_v23  ;;  %v5327_v60 = vmul.f32 1.442695, %v5296_v56 }
0x107b   :  { %9133 = vpow2.f32 %v5325_v6  ;;  %5278 = vmax.xlane.f32.xlu0 %v5277_v38  ;;  %5287 = vmax.xlane.f32.xlu1 %v5286_v33 }
0x107c   :  { %9135 = vpow2.f32 %v5327_v60 }
0x107f   :  { %5374 = vadd.xlane.f32.xlu0 %v5373_v57 }
0x1083   :  { %5284 = vmax.xlane.f32.xlu0 %v5283_v25 }
0x1085   :  { %v11094_v26 = vpop.eup %9133 }
0x1086   :  { %v11096_v8 = vpop.eup %9135  ;;  %v5379_v45 = vsel %vm567_vm9, %v11094_v26, 0.0 }
0x1087   :  { %5380 = vadd.xlane.f32.xlu0 %v5379_v45  ;;  %v5382_v1 = vsel %vm567_vm9, %v11096_v8, 0.0 }
0x1088   :  { %5383 = vadd.xlane.f32.xlu1 %v5382_v1 }
0x10ab   :  { %v5243_v39 = vpop.xlane.xlu0 %5242  ;;  %v5246_v42 = vpop.xlane.xlu1 %5245 }
0x10ac   :  { %v5297_v23 = vsub.f32 %v10970_v55, %v5243_v39  ;;  %v5298_v56 = vsub.f32 %v10972_v4, %v5246_v42 }
0x10ae   :  { %v5329_v6 = vmul.f32 1.442695, %v5297_v23  ;;  %v5331_v60 = vmul.f32 1.442695, %v5298_v56 }
0x10b0   :  { %9137 = vpow2.f32 %v5329_v6 }
0x10b1   :  { %9139 = vpow2.f32 %v5331_v60 }
0x10b3   :  { %v5249_v38 = vpop.xlane.xlu0 %5248  ;;  %v5252_v33 = vpop.xlane.xlu1 %5251 }
0x10b4   :  { %v5299_v57 = vsub.f32 %v10982_v3, %v5249_v38  ;;  %v5300_v25 = vsub.f32 %v10984_v13, %v5252_v33 }
0x10b6   :  { %v5333_v45 = vmul.f32 1.442695, %v5299_v57  ;;  %v5335_v62 = vmul.f32 1.442695, %v5300_v25 }
0x10b8   :  { %9141 = vpow2.f32 %v5333_v45 }
0x10b9   :  { %9143 = vpow2.f32 %v5335_v62 }
0x10ba   :  { %v11106_v1 = vpop.eup %9137 }
0x10bb   :  { %v11108_v12 = vpop.eup %9139  ;;  %v5255_v55 = vpop.xlane.xlu0 %5254  ;;  %v5385_v4 = vsel %vm567_vm9, %v11106_v1, 0.0 }
0x10bc   :  { %v5301_v39 = vsub.f32 %v10994_v36, %v5255_v55  ;;  %v5388_v42 = vsel %vm567_vm9, %v11108_v12, 0.0  ;;  %5386 = vadd.xlane.f32.xlu1 %v5385_v4 }
0x10bd   :  { %5389 = vadd.xlane.f32.xlu0 %v5388_v42 }
0x10be   :  { %v5337_v3 = vmul.f32 1.442695, %v5301_v39 }
0x10c0   :  { %9145 = vpow2.f32 %v5337_v3 }
0x10c2   :  { %v11115_v13 = vpop.eup %9141 }
0x10c3   :  { %v11117_v62 = vpop.eup %9143  ;;  %v5261_v23 = vpop.xlane.xlu0 %5260  ;;  %v5391_v56 = vsel %vm567_vm9, %v11115_v13, 0.0 }
0x10c4   :  { %v5303_v6 = vsub.f32 %v11004_v59, %v5261_v23  ;;  %v5394_v36 = vsel %vm567_vm9, %v11117_v62, 0.0  ;;  %5392 = vadd.xlane.f32.xlu1 %v5391_v56  ;;  %v11132_v59 = vpop.permute.xlu1 %6369 }
0x10c5   :  { %5395 = vadd.xlane.f32.xlu0 %v5394_v36 }
0x10c6   :  { %v5341_v60 = vmul.f32 1.442695, %v5303_v6 }
0x10c7   :  { %v11137_v36 = vpop.permute.xlu0 %6417 }
0x10c8   :  { %9147 = vpow2.f32 %v5341_v60 }
0x10ca   :  { %v11124_v38 = vpop.eup %9145 }
0x10cb   :  { %v5397_v33 = vsel %vm567_vm9, %v11124_v38, 0.0 }
0x10cc   :  { %5398 = vadd.xlane.f32.xlu1 %v5397_v33 }
0x10d2   :  { %v11128_v57 = vpop.eup %9147 }
0x10d3   :  { %v5403_v25 = vsel %vm567_vm9, %v11128_v57, 0.0 }
0x10d4   :  { %5404 = vadd.xlane.f32.xlu1 %v5403_v25 }
0x10e8   :  { %v5258_v45 = vpop.xlane.xlu1 %5257 }
0x10e9   :  { %v5302_v55 = vsub.f32 %v10996_v28, %v5258_v45 }
0x10eb   :  { %v5339_v4 = vmul.f32 1.442695, %v5302_v55 }
0x10ec   :  { %v5264_v39 = vpop.xlane.xlu1 %5263 }
0x10ed   :  { %9149 = vpow2.f32 %v5339_v4  ;;  %v5304_v42 = vsub.f32 %v11006_v48, %v5264_v39 }
0x10ef   :  { %v5343_v3 = vmul.f32 1.442695, %v5304_v42 }
0x10f0   :  { %v5270_v23 = vpop.xlane.xlu1 %5269 }
0x10f1   :  { %9151 = vpow2.f32 %v5343_v3  ;;  %v5306_v56 = vsub.f32 %v11018_v29, %v5270_v23 }
0x10f3   :  { %v5347_v6 = vmul.f32 1.442695, %v5306_v56 }
0x10f4   :  { %v5366_v60 = vpop.xlane.xlu1 %5365 }
0x10f5   :  { %9153 = vpow2.f32 %v5347_v6 }
0x10f6   :  { %9155 = vrcp.f32 %v5366_v60 }
0x10f7   :  { %v11139_v33 = vpop.eup %9149 }
0x10f8   :  { %v5267_v25 = vpop.xlane.xlu0 %5266  ;;  %v5276_v28 = vpop.xlane.xlu1 %5275  ;;  %v5400_v45 = vsel %vm567_vm9, %v11139_v33, 0.0 }
0x10f9   :  { %v5305_v48 = vsub.f32 %v11016_v43, %v5267_v25  ;;  %v5308_v55 = vsub.f32 %v11026_v46, %v5276_v28  ;;  %5401 = vadd.xlane.f32.xlu0 %v5400_v45 }
0x10fb   :  { %v11145_v4 = vpop.eup %9151  ;;  %v5345_v29 = vmul.f32 1.442695, %v5305_v48  ;;  %v5351_v39 = vmul.f32 1.442695, %v5308_v55  ;;  %v5655_v48 = vsel %vm2034_vm10, %v10962_v54, 0 }
0x10fc   :  { %v5363_v42 = vpop.xlane.xlu0 %5362  ;;  %v5372_v3 = vpop.xlane.xlu1 %5371  ;;  %v5406_v23 = vsel %vm567_vm9, %v11145_v4, 0.0 }
0x10fd   :  { %9157 = vpow2.f32 %v5345_v29  ;;  %5407 = vadd.xlane.f32.xlu0 %v5406_v23 }
0x10fe   :  { %9159 = vpow2.f32 %v5351_v39 }
0x10ff   :  { %v11149_v56 = vpop.eup %9153  ;;  %9161 = vrcp.f32 %v5363_v42 }
0x1100   :  { %v9156_v6 = vpop.eup %9155  ;;  %9163 = vrcp.f32 %v5372_v3  ;;  %v11151_v43 = vpop.xlane.xlu0 %5272  ;;  %v5412_v60 = vsel %vm567_vm9, %v11149_v56, 0.0 }
0x1101   :  { %v11153_v46 = vpop.xlane.xlu1 %5281  ;;  %v5458_v25 = vmul.f32 %v9156_v6, %v11049_v24  ;;  %5413 = vadd.xlane.f32.xlu0 %v5412_v60 }
0x1103   :  { %v5482_v28 = vpack.c.bf16 %v5458_v25, %v5458_v25 }
0x1104   :  { %v5369_v45 = vpop.xlane.xlu0 %5368 }
0x1105   :  { %8475 = vmatmul.mubr.msk.bf16.vlgmr.msra.gmra.mrb[184].mxu1 %vm567_vm9, %v5482_v28  ;;  %v5378_v55 = vpop.xlane.xlu1 %5377  ;;  %9165 = vrcp.f32 %v5369_v45 }
0x1106   :  { %8485 = vmatpush3.bf16.msra.mxu1 %v5655_v48  ;;  %8486 = vmatprep.mubr.msk.bf16.mxu1 %vm9311_vm0, %v11777_v32  ;;  %9167 = vrcp.f32 %v5378_v55  ;;  %v5607_v48 = vsel %vm2034_vm10, %v10964_v58, 0  ;;  %v5751_v55 = vsel %vm2034_vm10, %v10966_v17, 0 }
0x1107   :  { %v11163_v29 = vpop.eup %9157  ;;  %8496 = vmatprep.subr.bf16.mxu1 %v11777_v32 }
0x1108   :  { %v11166_v39 = vpop.eup %9159  ;;  %v11168_v24 = vpop.xlane.xlu0 %5278  ;;  %v5409_v54 = vsel %vm567_vm9, %v11163_v29, 0.0 }
0x1109   :  { %v9162_v42 = vpop.eup %9161  ;;  %v5418_v3 = vsel %vm567_vm9, %v11166_v39, 0.0  ;;  %5410 = vadd.xlane.f32.xlu1 %v5409_v54  ;;  %v5288_v54 = vpop.xlane.xlu1 %5287 }
0x110a   :  { %v9164_v23 = vpop.eup %9163  ;;  %v5457_v6 = vmul.f32 %v9162_v42, %v11058_v0  ;;  %5419 = vadd.xlane.f32.xlu0 %v5418_v3 }
0x110b   :  { %v5460_v60 = vmul.f32 %v9164_v23, %v11064_v30 }
0x110c   :  { %v5481_v25 = vpack.c.bf16 %v5457_v6, %v5457_v6  ;;  %v5375_v28 = vpop.xlane.xlu0 %5374 }
0x110d   :  { %v5484_v45 = vpack.c.bf16 %v5460_v60, %v5460_v60  ;;  %9169 = vrcp.f32 %v5375_v28  ;;  %v5847_v28 = vsel %vm2034_vm10, %v10978_v27, 0 }
0x110e   :  { %8469 = vmatmul.mubr.msk.bf16.vlgmr.msra.gmra.mrb[176].mxu0 %vm567_vm9, %v5481_v25  ;;  %v5703_v25 = vsel %vm2034_vm10, %v10968_v14, 0 }
0x110f   :  { %8479 = vmatpush3.bf16.msra.mxu0 %v5607_v48  ;;  %8487 = vmatmul.mubr.msk.bf16.vlgmr.msra.gmra.mrb[188].mxu1 %vm567_vm9, %v5484_v45  ;;  %v9166_v30 = vpop.eup %9165 }
0x1110   :  { %8497 = vmatpush3.bf16.msra.mxu1 %v5751_v55  ;;  %v11182_v0 = vpop.xlane.xlu0 %5284  ;;  %8480 = vmatprep.mubr.msk.bf16.mxu0 %vm9311_vm0, %v11777_v32  ;;  %v9168_v58 = vpop.eup %9167  ;;  %v5459_v17 = vmul.f32 %v9166_v30, %v11070_v52 }
0x1111   :  { %8490 = vmatprep.subr.bf16.mxu0 %v11777_v32  ;;  %8498 = vmatprep.mubr.msk.bf16.mxu1 %vm9311_vm0, %v11777_v32  ;;  %v5462_v42 = vmul.f32 %v9168_v58, %v11076_v21  ;;  %v5799_v21 = vsel %vm2034_vm10, %v10980_v61, 0  ;;  %v5943_v61 = vsel %vm2034_vm10, %v10990_v18, 0  ;;  %v5895_v58 = vsel %vm2034_vm10, %v10992_v19, 0 }
0x1112   :  { %8508 = vmatprep.subr.bf16.mxu1 %v11777_v32  ;;  %v5483_v3 = vpack.c.bf16 %v5459_v17, %v5459_v17  ;;  %v5310_v18 = vsub.f32 %v11036_v20, %v11153_v46  ;;  %v5311_v17 = vsub.f32 %v11051_v5, %v11182_v0 }
0x1113   :  { %v5486_v6 = vpack.c.bf16 %v5462_v42, %v5462_v42 }
0x1114   :  { %v5381_v23 = vpop.xlane.xlu0 %5380  ;;  %v5357_v20 = vmul.f32 1.442695, %v5311_v17 }
0x1115   :  { %v5384_v60 = vpop.xlane.xlu1 %5383  ;;  %9171 = vrcp.f32 %v5381_v23 }
0x1116   :  { %8481 = vmatmul.mubr.msk.bf16.vlgmr.msra.gmra.mrb[180].mxu0 %vm567_vm9, %v5483_v3  ;;  %9173 = vrcp.f32 %v5384_v60 }
0x1117   :  { %8491 = vmatpush3.bf16.msra.mxu0 %v5703_v25  ;;  %8499 = vmatmul.mubr.msk.bf16.vlgmr.msra.gmra.mrb[192].mxu1 %vm567_vm9, %v5486_v6  ;;  %v9170_v52 = vpop.eup %9169 }
0x1118   :  { %8509 = vmatpush3.bf16.msra.mxu1 %v5847_v28  ;;  %8492 = vmatprep.mubr.msk.bf16.mxu0 %vm9311_vm0, %v11777_v32  ;;  %v5461_v14 = vmul.f32 %v9170_v52, %v11088_v50 }
0x1119   :  { %8502 = vmatprep.subr.bf16.mxu0 %v11777_v32  ;;  %8510 = vmatprep.mubr.msk.bf16.mxu1 %vm9311_vm0, %v11777_v32 }
0x111a   :  { %6465 = vrot.lane.b32.xlu1 %v10775_v9, %s9316_s30  ;;  %8520 = vmatprep.subr.bf16.mxu1 %v11777_v32  ;;  %v5485_v27 = vpack.c.bf16 %v5461_v14, %v5461_v14 }
0x111e   :  { %8493 = vmatmul.mubr.msk.bf16.vlgmr.msra.gmra.mrb[184].mxu0 %vm567_vm9, %v5485_v27 }
0x111f   :  { %8503 = vmatpush3.bf16.msra.mxu0 %v5799_v21  ;;  %8504 = vmatprep.mubr.msk.bf16.mxu0 %vm9311_vm0, %v11777_v32  ;;  %v9172_v45 = vpop.eup %9171 }
0x1120   :  { %6513 = vrot.lane.b32.xlu0 %v10784_v7, %s9316_s30  ;;  %8514 = vmatprep.subr.bf16.mxu0 %v11777_v32  ;;  %v9174_v50 = vpop.eup %9173  ;;  %v5463_v9 = vmul.f32 %v9172_v45, %v11094_v26  ;;  %v5307_v7 = vsub.f32 %v11024_v34, %v11151_v43  ;;  %v5309_v26 = vsub.f32 %v11032_v22, %v11168_v24 }
0x1121   :  { %v5464_v48 = vmul.f32 %v9174_v50, %v11096_v8  ;;  %v5355_v8 = vmul.f32 1.442695, %v5310_v18  ;;  %v5312_v34 = vsub.f32 %v11053_v37, %v5288_v54 }
0x1122   :  { %v5487_v55 = vpack.c.bf16 %v5463_v9, %v5463_v9  ;;  %v5349_v19 = vmul.f32 1.442695, %v5307_v7  ;;  %v5353_v43 = vmul.f32 1.442695, %v5309_v26  ;;  %v6135_v7 = vsel %vm2034_vm10, %v11000_v10, 0 }
0x1123   :  { %v5488_v30 = vpack.c.bf16 %v5464_v48, %v5464_v48  ;;  %v5359_v42 = vmul.f32 1.442695, %v5312_v34  ;;  %v5991_v48 = vsel %vm2034_vm10, %v11002_v15, 0  ;;  %v6183_v10 = vsel %vm2034_vm10, %v11020_v44, 0 }
0x1124   :  { %9175 = vpow2.f32 %v5349_v19 }
0x1125   :  { %8511 = vmatmul.mubr.msk.bf16.vlgmr.msra.gmra.mrb[196].mxu1 %vm567_vm9, %v5488_v30  ;;  %9177 = vpow2.f32 %v5355_v8  ;;  %v6039_v30 = vsel %vm2034_vm10, %v11022_v2, 0 }
0x1126   :  { %8505 = vmatmul.mubr.msk.bf16.vlgmr.msra.gmra.mrb[188].mxu0 %vm567_vm9, %v5487_v55  ;;  %8521 = vmatpush3.bf16.msra.mxu1 %v5943_v61  ;;  %9179 = vpow2.f32 %v5353_v43  ;;  %v6087_v61 = vsel %vm2034_vm10, %v11014_v51, 0 }
0x1127   :  { %8515 = vmatpush3.bf16.msra.mxu0 %v5895_v58  ;;  %8516 = vmatprep.mubr.msk.bf16.mxu0 %vm9311_vm0, %v11777_v32  ;;  %9181 = vpow2.f32 %v5359_v42 }
0x1128   :  { %8526 = vmatprep.subr.bf16.mxu0 %v11777_v32  ;;  %8522 = vmatprep.mubr.msk.bf16.mxu1 %vm9311_vm0, %v11777_v32  ;;  %9183 = vpow2.f32 %v5357_v20 }
0x1129   :  { %8532 = vmatprep.subr.bf16.mxu1 %v11777_v32 }
0x112e   :  { %v11238_v46 = vpop.eup %9175 }
0x112f   :  { %v11240_v3 = vpop.eup %9177  ;;  %v5415_v22 = vsel %vm567_vm9, %v11238_v46, 0.0 }
0x1130   :  { %v11244_v24 = vpop.eup %9179  ;;  %v5424_v37 = vsel %vm567_vm9, %v11240_v3, 0.0 }
0x1131   :  { %v11248_v5 = vpop.eup %9181  ;;  %v5421_v0 = vsel %vm567_vm9, %v11244_v24, 0.0 }
0x1132   :  { %v11252_v54 = vpop.eup %9183  ;;  %v5430_v23 = vsel %vm567_vm9, %v11248_v5, 0.0 }
0x1133   :  { %v5427_v6 = vsel %vm567_vm9, %v11252_v54, 0.0 }
0x113e   :  { %5416 = vadd.xlane.f32.xlu1 %v5415_v22 }
0x113f   :  { %5425 = vadd.xlane.f32.xlu0 %v5424_v37 }
0x1142   :  { %5422 = vadd.xlane.f32.xlu1 %v5421_v0 }
0x1143   :  { %5431 = vadd.xlane.f32.xlu0 %v5430_v23  ;;  %v6327_v23 = vsel %vm2034_vm10, %v11030_v47, 0  ;;  %v6423_v47 = vsel %vm2034_vm10, %v11137_v36, 0 }
0x1146   :  { %5428 = vadd.xlane.f32.xlu1 %v5427_v6 }
0x1149   :  { %v5387_v60 = vpop.xlane.xlu1 %5386 }
0x114a   :  { %v5390_v25 = vpop.xlane.xlu0 %5389  ;;  %9185 = vrcp.f32 %v5387_v60 }
0x114b   :  { %9187 = vrcp.f32 %v5390_v25 }
0x1151   :  { %v5393_v28 = vpop.xlane.xlu1 %5392 }
0x1152   :  { %v5396_v52 = vpop.xlane.xlu0 %5395  ;;  %9189 = vrcp.f32 %v5393_v28 }
0x1153   :  { %9191 = vrcp.f32 %v5396_v52  ;;  %v6375_v52 = vsel %vm2034_vm10, %v11132_v59, 0 }
0x1154   :  { %v9186_v14 = vpop.eup %9185 }
0x1155   :  { %v9188_v27 = vpop.eup %9187  ;;  %v5465_v21 = vmul.f32 %v9186_v14, %v11106_v1 }
0x1156   :  { %v5466_v45 = vmul.f32 %v9188_v27, %v11108_v12 }
0x1157   :  { %6561 = vrot.lane.b32.xlu1 %v10796_v35, %s9316_s30  ;;  %v5489_v50 = vpack.c.bf16 %v5465_v21, %v5465_v21 }
0x1158   :  { %v5490_v9 = vpack.c.bf16 %v5466_v45, %v5466_v45 }
0x1159   :  { %6609 = vrot.lane.b32.xlu0 %v10794_v16, %s9316_s30  ;;  %8517 = vmatmul.mubr.msk.bf16.vlgmr.msra.gmra.mrb[192].mxu0 %vm567_vm9, %v5489_v50  ;;  %v5399_v55 = vpop.xlane.xlu1 %5398 }
0x115a   :  { %8523 = vmatmul.mubr.msk.bf16.vlgmr.msra.gmra.mrb[200].mxu1 %vm567_vm9, %v5490_v9  ;;  %8527 = vmatpush3.bf16.msra.mxu0 %v5991_v48  ;;  %9193 = vrcp.f32 %v5399_v55 }
0x115b   :  { %8533 = vmatpush3.bf16.msra.mxu1 %v6039_v30  ;;  %8528 = vmatprep.mubr.msk.bf16.mxu0 %vm9311_vm0, %v11777_v32 }
0x115c   :  { %v9190_v12 = vpop.eup %9189  ;;  %8534 = vmatprep.mubr.msk.bf16.mxu1 %vm9311_vm0, %v11777_v32  ;;  %8538 = vmatprep.subr.bf16.mxu0 %v11777_v32 }
0x115d   :  { %v9192_v16 = vpop.eup %9191  ;;  %v5467_v35 = vmul.f32 %v9190_v12, %v11115_v13  ;;  %8544 = vmatprep.subr.bf16.mxu1 %v11777_v32 }
0x115e   :  { %v5468_v15 = vmul.f32 %v9192_v16, %v11117_v62 }
0x115f   :  { %v5491_v2 = vpack.c.bf16 %v5467_v35, %v5467_v35 }
0x1160   :  { %v5492_v1 = vpack.c.bf16 %v5468_v15, %v5468_v15 }
0x1161   :  { %8529 = vmatmul.mubr.msk.bf16.vlgmr.msra.gmra.mrb[196].mxu0 %vm567_vm9, %v5491_v2  ;;  %v5405_v58 = vpop.xlane.xlu1 %5404 }
0x1162   :  { %8535 = vmatmul.mubr.msk.bf16.vlgmr.msra.gmra.mrb[204].mxu1 %vm567_vm9, %v5492_v1  ;;  %8539 = vmatpush3.bf16.msra.mxu0 %v6087_v61  ;;  %9195 = vrcp.f32 %v5405_v58 }
0x1163   :  { %8545 = vmatpush3.bf16.msra.mxu1 %v6135_v7  ;;  %8540 = vmatprep.mubr.msk.bf16.mxu0 %vm9311_vm0, %v11777_v32 }
0x1164   :  { %v9194_v13 = vpop.eup %9193  ;;  %8550 = vmatprep.subr.bf16.mxu0 %v11777_v32  ;;  %8546 = vmatprep.mubr.msk.bf16.mxu1 %vm9311_vm0, %v11777_v32 }
0x1165   :  { %v5469_v51 = vmul.f32 %v9194_v13, %v11124_v38  ;;  %8556 = vmatprep.subr.bf16.mxu1 %v11777_v32  ;;  %v6279_v38 = vsel %vm2034_vm10, %v11028_v31, 0  ;;  %v6231_v31 = vsel %vm2034_vm10, %v11012_v63, 0 }
0x1167   :  { %v5493_v62 = vpack.c.bf16 %v5469_v51, %v5469_v51 }
0x1169   :  { %8541 = vmatmul.mubr.msk.bf16.vlgmr.msra.gmra.mrb[200].mxu0 %vm567_vm9, %v5493_v62 }
0x116a   :  { %8551 = vmatpush3.bf16.msra.mxu0 %v6183_v10  ;;  %8552 = vmatprep.mubr.msk.bf16.mxu0 %vm9311_vm0, %v11777_v32 }
0x116b   :  { %8562 = vmatprep.subr.bf16.mxu0 %v11777_v32 }
0x116c   :  { %v9196_v18 = vpop.eup %9195 }
0x116d   :  { %v5471_v19 = vmul.f32 %v9196_v18, %v11128_v57 }
0x116f   :  { %v5495_v26 = vpack.c.bf16 %v5471_v19, %v5471_v19 }
0x1171   :  { %8553 = vmatmul.mubr.msk.bf16.vlgmr.msra.gmra.mrb[204].mxu0 %vm567_vm9, %v5495_v26 }
0x1172   :  { %8563 = vmatpush3.bf16.msra.mxu0 %v6279_v38  ;;  %8564 = vmatprep.mubr.msk.bf16.mxu0 %vm9311_vm0, %v11777_v32 }
0x1173   :  { %8574 = vmatprep.subr.bf16.mxu0 %v11777_v32 }
0x1186   :  { %v5402_v44 = vpop.xlane.xlu0 %5401 }
0x1187   :  { %9197 = vrcp.f32 %v5402_v44 }
0x118a   :  { %v5408_v8 = vpop.xlane.xlu0 %5407 }
0x118b   :  { %9199 = vrcp.f32 %v5408_v8 }
0x118e   :  { %v5414_v34 = vpop.xlane.xlu0 %5413 }
0x118f   :  { %9201 = vrcp.f32 %v5414_v34 }
0x1191   :  { %v9198_v43 = vpop.eup %9197 }
0x1192   :  { %v5470_v57 = vmul.f32 %v9198_v43, %v11139_v33 }
0x1194   :  { %v5494_v17 = vpack.c.bf16 %v5470_v57, %v5470_v57 }
0x1195   :  { %v9200_v42 = vpop.eup %9199 }
0x1196   :  { %8547 = vmatmul.mubr.msk.bf16.vlgmr.msra.gmra.mrb[208].mxu1 %vm567_vm9, %v5494_v17  ;;  %v5411_v20 = vpop.xlane.xlu1 %5410  ;;  %v5472_v22 = vmul.f32 %v9200_v42, %v11145_v4 }
0x1197   :  { %8557 = vmatpush3.bf16.msra.mxu1 %v6231_v31  ;;  %9203 = vrcp.f32 %v5411_v20  ;;  %8558 = vmatprep.mubr.msk.bf16.mxu1 %vm9311_vm0, %v11777_v32  ;;  %v5420_v37 = vpop.xlane.xlu0 %5419 }
0x1198   :  { %8568 = vmatprep.subr.bf16.mxu1 %v11777_v32  ;;  %9205 = vrcp.f32 %v5420_v37  ;;  %v5496_v33 = vpack.c.bf16 %v5472_v22, %v5472_v22 }
0x1199   :  { %v9202_v0 = vpop.eup %9201 }
0x119a   :  { %v5474_v63 = vmul.f32 %v9202_v0, %v11149_v56 }
0x119b   :  { %v6514_v59 = vpop.permute.xlu0 %6513 }
0x119c   :  { %v5498_v25 = vpack.c.bf16 %v5474_v63, %v5474_v63 }
0x119e   :  { %8559 = vmatmul.mubr.msk.bf16.vlgmr.msra.gmra.mrb[212].mxu1 %vm567_vm9, %v5496_v33 }
0x119f   :  { %8569 = vmatpush3.bf16.msra.mxu1 %v6327_v23  ;;  %8570 = vmatprep.mubr.msk.bf16.mxu1 %vm9311_vm0, %v11777_v32 }
0x11a0   :  { %8580 = vmatprep.subr.bf16.mxu1 %v11777_v32 }
0x11a1   :  { %v9204_v4 = vpop.eup %9203 }
0x11a2   :  { %v5473_v6 = vmul.f32 %v9204_v4, %v11163_v29  ;;  %v9206_v28 = vpop.eup %9205  ;;  %v6519_v29 = vsel %vm2034_vm10, %v6514_v59, 0 }
0x11a3   :  { %v5476_v56 = vmul.f32 %v9206_v28, %v11166_v39  ;;  %v6466_v39 = vpop.permute.xlu1 %6465 }
0x11a4   :  { %v5497_v60 = vpack.c.bf16 %v5473_v6, %v5473_v6  ;;  %v6471_v7 = vsel %vm2034_vm10, %v6466_v39, 0 }
0x11a5   :  { %v5500_v36 = vpack.c.bf16 %v5476_v56, %v5476_v56 }
0x11a6   :  { %8565 = vmatmul.mubr.msk.bf16.vlgmr.msra.gmra.mrb[208].mxu0 %vm567_vm9, %v5497_v60  ;;  %8571 = vmatmul.mubr.msk.bf16.vlgmr.msra.gmra.mrb[216].mxu1 %vm567_vm9, %v5498_v25 }
0x11a7   :  { %8575 = vmatpush3.bf16.msra.mxu0 %v6375_v52  ;;  %8581 = vmatpush3.bf16.msra.mxu1 %v6423_v47 }
0x11a8   :  { %8582 = vmatprep.mubr.msk.bf16.mxu1 %vm9311_vm0, %v11777_v32  ;;  %8592 = vmatprep.subr.bf16.mxu1 %v11777_v32 }
0x11a9   :  { %8576 = vmatprep.mubr.msk.bf16.mxu0 %vm9311_vm0, %v11777_v32  ;;  %8586 = vmatprep.subr.bf16.mxu0 %v11777_v32 }
0x11ae   :  { %8583 = vmatmul.mubr.msk.bf16.vlgmr.msra.gmra.mrb[220].mxu1 %vm567_vm9, %v5500_v36 }
0x11af   :  { %8593 = vmatpush3.bf16.msra.mxu1 %v6519_v29  ;;  %8594 = vmatprep.mubr.msk.bf16.mxu1 %vm9311_vm0, %v11777_v32 }
0x11b0   :  { %8604 = vmatprep.subr.bf16.mxu1 %v11777_v32 }
0x11cb   :  { %v5417_v14 = vpop.xlane.xlu1 %5416 }
0x11cc   :  { %v5426_v27 = vpop.xlane.xlu0 %5425  ;;  %9207 = vrcp.f32 %v5417_v14 }
0x11cd   :  { %9209 = vrcp.f32 %v5426_v27 }
0x11cf   :  { %v5423_v21 = vpop.xlane.xlu1 %5422 }
0x11d0   :  { %v5432_v45 = vpop.xlane.xlu0 %5431  ;;  %9211 = vrcp.f32 %v5423_v21 }
0x11d1   :  { %9213 = vrcp.f32 %v5432_v45 }
0x11d3   :  { %v5429_v50 = vpop.xlane.xlu1 %5428 }
0x11d4   :  { %9215 = vrcp.f32 %v5429_v50  ;;  %v6610_v16 = vpop.permute.xlu0 %6609 }
0x11d5   :  { %v6615_v51 = vsel %vm2034_vm10, %v6610_v16, 0 }
0x11d6   :  { %v9208_v9 = vpop.eup %9207 }
0x11d7   :  { %v9210_v48 = vpop.eup %9209  ;;  %v5475_v55 = vmul.f32 %v9208_v9, %v11238_v46  ;;  %v6562_v62 = vpop.permute.xlu1 %6561 }
0x11d8   :  { %v5478_v30 = vmul.f32 %v9210_v48, %v11240_v3  ;;  %v11340_v12 = vpop.f32.mrb[184].mxu1  ;;  %v6567_v44 = vsel %vm2034_vm10, %v6562_v62, 0 }
0x11d9   :  { %v8476_v35 = vpop.f32.mrb[185].mxu1  ;;  %v5499_v15 = vpack.c.bf16 %v5475_v55, %v5475_v55 }
0x11da   :  { %v9212_v2 = vpop.eup %9211  ;;  %v5598_v1 = vpop.f32.mrb[186].mxu1  ;;  %v5502_v61 = vpack.c.bf16 %v5478_v30, %v5478_v30 }
0x11db   :  { %v9214_v58 = vpop.eup %9213  ;;  %v8477_v13 = vpop.f32.mrb[187].mxu1  ;;  %8577 = vmatmul.mubr.msk.bf16.vlgmr.msra.gmra.mrb[212].mxu0 %vm567_vm9, %v5499_v15  ;;  %v5477_v46 = vmul.f32 %v9212_v2, %v11244_v24 }
0x11dc   :  { %8587 = vmatpush3.bf16.msra.mxu0 %v6471_v7  ;;  %8595 = vmatmul.mubr.msk.bf16.vlgmr.msra.gmra.mrb[224].mxu1 %vm567_vm9, %v5502_v61  ;;  %v5480_v3 = vmul.f32 %v9214_v58, %v11248_v5 }
0x11dd   :  { %8605 = vmatpush3.bf16.msra.mxu1 %v6615_v51  ;;  %8588 = vmatprep.mubr.msk.bf16.mxu0 %vm9311_vm0, %v11777_v32  ;;  %v5501_v18 = vpack.c.bf16 %v5477_v46, %v5477_v46 }
0x11de   :  { %8598 = vmatprep.subr.bf16.mxu0 %v11777_v32  ;;  %8606 = vmatprep.mubr.msk.bf16.mxu1 %vm9311_vm0, %v11777_v32  ;;  %v9216_v19 = vpop.eup %9215  ;;  %v5504_v38 = vpack.c.bf16 %v5480_v3, %v5480_v3 }
0x11df   :  { %8626 = vmatprep.subr.bf16.mxu1 %v11777_v32  ;;  %v5479_v57 = vmul.f32 %v9216_v19, %v11252_v54 }
0x11e1   :  { %v11354_v10 = vpop.f32.mrb[176].mxu0  ;;  %v5503_v31 = vpack.c.bf16 %v5479_v57, %v5479_v57 }
0x11e2   :  { %v11356_v26 = vpop.f32.mrb[188].mxu1  ;;  %v8470_v24 = vpop.f32.mrb[177].mxu0 }
0x11e3   :  { %v8488_v8 = vpop.f32.mrb[189].mxu1  ;;  %v5550_v5 = vpop.f32.mrb[178].mxu0  ;;  %8589 = vmatmul.mubr.msk.bf16.vlgmr.msra.gmra.mrb[216].mxu0 %vm567_vm9, %v5501_v18 }
0x11e4   :  { %v5694_v34 = vpop.f32.mrb[190].mxu1  ;;  %v8471_v43 = vpop.f32.mrb[179].mxu0  ;;  %8599 = vmatpush3.bf16.msra.mxu0 %v6567_v44  ;;  %8607 = vmatmul.mubr.msk.bf16.vlgmr.msra.gmra.mrb[228].mxu1 %vm567_vm9, %v5504_v38  ;;  %v7577_v44 = vld [vmem:[%s11741_s6 + $0x20] sm:$0xff]  ;;  %v7578_v8 = vld [vmem:[%s11741_s6 + $0x28] sm:$0xff] }
0x11e5   :  { %v8489_v17 = vpop.f32.mrb[191].mxu1  ;;  %8600 = vmatprep.mubr.msk.bf16.mxu0 %vm9311_vm0, %v11777_v32  ;;  %8610 = vmatprep.subr.bf16.mxu0 %v11777_v32  ;;  %v6750_v5 = vpack.c.bf16 %v7578_v8, %v7577_v44 }
0x11e6   :  { %8630 = vmatprep.mubr.msk.bf16.mxu1 %vm9311_vm0, %v11777_v32 }
0x11e9   :  { %v11367_v42 = vpop.f32.mrb[180].mxu0 }
0x11ea   :  { %v11369_v20 = vpop.f32.mrb[192].mxu1  ;;  %v8482_v22 = vpop.f32.mrb[181].mxu0 }
0x11eb   :  { %v8500_v37 = vpop.f32.mrb[193].mxu1  ;;  %v5646_v33 = vpop.f32.mrb[182].mxu0  ;;  %8601 = vmatmul.mubr.msk.bf16.vlgmr.msra.gmra.mrb[220].mxu0 %vm567_vm9, %v5503_v31 }
0x11ec   :  { %v5790_v54 = vpop.f32.mrb[194].mxu1  ;;  %v8483_v0 = vpop.f32.mrb[183].mxu0  ;;  %8614 = vmatprep.mubr.msk.bf16.mxu0 %vm9311_vm0, %v11777_v32  ;;  %8611 = vmatpush3.bf16.msra.mxu0 %v6750_v5 }
0x11ed   :  { %v8501_v23 = vpop.f32.mrb[195].mxu1  ;;  %8612 = vmatprep.subr.bf16.mxu0 %v11777_v32 }
0x11f1   :  { %v11374_v63 = vpop.f32.mrb[184].mxu0 }
0x11f2   :  { %v8494_v4 = vpop.f32.mrb[185].mxu0 }
0x11f3   :  { %v5742_v6 = vpop.f32.mrb[186].mxu0 }
0x11f4   :  { %v8495_v60 = vpop.f32.mrb[187].mxu0 }
0x11f8   :  { %v5883_v28 = vpop.f32.mrb[196].mxu1 }
0x11f9   :  { %v5835_v25 = vpop.f32.mrb[188].mxu0  ;;  %v8512_v56 = vpop.f32.mrb[197].mxu1 }
0x11fa   :  { %v8932_v52 = vpack.i.bf16 %v5883_v28, %v5835_v25  ;;  %v8506_v47 = vpop.f32.mrb[189].mxu0  ;;  %v5886_v36 = vpop.f32.mrb[198].mxu1 }
0x11fb   :  { %v5838_v59 = vpop.f32.mrb[190].mxu0  ;;  %v8513_v39 = vpop.f32.mrb[199].mxu1 }
0x11fc   :  { %v8507_v29 = vpop.f32.mrb[191].mxu0  ;;  %8933 = vrot.lane.b32.xlu1 %v8932_v52, %s9317_s0 }
0x122c   :  { %v5931_v14 = vpop.f32.mrb[192].mxu0 }
0x122d   :  { %v5979_v27 = vpop.f32.mrb[200].mxu1  ;;  %v8518_v21 = vpop.f32.mrb[193].mxu0 }
0x122e   :  { %v8947_v45 = vpack.i.bf16 %v5979_v27, %v5931_v14  ;;  %v8524_v50 = vpop.f32.mrb[201].mxu1  ;;  %v5934_v9 = vpop.f32.mrb[194].mxu0  ;;  %v7579_v14 = vld [vmem:[%s11741_s6 + $0x30] sm:$0xff]  ;;  %v7580_v27 = vld [vmem:[%s11741_s6 + $0x38] sm:$0xff] }
0x122f   :  { %v5982_v48 = vpop.f32.mrb[202].mxu1  ;;  %v8519_v55 = vpop.f32.mrb[195].mxu0  ;;  %v6751_v21 = vpack.c.bf16 %v7580_v27, %v7579_v14 }
0x1230   :  { %v8525_v30 = vpop.f32.mrb[203].mxu1 }
0x1231   :  { %8613 = vmatpush3.bf16.msra.mxu0 %v6751_v21 }
0x1232   :  { %8642 = vmatprep.subr.bf16.mxu0 %v11777_v32 }
0x1234   :  { %v11377_v16 = vpop.f32.mrb[196].mxu0 }
0x1235   :  { %v11379_v35 = vpop.f32.mrb[204].mxu1  ;;  %v8530_v15 = vpop.f32.mrb[197].mxu0 }
0x1236   :  { %v8962_v2 = vpack.i.bf16 %v11379_v35, %v11377_v16  ;;  %v8536_v1 = vpop.f32.mrb[205].mxu1  ;;  %v6030_v61 = vpop.f32.mrb[198].mxu0 }
0x1237   :  { %v6078_v58 = vpop.f32.mrb[206].mxu1  ;;  %v8531_v7 = vpop.f32.mrb[199].mxu0 }
0x1238   :  { %v8537_v13 = vpop.f32.mrb[207].mxu1 }
0x123c   :  { %v6123_v51 = vpop.f32.mrb[200].mxu0 }
0x123d   :  { %v8542_v46 = vpop.f32.mrb[201].mxu0 }
0x123e   :  { %v6126_v3 = vpop.f32.mrb[202].mxu0 }
0x123f   :  { %v8543_v62 = vpop.f32.mrb[203].mxu0 }
0x1244   :  { %v6219_v18 = vpop.f32.mrb[204].mxu0 }
0x1245   :  { %v8554_v19 = vpop.f32.mrb[205].mxu0 }
0x1246   :  { %v6222_v24 = vpop.f32.mrb[206].mxu0 }
0x1247   :  { %v8555_v38 = vpop.f32.mrb[207].mxu0 }
0x1269   :  { %v6171_v34 = vpop.f32.mrb[208].mxu1 }
0x126a   :  { %v8937_v43 = vpack.i.bf16 %v6171_v34, %v6123_v51  ;;  %v8548_v57 = vpop.f32.mrb[209].mxu1 }
0x126b   :  { %v6174_v17 = vpop.f32.mrb[210].mxu1 }
0x126c   :  { %8938 = vrot.lane.b32.xlu0 %v8937_v43, %s9318_s2  ;;  %v8549_v31 = vpop.f32.mrb[211].mxu1 }
0x126e   :  { %v8934_v34 = vpop.permute.xlu1 %8933 }
0x126f   :  { %v8936_v57 = vunpack.i.h.bf16 %v8934_v34  ;;  %v8935_v17 = vunpack.i.l.bf16 %v8934_v34 }
0x1270   :  { %8948 = vrot.lane.b32.xlu0 %v8947_v45, %s9317_s0 }
0x1271   :  { %v6267_v22 = vpop.f32.mrb[212].mxu1  ;;  %v6730_v35 = vsel %vm567_vm9, %v11340_v12, %v8936_v57 }
0x1272   :  { %v8952_v37 = vpack.i.bf16 %v6267_v22, %v6219_v18  ;;  %v8560_v33 = vpop.f32.mrb[213].mxu1 }
0x1273   :  { %v6270_v54 = vpop.f32.mrb[214].mxu1 }
0x1274   :  { %v8561_v0 = vpop.f32.mrb[215].mxu1 }
0x1279   :  { %v6315_v23 = vpop.f32.mrb[208].mxu0  ;;  %v6363_v4 = vpop.f32.mrb[216].mxu1 }
0x127a   :  { %v8967_v6 = vpack.i.bf16 %v6363_v4, %v6315_v23  ;;  %v8566_v60 = vpop.f32.mrb[209].mxu0  ;;  %v8572_v25 = vpop.f32.mrb[217].mxu1 }
0x127b   :  { %v6318_v28 = vpop.f32.mrb[210].mxu0  ;;  %v6366_v52 = vpop.f32.mrb[218].mxu1 }
0x127c   :  { %v8567_v47 = vpop.f32.mrb[211].mxu0  ;;  %v8573_v56 = vpop.f32.mrb[219].mxu1 }
0x1281   :  { %v6459_v59 = vpop.f32.mrb[220].mxu1 }
0x1282   :  { %v8584_v36 = vpop.f32.mrb[221].mxu1 }
0x1283   :  { %v6462_v29 = vpop.f32.mrb[222].mxu1 }
0x1284   :  { %v8585_v39 = vpop.f32.mrb[223].mxu1 }
0x12ae   :  { %v6411_v45 = vpop.f32.mrb[212].mxu0 }
0x12af   :  { %v8942_v50 = vpack.i.bf16 %v6459_v59, %v6411_v45  ;;  %v6555_v9 = vpop.f32.mrb[224].mxu1  ;;  %v8578_v48 = vpop.f32.mrb[213].mxu0 }
0x12b0   :  { %v8596_v55 = vpop.f32.mrb[225].mxu1  ;;  %v6414_v30 = vpop.f32.mrb[214].mxu0 }
0x12b1   :  { %v6558_v15 = vpop.f32.mrb[226].mxu1  ;;  %v8579_v1 = vpop.f32.mrb[215].mxu0  ;;  %8943 = vrot.lane.b32.xlu1 %v8942_v50, %s9319_s23 }
0x12b2   :  { %v8597_v61 = vpop.f32.mrb[227].mxu1 }
0x12b5   :  { %8953 = vrot.lane.b32.xlu1 %v8952_v37, %s9318_s2 }
0x12b6   :  { %v6507_v58 = vpop.f32.mrb[216].mxu0 }
0x12b7   :  { %v8957_v7 = vpack.i.bf16 %v6555_v9, %v6507_v58  ;;  %v6651_v13 = vpop.f32.mrb[228].mxu1  ;;  %v8590_v51 = vpop.f32.mrb[217].mxu0 }
0x12b8   :  { %v8608_v46 = vpop.f32.mrb[229].mxu1  ;;  %v6510_v3 = vpop.f32.mrb[218].mxu0 }
0x12b9   :  { %v6654_v62 = vpop.f32.mrb[230].mxu1  ;;  %v8591_v18 = vpop.f32.mrb[219].mxu0  ;;  %8963 = vrot.lane.b32.xlu1 %v8962_v2, %s9317_s0  ;;  %8958 = vrot.lane.b32.xlu0 %v8957_v7, %s9319_s23  ;;  %v6729_v2 = vsel %vm567_vm9, %v11354_v10, %v8935_v17 }
0x12ba   :  { %v8609_v19 = vpop.f32.mrb[231].mxu1 }
0x12bd   :  { %8968 = vrot.lane.b32.xlu0 %v8967_v6, %s9318_s2 }
0x12be   :  { %v6603_v24 = vpop.f32.mrb[220].mxu0 }
0x12bf   :  { %v8972_v38 = vpack.i.bf16 %v6651_v13, %v6603_v24  ;;  %v8602_v44 = vpop.f32.mrb[221].mxu0 }
0x12c0   :  { %v6606_v8 = vpop.f32.mrb[222].mxu0 }
0x12c1   :  { %v8603_v5 = vpop.f32.mrb[223].mxu0  ;;  %8973 = vrot.lane.b32.xlu1 %v8972_v38, %s9319_s23 }
0x12de   :  { %v8939_v43 = vpop.permute.xlu0 %8938 }
0x12df   :  { %v8941_v31 = vunpack.i.h.bf16 %v8939_v43  ;;  %v8940_v22 = vunpack.i.l.bf16 %v8939_v43 }
0x12e1   :  { %v6736_v54 = vsel %vm3260_vm11, %v6730_v35, %v8941_v31  ;;  %v6735_v0 = vsel %vm3260_vm11, %v6729_v2, %v8940_v22 }
0x12e2   :  { %v8949_v23 = vpop.permute.xlu0 %8948 }
0x12e3   :  { %v8951_v28 = vunpack.i.h.bf16 %v8949_v23  ;;  %v8950_v52 = vunpack.i.l.bf16 %v8949_v23  ;;  %v11785_v23 = vld [vmem:[#allocation15_spill] sm:$0xff] }
0x12e5   :  { %v6732_v56 = vsel %vm567_vm9, %v11356_v26, %v8951_v28  ;;  %v6731_v59 = vsel %vm567_vm9, %v11367_v42, %v8950_v52 }
0x1323   :  { %v8944_v16 = vpop.permute.xlu1 %8943 }
0x1324   :  { %v8946_v37 = vunpack.i.h.bf16 %v8944_v16  ;;  %v8945_v33 = vunpack.i.l.bf16 %v8944_v16 }
0x1326   :  { %v6742_v4 = vsel %vm3267_vm12, %v6736_v54, %v8946_v37  ;;  %v6741_v6 = vsel %vm3267_vm12, %v6735_v0, %v8945_v33 }
0x1327   :  { %v6747_v60 = vpack.c.bf16 %v6742_v4, %v6741_v6  ;;  %v8954_v25 = vpop.permute.xlu1 %8953 }
0x1328   :  { %v8956_v47 = vunpack.i.h.bf16 %v8954_v25  ;;  %v8955_v12 = vunpack.i.l.bf16 %v8954_v25  ;;  %v11786_v25 = vld [vmem:[#allocation17_spill] sm:$0xff] }
0x1329   :  { %8615 = vmatmul.mubr.msk.bf16.vlgmr.msra.gmra.mrb[224].mxu0 %vm186_vm8, %v6747_v60 }
0x132a   :  { %8618 = vmatprep.mubr.msk.bf16.mxu0 %vm9311_vm0, %v11777_v32  ;;  %v6738_v39 = vsel %vm3260_vm11, %v6732_v56, %v8956_v47  ;;  %v6737_v14 = vsel %vm3260_vm11, %v6731_v59, %v8955_v12 }
0x132b   :  { %v8959_v10 = vpop.permute.xlu0 %8958  ;;  %v8964_v27 = vpop.permute.xlu1 %8963 }
0x132c   :  { %v8961_v36 = vunpack.i.h.bf16 %v8959_v10  ;;  %v8960_v29 = vunpack.i.l.bf16 %v8959_v10  ;;  %v8966_v48 = vunpack.i.h.bf16 %v8964_v27  ;;  %v8965_v55 = vunpack.i.l.bf16 %v8964_v27 }
0x132e   :  { %v6744_v21 = vsel %vm3267_vm12, %v6738_v39, %v8961_v36  ;;  %v6743_v45 = vsel %vm3267_vm12, %v6737_v14, %v8960_v29  ;;  %v6734_v15 = vsel %vm567_vm9, %v11369_v20, %v8966_v48  ;;  %v6733_v1 = vsel %vm567_vm9, %v11374_v63, %v8965_v55  ;;  %v11444_v20 = vld [vmem:[%s11744_s9 + $0x8] sm:$0xff] }
0x132f   :  { %v6748_v50 = vpack.c.bf16 %v6744_v21, %v6743_v45  ;;  %v8969_v9 = vpop.permute.xlu0 %8968  ;;  %v6755_v63 = vrot.slane %v11444_v20, %v9546_v53 }
0x1330   :  { %v8971_v30 = vunpack.i.h.bf16 %v8969_v9  ;;  %v8970_v26 = vunpack.i.l.bf16 %v8969_v9 }
0x1331   :  { %8619 = vmatmul.mubr.msk.bf16.gmra.mrb[228].mxu0 %vm186_vm8, %v6748_v50 }
0x1332   :  { %8622 = vmatprep.mubr.msk.bf16.mxu0 %vm9311_vm0, %v11777_v32  ;;  %v6740_v7 = vsel %vm3260_vm11, %v6734_v15, %v8971_v30  ;;  %v6739_v13 = vsel %vm3260_vm11, %v6733_v1, %v8970_v26 }
0x1333   :  { %v8974_v42 = vpop.permute.xlu1 %8973 }
0x1334   :  { %v8976_v61 = vunpack.i.h.bf16 %v8974_v42  ;;  %v8975_v58 = vunpack.i.l.bf16 %v8974_v42 }
0x1336   :  { %v6746_v51 = vsel %vm3267_vm12, %v6740_v7, %v8976_v61  ;;  %v6745_v46 = vsel %vm3267_vm12, %v6739_v13, %v8975_v58 }
0x1337   :  { %v6749_v3 = vpack.c.bf16 %v6746_v51, %v6745_v46 }
0x1339   :  { %8623 = vmatmul.mubr.msk.bf16.gmra.mrb[232].mxu0 %vm186_vm8, %v6749_v3 }
0x133a   :  { %8658 = vmatprep.mubr.msk.bf16.mxu0 %vm9311_vm0, %v11777_v32 }
0x13fc   :  { %v6799_v62 = vpop.f32.mrb[224].mxu0 }
0x13fd   :  { %v6800_v18 = vadd.f32 %v6799_v62, %v6755_v63  ;;  %v8616_v19 = vpop.f32.mrb[225].mxu0  ;;  %v7581_v62 = vld [vmem:[%s11742_s7 + $0x20] sm:$0xff] }
0x13fe   :  { %v6802_v24 = vpop.f32.mrb[226].mxu0 }
0x13ff   :  { %v6822_v38 = vadd.f32 %v6800_v18, %v10585_v41  ;;  %v6803_v44 = vadd.f32 %v6802_v24, %v6755_v63  ;;  %v8617_v8 = vpop.f32.mrb[227].mxu0  ;;  %v7582_v18 = vld [vmem:[%s11742_s7 + $0x28] sm:$0xff]  ;;  %v7583_v24 = vld [vmem:[%s11742_s7 + $0x30] sm:$0xff] }
0x1400   :  { %v6929_v19 = vpack.c.bf16 %v7582_v18, %v7581_v62  ;;  %v7589_v62 = vld [vmem:[%s11743_s8 + $0xa0] sm:$0xff]  ;;  %v7590_v18 = vld [vmem:[%s11743_s8 + $0xa8] sm:$0xff] }
0x1401   :  { %v6823_v5 = vadd.f32 %v6803_v44, %v10587_v49  ;;  %v6828_v34 = vsel %vm186_vm8, %v6822_v38, 0.0 }
0x1402   :  { %6829 = vadd.xlane.f32.xlu0 %v6828_v34  ;;  %8627 = vmatpush3.bf16.msra.mxu1 %v6929_v19  ;;  %v7060_v19 = vpack.c.bf16 %v7590_v18, %v7589_v62 }
0x1403   :  { %v6831_v43 = vsel %vm186_vm8, %v6823_v5, 0.0  ;;  %8628 = vmatprep.subr.bf16.mxu1 %v11777_v32 }
0x1404   :  { %v6807_v57 = vpop.f32.mrb[228].mxu0  ;;  %6832 = vadd.xlane.f32.xlu1 %v6831_v43 }
0x1405   :  { %v6808_v17 = vadd.f32 %v6807_v57, %v6755_v63  ;;  %v8620_v31 = vpop.f32.mrb[229].mxu0 }
0x1406   :  { %v6810_v53 = vpop.f32.mrb[230].mxu0 }
0x1407   :  { %v6824_v22 = vadd.f32 %v6808_v17, %v10594_v40  ;;  %v6811_v16 = vadd.f32 %v6810_v53, %v6755_v63  ;;  %v8621_v35 = vpop.f32.mrb[231].mxu0 }
0x1409   :  { %v6825_v41 = vadd.f32 %v6811_v16, %v10596_v11  ;;  %v6834_v2 = vsel %vm186_vm8, %v6824_v22, 0.0 }
0x140a   :  { %6835 = vadd.xlane.f32.xlu0 %v6834_v2 }
0x140b   :  { %v6837_v54 = vsel %vm186_vm8, %v6825_v41, 0.0 }
0x140c   :  { %v6815_v49 = vpop.f32.mrb[232].mxu0 }
0x140d   :  { %v6816_v37 = vadd.f32 %v6815_v49, %v6755_v63  ;;  %v8624_v33 = vpop.f32.mrb[233].mxu0 }
0x140e   :  { %6838 = vadd.xlane.f32.xlu0 %v6837_v54  ;;  %v6818_v0 = vpop.f32.mrb[234].mxu0 }
0x140f   :  { %v6826_v4 = vadd.f32 %v6816_v37, %v11785_v23  ;;  %v6819_v6 = vadd.f32 %v6818_v0, %v6755_v63  ;;  %v8625_v60 = vpop.f32.mrb[235].mxu0 }
0x1411   :  { %v6827_v40 = vadd.f32 %v6819_v6, %v11786_v25  ;;  %v6840_v28 = vsel %vm186_vm8, %v6826_v4, 0.0 }
0x1412   :  { %6841 = vadd.xlane.f32.xlu1 %v6840_v28 }
0x1413   :  { %v6843_v11 = vsel %vm186_vm8, %v6827_v40, 0.0 }
0x1414   :  { %6844 = vadd.xlane.f32.xlu0 %v6843_v11 }
0x148f   :  { %v6830_v52 = vpop.xlane.xlu0 %6829 }
0x1490   :  { %v6846_v47 = vmul.f32 0.03125, %v6830_v52 }
0x1491   :  { %v6833_v12 = vpop.xlane.xlu1 %6832 }
0x1492   :  { %v6852_v10 = vsub.f32 %v6822_v38, %v6846_v47  ;;  %v6847_v56 = vmul.f32 0.03125, %v6833_v12  ;;  %v7584_v38 = vld [vmem:[%s11742_s7 + $0x38] sm:$0xff] }
0x1493   :  { %v6930_v44 = vpack.c.bf16 %v7584_v38, %v7583_v24  ;;  %v7591_v24 = vld [vmem:[%s11743_s8 + $0xb0] sm:$0xff]  ;;  %v7592_v38 = vld [vmem:[%s11743_s8 + $0xb8] sm:$0xff] }
0x1494   :  { %v11460_v59 = vsub.f32 %v6823_v5, %v6847_v56  ;;  %v6858_v36 = vmul.f32 %v6852_v10, %v6852_v10 }
0x1495   :  { %8629 = vmatpush3.bf16.msra.mxu1 %v6930_v44  ;;  %v7061_v44 = vpack.c.bf16 %v7592_v38, %v7591_v24 }
0x1496   :  { %v6864_v29 = vsel %vm186_vm8, %v6858_v36, 0.0  ;;  %v6859_v39 = vmul.f32 %v11460_v59, %v11460_v59  ;;  %8670 = vmatprep.subr.bf16.mxu1 %v11777_v32 }
0x1497   :  { %v6836_v14 = vpop.xlane.xlu0 %6835  ;;  %6865 = vadd.xlane.f32.xlu1 %v6864_v29 }
0x1498   :  { %v6848_v27 = vmul.f32 0.03125, %v6836_v14  ;;  %v6867_v21 = vsel %vm186_vm8, %v6859_v39, 0.0 }
0x1499   :  { %6868 = vadd.xlane.f32.xlu0 %v6867_v21 }
0x149a   :  { %v11466_v45 = vsub.f32 %v6824_v22, %v6848_v27 }
0x149b   :  { %v6839_v50 = vpop.xlane.xlu0 %6838 }
0x149c   :  { %v6849_v9 = vmul.f32 0.03125, %v6839_v50  ;;  %v6860_v48 = vmul.f32 %v11466_v45, %v11466_v45 }
0x149e   :  { %v11470_v55 = vsub.f32 %v6825_v41, %v6849_v9  ;;  %v6870_v30 = vsel %vm186_vm8, %v6860_v48, 0.0  ;;  %v11787_v41 = vld [vmem:[#allocation13_spill] sm:$0xff] }
0x149f   :  { %6871 = vadd.xlane.f32.xlu1 %v6870_v30  ;;  %v6842_v26 = vpop.xlane.xlu1 %6841  ;;  %v11788_v2 = vsub.s32 2, %v11787_v41 }
0x14a0   :  { %v6850_v42 = vmul.f32 0.03125, %v6842_v26  ;;  %v6861_v15 = vmul.f32 %v11470_v55, %v11470_v55 }
0x14a1   :  { %v6845_v1 = vpop.xlane.xlu0 %6844  ;;  %v6909_v49 = vrot.slane %v11444_v20, %v11788_v2 }
0x14a2   :  { %v11475_v61 = vsub.f32 %v6826_v4, %v6850_v42  ;;  %v6851_v58 = vmul.f32 0.03125, %v6845_v1  ;;  %v6873_v7 = vsel %vm186_vm8, %v6861_v15, 0.0 }
0x14a3   :  { %6874 = vadd.xlane.f32.xlu0 %v6873_v7  ;;  %v7585_v7 = vld [vmem:[%s11743_s8 + $0x80] sm:$0xff] }
0x14a4   :  { %v11478_v13 = vsub.f32 %v6827_v40, %v6851_v58  ;;  %v6862_v51 = vmul.f32 %v11475_v61, %v11475_v61  ;;  %v11789_v40 = vsub.s32 3, %v11787_v41 }
0x14a6   :  { %v6876_v46 = vsel %vm186_vm8, %v6862_v51, 0.0  ;;  %v6863_v3 = vmul.f32 %v11478_v13, %v11478_v13  ;;  %v6919_v28 = vrot.slane %v11444_v20, %v11789_v40 }
0x14a7   :  { %6877 = vadd.xlane.f32.xlu1 %v6876_v46  ;;  %v7587_v46 = vld [vmem:[%s11743_s8 + $0x90] sm:$0xff] }
0x14a8   :  { %v6879_v63 = vsel %vm186_vm8, %v6863_v3, 0.0  ;;  %v7588_v3 = vld [vmem:[%s11743_s8 + $0x98] sm:$0xff] }
0x14a9   :  { %6880 = vadd.xlane.f32.xlu0 %v6879_v63  ;;  %v7059_v63 = vpack.c.bf16 %v7588_v3, %v7587_v46 }
0x1524   :  { %v6866_v8 = vpop.xlane.xlu1 %6865 }
0x1525   :  { %v6882_v5 = vmul.f32 0.03125, %v6866_v8  ;;  %v7593_v8 = vld [vmem:[%s11743_s8 + $0xc0] sm:$0xff] }
0x1526   :  { %v6869_v34 = vpop.xlane.xlu0 %6868 }
0x1527   :  { %v6888_v43 = vadd.f32 1e-12, %v6882_v5  ;;  %v6883_v57 = vmul.f32 0.03125, %v6869_v34  ;;  %v7594_v5 = vld [vmem:[%s11743_s8 + $0xc8] sm:$0xff] }
0x1528   :  { %v7062_v34 = vpack.c.bf16 %v7594_v5, %v7593_v8 }
0x1529   :  { %9217 = vrsqrt.f32 %v6888_v43  ;;  %v6889_v17 = vadd.f32 1e-12, %v6883_v57  ;;  %v7595_v43 = vld [vmem:[%s11743_s8 + $0xd0] sm:$0xff]  ;;  %v7596_v57 = vld [vmem:[%s11743_s8 + $0xd8] sm:$0xff] }
0x152b   :  { %9219 = vrsqrt.f32 %v6889_v17  ;;  %v7063_v17 = vpack.c.bf16 %v7596_v57, %v7595_v43 }
0x152c   :  { %v6872_v31 = vpop.xlane.xlu1 %6871 }
0x152d   :  { %v6884_v53 = vmul.f32 0.03125, %v6872_v31  ;;  %v7597_v31 = vld [vmem:[%s11743_s8 + $0xe0] sm:$0xff] }
0x152f   :  { %v6890_v22 = vadd.f32 1e-12, %v6884_v53  ;;  %v7598_v53 = vld [vmem:[%s11743_s8 + $0xe8] sm:$0xff] }
0x1530   :  { %v6875_v16 = vpop.xlane.xlu0 %6874 }
0x1531   :  { %9221 = vrsqrt.f32 %v6890_v22  ;;  %v6885_v35 = vmul.f32 0.03125, %v6875_v16  ;;  %v7064_v22 = vpack.c.bf16 %v7598_v53, %v7597_v31  ;;  %v7599_v16 = vld [vmem:[%s11743_s8 + $0xf0] sm:$0xff] }
0x1533   :  { %v9218_v37 = vpop.eup %9217  ;;  %v6891_v33 = vadd.f32 1e-12, %v6885_v35  ;;  %v7600_v35 = vld [vmem:[%s11743_s8 + $0xf8] sm:$0xff] }
0x1534   :  { %v6900_v54 = vmul.f32 %v9218_v37, %v6852_v10  ;;  %v6878_v0 = vpop.xlane.xlu1 %6877  ;;  %v7065_v2 = vpack.c.bf16 %v7600_v35, %v7599_v16 }
0x1535   :  { %v9220_v23 = vpop.eup %9219  ;;  %9223 = vrsqrt.f32 %v6891_v33  ;;  %v6886_v4 = vmul.f32 0.03125, %v6878_v0 }
0x1536   :  { %v6910_v6 = vmul.f32 %v6909_v49, %v6900_v54  ;;  %v6901_v60 = vmul.f32 %v9220_v23, %v11460_v59  ;;  %v6881_v25 = vpop.xlane.xlu0 %6880 }
0x1537   :  { %v6892_v11 = vadd.f32 1e-12, %v6886_v4  ;;  %v6887_v52 = vmul.f32 0.03125, %v6881_v25 }
0x1538   :  { %v6911_v47 = vmul.f32 %v6909_v49, %v6901_v60  ;;  %v11507_v56 = vadd.f32 %v6919_v28, %v6910_v6 }
0x1539   :  { %9225 = vrsqrt.f32 %v6892_v11  ;;  %v6893_v12 = vadd.f32 1e-12, %v6887_v52 }
0x153a   :  { %v11509_v10 = vadd.f32 %v6919_v28, %v6911_v47 }
0x153b   :  { %v9222_v36 = vpop.eup %9221  ;;  %9227 = vrsqrt.f32 %v6893_v12 }
0x153c   :  { %v6902_v29 = vmul.f32 %v9222_v36, %v11466_v45  ;;  %v6926_v59 = vpack.c.bf16 %v11509_v10, %v11507_v56 }
0x153e   :  { %8631 = vmatmul.mubr.msk.bf16.vlgmr.msra.gmra.mrb[232].mxu1 %vm186_vm8, %v6926_v59  ;;  %v6912_v27 = vmul.f32 %v6909_v49, %v6902_v29 }
0x153f   :  { %v9224_v39 = vpop.eup %9223  ;;  %8634 = vmatprep.mubr.msk.bf16.mxu1 %vm9311_vm0, %v11777_v32 }
0x1540   :  { %v6903_v14 = vmul.f32 %v9224_v39, %v11470_v55  ;;  %v11519_v48 = vadd.f32 %v6919_v28, %v6912_v27 }
0x1542   :  { %v6913_v21 = vmul.f32 %v6909_v49, %v6903_v14 }
0x1543   :  { %v9226_v50 = vpop.eup %9225 }
0x1544   :  { %v6904_v9 = vmul.f32 %v9226_v50, %v11475_v61  ;;  %v11521_v30 = vadd.f32 %v6919_v28, %v6913_v21 }
0x1545   :  { %v9228_v45 = vpop.eup %9227 }
0x1546   :  { %v6905_v26 = vmul.f32 %v9228_v45, %v11478_v13  ;;  %v6927_v42 = vpack.c.bf16 %v11521_v30, %v11519_v48  ;;  %v6914_v15 = vmul.f32 %v6909_v49, %v6904_v9  ;;  %v7586_v13 = vld [vmem:[%s11743_s8 + $0x88] sm:$0xff] }
0x1547   :  { %v7058_v51 = vpack.c.bf16 %v7586_v13, %v7585_v7 }
0x1548   :  { %8635 = vmatmul.mubr.msk.bf16.gmra.mrb[236].mxu1 %vm186_vm8, %v6927_v42  ;;  %v6915_v1 = vmul.f32 %v6909_v49, %v6905_v26  ;;  %v11531_v61 = vadd.f32 %v6919_v28, %v6914_v15  ;;  %v11790_v49 = vsub.s32 4, %v11787_v41 }
0x1549   :  { %8638 = vmatprep.mubr.msk.bf16.mxu1 %vm9311_vm0, %v11777_v32  ;;  %8643 = vmatpush3.bf16.msra.mxu0 %v7058_v51 }
0x154a   :  { %v11529_v55 = vadd.f32 %v6919_v28, %v6915_v1  ;;  %8644 = vmatprep.subr.bf16.mxu0 %v11777_v32  ;;  %v6934_v37 = vrot.slane %v11444_v20, %v11790_v49 }
0x154c   :  { %v6928_v58 = vpack.c.bf16 %v11529_v55, %v11531_v61 }
0x154d   :  { %8645 = vmatpush3.bf16.msra.mxu0 %v7059_v63 }
0x154e   :  { %8646 = vmatprep.subr.bf16.mxu0 %v11777_v32 }
0x1550   :  { %8639 = vmatmul.mubr.msk.bf16.gmra.mrb[240].mxu1 %vm186_vm8, %v6928_v58 }
0x1551   :  { %8674 = vmatprep.mubr.msk.bf16.mxu1 %vm9311_vm0, %v11777_v32  ;;  %8647 = vmatpush3.bf16.msra.mxu0 %v7060_v19 }
0x1552   :  { %8648 = vmatprep.subr.bf16.mxu0 %v11777_v32 }
0x1555   :  { %8649 = vmatpush3.bf16.msra.mxu0 %v7061_v44 }
0x1556   :  { %8650 = vmatprep.subr.bf16.mxu0 %v11777_v32 }
0x1559   :  { %8651 = vmatpush3.bf16.msra.mxu0 %v7062_v34 }
0x155a   :  { %8652 = vmatprep.subr.bf16.mxu0 %v11777_v32 }
0x155d   :  { %8653 = vmatpush3.bf16.msra.mxu0 %v7063_v17 }
0x155e   :  { %8654 = vmatprep.subr.bf16.mxu0 %v11777_v32 }
0x1561   :  { %8655 = vmatpush3.bf16.msra.mxu0 %v7064_v22 }
0x1562   :  { %8656 = vmatprep.subr.bf16.mxu0 %v11777_v32 }
0x1565   :  { %8657 = vmatpush3.bf16.msra.mxu0 %v7065_v2 }
0x1611   :  { %v6978_v33 = vpop.f32.mrb[232].mxu1 }
0x1612   :  { %v6979_v54 = vadd.f32 %v6978_v33, %v6934_v37  ;;  %v8632_v0 = vpop.f32.mrb[233].mxu1 }
0x1613   :  { %v6981_v23 = vpop.f32.mrb[234].mxu1 }
0x1614   :  { %v7007_v4 = vmul.f32 0.044715, %v6979_v54  ;;  %v6982_v6 = vadd.f32 %v6981_v23, %v6934_v37  ;;  %v8633_v60 = vpop.f32.mrb[235].mxu1  ;;  %v7001_v17 = vmul.f32 0.5, %v6979_v54 }
0x1616   :  { %v7013_v25 = vmul.f32 %v7007_v4, %v6979_v54  ;;  %v7008_v40 = vmul.f32 0.044715, %v6982_v6  ;;  %v7002_v31 = vmul.f32 0.5, %v6982_v6 }
0x1618   :  { %v7019_v28 = vmul.f32 %v7013_v25, %v6979_v54  ;;  %v7014_v11 = vmul.f32 %v7008_v40, %v6982_v6 }
0x161a   :  { %v7025_v52 = vadd.f32 %v7019_v28, %v6979_v54  ;;  %v7020_v47 = vmul.f32 %v7014_v11, %v6982_v6 }
0x161b   :  { %v6986_v12 = vpop.f32.mrb[236].mxu1 }
0x161c   :  { %v7031_v36 = vmul.f32 0.7978846, %v7025_v52  ;;  %v7026_v29 = vadd.f32 %v7020_v47, %v6982_v6  ;;  %v6987_v59 = vadd.f32 %v6986_v12, %v6934_v37  ;;  %v8636_v39 = vpop.f32.mrb[237].mxu1 }
0x161d   :  { %v6989_v14 = vpop.f32.mrb[238].mxu1 }
0x161e   :  { %9229 = vtanh.f32 %v7031_v36  ;;  %v7032_v27 = vmul.f32 0.7978846, %v7026_v29  ;;  %v7009_v21 = vmul.f32 0.044715, %v6987_v59  ;;  %v6990_v50 = vadd.f32 %v6989_v14, %v6934_v37  ;;  %v8637_v9 = vpop.f32.mrb[239].mxu1 }
0x161f   :  { %v7003_v54 = vmul.f32 0.5, %v6987_v59 }
0x1620   :  { %9231 = vtanh.f32 %v7032_v27  ;;  %v7015_v45 = vmul.f32 %v7009_v21, %v6987_v59  ;;  %v7010_v26 = vmul.f32 0.044715, %v6990_v50  ;;  %v7004_v6 = vmul.f32 0.5, %v6990_v50 }
0x1622   :  { %v7021_v42 = vmul.f32 %v7015_v45, %v6987_v59  ;;  %v7016_v15 = vmul.f32 %v7010_v26, %v6990_v50 }
0x1623   :  { %v6994_v1 = vpop.f32.mrb[240].mxu1 }
0x1624   :  { %v7022_v58 = vmul.f32 %v7016_v15, %v6990_v50  ;;  %v6995_v7 = vadd.f32 %v6994_v1, %v6934_v37  ;;  %v8640_v13 = vpop.f32.mrb[241].mxu1  ;;  %v7027_v51 = vadd.f32 %v7021_v42, %v6987_v59  ;;  %v11791_v59 = vsub.s32 5, %v11787_v41 }
0x1625   :  { %v6997_v46 = vpop.f32.mrb[242].mxu1 }
0x1626   :  { %v7011_v3 = vmul.f32 0.044715, %v6995_v7  ;;  %v6998_v63 = vadd.f32 %v6997_v46, %v6934_v37  ;;  %v8641_v62 = vpop.f32.mrb[243].mxu1  ;;  %v7028_v18 = vadd.f32 %v7022_v58, %v6990_v50  ;;  %v7033_v19 = vmul.f32 0.7978846, %v7027_v51 }
0x1627   :  { %v7005_v36 = vmul.f32 0.5, %v6995_v7  ;;  %v7069_v50 = vrot.slane %v11444_v20, %v11791_v59 }
0x1628   :  { %v9230_v24 = vpop.eup %9229  ;;  %v7017_v38 = vmul.f32 %v7011_v3, %v6995_v7  ;;  %v7012_v44 = vmul.f32 0.044715, %v6998_v63  ;;  %v7034_v8 = vmul.f32 0.7978846, %v7028_v18  ;;  %9233 = vtanh.f32 %v7033_v19 }
0x1629   :  { %v7043_v5 = vadd.f32 1.0, %v9230_v24  ;;  %v7006_v29 = vmul.f32 0.5, %v6998_v63 }
0x162a   :  { %v9232_v34 = vpop.eup %9231  ;;  %v7023_v43 = vmul.f32 %v7017_v38, %v6995_v7  ;;  %v7018_v57 = vmul.f32 %v7012_v44, %v6998_v63  ;;  %9235 = vtanh.f32 %v7034_v8 }
0x162b   :  { %v7044_v53 = vadd.f32 1.0, %v9232_v34  ;;  %v7049_v35 = vmul.f32 %v7043_v5, %v7001_v17 }
0x162c   :  { %v7024_v22 = vmul.f32 %v7018_v57, %v6998_v63  ;;  %v7029_v16 = vadd.f32 %v7023_v43, %v6995_v7 }
0x162d   :  { %v7050_v2 = vmul.f32 %v7044_v53, %v7002_v31 }
0x162e   :  { %v7030_v49 = vadd.f32 %v7024_v22, %v6998_v63  ;;  %v7035_v37 = vmul.f32 0.7978846, %v7029_v16 }
0x162f   :  { %v7055_v33 = vpack.c.bf16 %v7050_v2, %v7049_v35 }
0x1630   :  { %v7036_v0 = vmul.f32 0.7978846, %v7030_v49  ;;  %9237 = vtanh.f32 %v7035_v37 }
0x1631   :  { %8659 = vmatmul.mubr.bf16.vlgmr.msra.gmra.mrb[236].mxu0 %v7055_v33 }
0x1632   :  { %v9234_v23 = vpop.eup %9233  ;;  %8662 = vmatprep.mubr.msk.bf16.mxu0 %vm9311_vm0, %v11777_v32  ;;  %9239 = vtanh.f32 %v7036_v0 }
0x1633   :  { %v7045_v4 = vadd.f32 1.0, %v9234_v23 }
0x1634   :  { %v9236_v60 = vpop.eup %9235 }
0x1635   :  { %v7046_v25 = vadd.f32 1.0, %v9236_v60  ;;  %v7051_v40 = vmul.f32 %v7045_v4, %v7003_v54 }
0x1637   :  { %v7052_v28 = vmul.f32 %v7046_v25, %v7004_v6 }
0x1639   :  { %v7056_v11 = vpack.c.bf16 %v7052_v28, %v7051_v40 }
0x163a   :  { %v9238_v52 = vpop.eup %9237 }
0x163b   :  { %8663 = vmatmul.mubr.bf16.gmra.mrb[240].mxu0 %v7056_v11  ;;  %v7047_v47 = vadd.f32 1.0, %v9238_v52 }
0x163c   :  { %v9240_v12 = vpop.eup %9239  ;;  %8666 = vmatprep.mubr.msk.bf16.mxu0 %vm9311_vm0, %v11777_v32 }
0x163d   :  { %v7048_v39 = vadd.f32 1.0, %v9240_v12  ;;  %v7053_v14 = vmul.f32 %v7047_v47, %v7005_v36 }
0x163f   :  { %v7054_v27 = vmul.f32 %v7048_v39, %v7006_v29 }
0x1641   :  { %v7057_v21 = vpack.c.bf16 %v7054_v27, %v7053_v14 }
0x1643   :  { %8667 = vmatmul.mubr.bf16.gmra.mrb[244].mxu0 %v7057_v21 }
0x1704   :  { %v7104_v9 = vpop.f32.mrb[236].mxu0 }
0x1705   :  { %v7105_v45 = vadd.f32 %v7104_v9, %v7069_v50  ;;  %v8660_v26 = vpop.f32.mrb[237].mxu0  ;;  %v7232_v9 = vld [vmem:[%s11745_s10 + $0x8] sm:$0xff] }
0x1706   :  { %v7107_v42 = vpop.f32.mrb[238].mxu0  ;;  %v7233_v26 = vld [vmem:[%s11745_s10 + $0x10] sm:$0xff] }
0x1707   :  { %v7127_v15 = vadd.f32 %v7105_v45, %v11507_v56  ;;  %v7108_v1 = vadd.f32 %v7107_v42, %v7069_v50  ;;  %v8661_v58 = vpop.f32.mrb[239].mxu0  ;;  %v7234_v42 = vld [vmem:[%s11745_s10 + $0x18] sm:$0xff] }
0x1709   :  { %v7128_v7 = vadd.f32 %v7108_v1, %v11509_v10  ;;  %v7133_v13 = vsel %vm186_vm8, %v7127_v15, 0.0 }
0x170a   :  { %7134 = vadd.xlane.f32.xlu1 %v7133_v13 }
0x170b   :  { %v7136_v51 = vsel %vm186_vm8, %v7128_v7, 0.0 }
0x170e   :  { %7137 = vadd.xlane.f32.xlu1 %v7136_v51  ;;  %v7112_v46 = vpop.f32.mrb[240].mxu0 }
0x170f   :  { %v7113_v3 = vadd.f32 %v7112_v46, %v7069_v50  ;;  %v8664_v63 = vpop.f32.mrb[241].mxu0 }
0x1710   :  { %v7115_v62 = vpop.f32.mrb[242].mxu0 }
0x1711   :  { %v7129_v18 = vadd.f32 %v7113_v3, %v11519_v48  ;;  %v7116_v19 = vadd.f32 %v7115_v62, %v7069_v50  ;;  %v8665_v24 = vpop.f32.mrb[243].mxu0 }
0x1713   :  { %v7130_v56 = vadd.f32 %v7116_v19, %v11521_v30  ;;  %v7139_v38 = vsel %vm186_vm8, %v7129_v18, 0.0 }
0x1714   :  { %7140 = vadd.xlane.f32.xlu0 %v7139_v38 }
0x1715   :  { %v7142_v5 = vsel %vm186_vm8, %v7130_v56, 0.0 }
0x1716   :  { %v7120_v10 = vpop.f32.mrb[244].mxu0 }
0x1717   :  { %v7121_v44 = vadd.f32 %v7120_v10, %v7069_v50  ;;  %v8668_v8 = vpop.f32.mrb[245].mxu0 }
0x1718   :  { %7143 = vadd.xlane.f32.xlu0 %v7142_v5  ;;  %v7123_v34 = vpop.f32.mrb[246].mxu0  ;;  %v11792_v5 = vsub.s32 6, %v11787_v41 }
0x1719   :  { %v7131_v43 = vadd.f32 %v7121_v44, %v11531_v61  ;;  %v7124_v57 = vadd.f32 %v7123_v34, %v7069_v50  ;;  %v8669_v17 = vpop.f32.mrb[247].mxu0  ;;  %v7231_v50 = vld [vmem:[%s11745_s10] sm:$0xff] }
0x171a   :  { %v7241_v45 = vpack.c.bf16 %v7232_v9, %v7231_v50  ;;  %v7214_v34 = vrot.slane %v11444_v20, %v11792_v5 }
0x171b   :  { %v7132_v48 = vadd.f32 %v7124_v57, %v11529_v55  ;;  %v7145_v31 = vsel %vm186_vm8, %v7131_v43, 0.0 }
0x171c   :  { %7146 = vadd.xlane.f32.xlu1 %v7145_v31  ;;  %8671 = vmatpush3.bf16.msra.mxu1 %v7241_v45 }
0x171d   :  { %v7148_v30 = vsel %vm186_vm8, %v7132_v48, 0.0  ;;  %8672 = vmatprep.subr.bf16.mxu1 %v11777_v32 }
0x171e   :  { %7149 = vadd.xlane.f32.xlu0 %v7148_v30 }
0x1797   :  { %v7135_v53 = vpop.xlane.xlu1 %7134 }
0x1798   :  { %v7151_v22 = vmul.f32 0.03125, %v7135_v53  ;;  %v11793_v53 = vsub.s32 7, %v11787_v41 }
0x179a   :  { %v11615_v16 = vsub.f32 %v7127_v15, %v7151_v22  ;;  %v7242_v15 = vpack.c.bf16 %v7234_v42, %v7233_v26  ;;  %v7224_v22 = vrot.slane %v11444_v20, %v11793_v53 }
0x179b   :  { %v7138_v35 = vpop.xlane.xlu1 %7137 }
0x179c   :  { %v7152_v2 = vmul.f32 0.03125, %v7138_v35  ;;  %v7163_v49 = vmul.f32 %v11615_v16, %v11615_v16  ;;  %8673 = vmatpush3.bf16.msra.mxu1 %v7242_v15 }
0x179d   :  { %8678 = vmatprep.subr.bf16.mxu1 %v11777_v32 }
0x179e   :  { %v7158_v61 = vsub.f32 %v7128_v7, %v7152_v2  ;;  %v7169_v37 = vsel %vm186_vm8, %v7163_v49, 0.0 }
0x179f   :  { %7170 = vadd.xlane.f32.xlu1 %v7169_v37 }
0x17a0   :  { %v7164_v55 = vmul.f32 %v7158_v61, %v7158_v61 }
0x17a1   :  { %v7141_v33 = vpop.xlane.xlu0 %7140 }
0x17a2   :  { %v7153_v0 = vmul.f32 0.03125, %v7141_v33  ;;  %v7172_v23 = vsel %vm186_vm8, %v7164_v55, 0.0 }
0x17a3   :  { %7173 = vadd.xlane.f32.xlu1 %v7172_v23 }
0x17a4   :  { %v11621_v4 = vsub.f32 %v7129_v18, %v7153_v0 }
0x17a5   :  { %v7144_v60 = vpop.xlane.xlu0 %7143 }
0x17a6   :  { %v7154_v54 = vmul.f32 0.03125, %v7144_v60  ;;  %v7165_v6 = vmul.f32 %v11621_v4, %v11621_v4 }
0x17a8   :  { %v11625_v25 = vsub.f32 %v7130_v56, %v7154_v54  ;;  %v7175_v40 = vsel %vm186_vm8, %v7165_v6, 0.0 }
0x17a9   :  { %v7147_v28 = vpop.xlane.xlu1 %7146  ;;  %7176 = vadd.xlane.f32.xlu0 %v7175_v40 }
0x17aa   :  { %v7155_v11 = vmul.f32 0.03125, %v7147_v28  ;;  %v7166_v52 = vmul.f32 %v11625_v25, %v11625_v25 }
0x17ab   :  { %v7150_v47 = vpop.xlane.xlu0 %7149 }
0x17ac   :  { %v11630_v12 = vsub.f32 %v7131_v43, %v7155_v11  ;;  %v7156_v36 = vmul.f32 0.03125, %v7150_v47  ;;  %v7178_v29 = vsel %vm186_vm8, %v7166_v52, 0.0 }
0x17ad   :  { %7179 = vadd.xlane.f32.xlu0 %v7178_v29 }
0x17ae   :  { %v11633_v39 = vsub.f32 %v7132_v48, %v7156_v36  ;;  %v7167_v14 = vmul.f32 %v11630_v12, %v11630_v12 }
0x17b0   :  { %v7181_v27 = vsel %vm186_vm8, %v7167_v14, 0.0  ;;  %v7168_v21 = vmul.f32 %v11633_v39, %v11633_v39 }
0x17b1   :  { %7182 = vadd.xlane.f32.xlu1 %v7181_v27 }
0x17b2   :  { %v7184_v59 = vsel %vm186_vm8, %v7168_v21, 0.0 }
0x17b3   :  { %7185 = vadd.xlane.f32.xlu0 %v7184_v59 }
0x182c   :  { %v7171_v1 = vpop.xlane.xlu1 %7170 }
0x182d   :  { %v7187_v58 = vmul.f32 0.03125, %v7171_v1 }
0x182f   :  { %v7193_v46 = vadd.f32 1e-12, %v7187_v58 }
0x1830   :  { %v7174_v7 = vpop.xlane.xlu1 %7173 }
0x1831   :  { %v7188_v13 = vmul.f32 0.03125, %v7174_v7 }
0x1833   :  { %v7194_v51 = vadd.f32 1e-12, %v7188_v13 }
0x1835   :  { %9241 = vrsqrt.f32 %v7194_v51 }
0x1836   :  { %v7177_v3 = vpop.xlane.xlu0 %7176  ;;  %9243 = vrsqrt.f32 %v7193_v46 }
0x1837   :  { %v7189_v63 = vmul.f32 0.03125, %v7177_v3  ;;  %v7660_v3 = vld [vmem:[%s11745_s10 + $0x20] sm:$0xff] }
0x1839   :  { %v7195_v62 = vadd.f32 1e-12, %v7189_v63  ;;  %v7661_v63 = vld [vmem:[%s11745_s10 + $0x28] sm:$0xff] }
0x183a   :  { %v7180_v18 = vpop.xlane.xlu0 %7179 }
0x183b   :  { %9245 = vrsqrt.f32 %v7195_v62  ;;  %v7190_v19 = vmul.f32 0.03125, %v7180_v18  ;;  %v7662_v62 = vld [vmem:[%s11745_s10 + $0x30] sm:$0xff]  ;;  %v7329_v18 = vpack.c.bf16 %v7661_v63, %v7660_v3 }
0x183d   :  { %v7196_v24 = vadd.f32 1e-12, %v7190_v19  ;;  %v7663_v19 = vld [vmem:[%s11745_s10 + $0x38] sm:$0xff] }
0x183e   :  { %v7183_v56 = vpop.xlane.xlu1 %7182 }
0x183f   :  { %v9242_v38 = vpop.eup %9241  ;;  %9247 = vrsqrt.f32 %v7196_v24  ;;  %v7191_v10 = vmul.f32 0.03125, %v7183_v56  ;;  %v7330_v24 = vpack.c.bf16 %v7663_v19, %v7662_v62  ;;  %v7658_v56 = vld [vmem:[%s11746_s11] ss:$0 sm:$0xff] }
0x1840   :  { %v7206_v44 = vmul.f32 %v9242_v38, %v7158_v61  ;;  %v7186_v8 = vpop.xlane.xlu0 %7185  ;;  %v9244_v17 = vpop.eup %9243 }
0x1841   :  { %v7197_v43 = vadd.f32 1e-12, %v7191_v10  ;;  %v7192_v57 = vmul.f32 0.03125, %v7186_v8  ;;  %v7205_v35 = vmul.f32 %v9244_v17, %v11615_v16 }
0x1842   :  { %v7216_v48 = vmul.f32 %v7214_v34, %v7206_v44 }
0x1843   :  { %9249 = vrsqrt.f32 %v7197_v43  ;;  %v7198_v31 = vadd.f32 1e-12, %v7192_v57  ;;  %v7215_v55 = vmul.f32 %v7214_v34, %v7205_v35 }
0x1844   :  { %v7226_v49 = vadd.f32 %v7224_v22, %v7216_v48 }
0x1845   :  { %v9246_v30 = vpop.eup %9245  ;;  %9251 = vrsqrt.f32 %v7198_v31  ;;  %v7225_v40 = vadd.f32 %v7224_v22, %v7215_v55 }
0x1846   :  { %v7207_v2 = vmul.f32 %v9246_v30, %v11621_v4  ;;  %v7236_v23 = vpack.c.bf16 %v7226_v49, %v7226_v49  ;;  %v7382_v49 = vstv %s11747_s12  ;;  %s9320_s12 = smov 1  }
0x1847   :  { %v7235_v36 = vpack.c.bf16 %v7225_v40, %v7225_v40 }
0x1848   :  { %v7217_v61 = vmul.f32 %v7214_v34, %v7207_v2  ;;  %v7257_v16 = vunpack.c.l.b16 %v7236_v23 }
0x1849   :  { %v9248_v37 = vpop.eup %9247  ;;  %v7256_v9 = vunpack.c.l.b16 %v7235_v36  ;;  %v11794_v36 = vld [vmem:[#allocation12_spill] sm:$0xff] }
0x184a   :  { %v7227_v33 = vadd.f32 %v7224_v22, %v7217_v61  ;;  %v7208_v0 = vmul.f32 %v9248_v37, %v11625_v25  ;;  %v7262_v25 = vrot.slane %v7257_v16, 7 }
0x184c   :  { %v7237_v60 = vpack.c.bf16 %v7227_v33, %v7227_v33  ;;  %v7218_v54 = vmul.f32 %v7214_v34, %v7208_v0  ;;  %v7264_v42 = vsel %vm7263_vm13, %v7262_v25, %v7256_v9 }
0x184d   :  { %v9250_v6 = vpop.eup %9249 }
0x184e   :  { %v7228_v41 = vadd.f32 %v7224_v22, %v7218_v54  ;;  %v7209_v20 = vmul.f32 %v9250_v6, %v11630_v12  ;;  %v7258_v11 = vunpack.c.l.b16 %v7237_v60  ;;  %v7408_v60 = vld [vmem:[%s11736_s1] sm:$0x3]  ;;  %s9321_s1 = smov [#allocation3]  }
0x184f   :  { %v9252_v28 = vpop.eup %9251  ;;  %s7473_s26 = sshll.u32 %s9321_s1, 4  ;;  %s7474_s26 = int_to_ptr.vmem [resolvable:$true] %s7473_s26 }
0x1850   :  { %v7238_v52 = vpack.c.bf16 %v7228_v41, %v7228_v41  ;;  %v7219_v4 = vmul.f32 %v7214_v34, %v7209_v20  ;;  %v7210_v47 = vmul.f32 %v9252_v28, %v11633_v39  ;;  %v7265_v21 = vrot.slane %v7258_v11, 6  ;;  %s9261_s27 = scalar_lea.vmem %s7474_s26, 32  ;;  %p9266_p1 = scmp.lt.s32.totalorder %s7474_s26, %s7474_s26 }
0x1851   :  { %p9262_p0 = scmp.ne.s32.totalorder %s7474_s26, %s9261_s27  ;;  %p9267_p2 = scmp.lt.s32.totalorder %s9261_s27, %s9261_s27 }
0x1852   :  { %v7259_v29 = vunpack.c.l.b16 %v7238_v52  ;;  %v7229_v14 = vadd.f32 %v7224_v22, %v7219_v4  ;;  %v7220_v27 = vmul.f32 %v7214_v34, %v7210_v47  ;;  %v7267_v15 = vsel %vm7266_vm14, %v7265_v21, %v7264_v42 }
0x1853   :  { %p9268_p3 = por %p9267_p2, %p9266_p1 }
0x1854   :  { %v7239_v59 = vpack.c.bf16 %v7229_v14, %v7229_v14  ;;  %v7230_v50 = vadd.f32 %v7224_v22, %v7220_v27  ;;  %v7268_v45 = vrot.slane %v7259_v29, 5 }
0x1855   :  { %p9269_p4 = pnand %p9268_p3, %p9262_p0 }
0x1856   :  { %v7260_v12 = vunpack.c.l.b16 %v7239_v59  ;;  %v7240_v26 = vpack.c.bf16 %v7230_v50, %v7230_v50  ;;  %v7270_v58 = vsel %vm7269_vm15, %v7268_v45, %v7267_v15  ;;  %v11795_v50 = vmov 0  }
0x1858   :  { %v7271_v1 = vrot.slane %v7260_v12, 4  ;;  %v7261_v39 = vunpack.c.l.b16 %v7240_v26 }
0x185a   :  { %v7274_v7 = vrot.slane %v7261_v39, 3  ;;  %v7273_v13 = vsel %vm7272_vm1, %v7271_v1, %v7270_v58 }
0x185c   :  { %v7276_v51 = vsel %vm7275_vm2, %v7274_v7, %v7273_v13 }
0x185d   :  { %v7277_v46 = vpack.c.b16 %v7276_v51, %v7276_v51 }
0x185f   :  { %8675 = vmatmul.mubr.msk.bf16.vlgmr.msra.gmra.mrb[244].mxu1 %vm186_vm8, %v7277_v46 }
0x1860   :  { %8682 = vmatprep.mubr.msk.bf16.mxu1 %vm9311_vm0, %v11777_v32  ;;  %8679 = vmatpush3.bf16.msra.mxu1 %v7329_v18  ;;  %vm7378_vm0 = vcmask 254976  }
0x1861   :  { %8680 = vmatprep.subr.bf16.mxu1 %v11777_v32 }
0x1864   :  { %8681 = vmatpush3.bf16.msra.mxu1 %v7330_v24 }
0x1932   :  { %v7315_v38 = vpop.f32.mrb[244].mxu1 }
0x1933   :  { %v7316_v10 = vadd.f32 %v7658_v56, %v7315_v38  ;;  %v8676_v44 = vpop.f32.mrb[245].mxu1 }
0x1934   :  { %v7318_v8 = vpop.f32.mrb[246].mxu1 }
0x1935   :  { %9253 = vtanh.f32 %v7316_v10  ;;  %v8677_v5 = vpop.f32.mrb[247].mxu1 }
0x193f   :  { %v9254_v34 = vpop.eup %9253 }
0x1940   :  { %v7328_v43 = vpack.c.bf16 %v9254_v34, %v9254_v34  ;;  %v7375_v57 = vrot.slane %v9254_v34, 2  ;;  %v7384_v17 = vrot.slane %v9254_v34, 4 }
0x1942   :  { %8683 = vmatmul.mubr.msk.bf16.vlgmr.msra.gmra.mrb[248].mxu1 %vm186_vm8, %v7328_v43  ;;  %vm7444_vm8 = vcmask 9224  }
0x1a15   :  { %v7368_v48 = vpop.f32.mrb[248].mxu1 }
0x1a16   :  { %v7377_v32 = vmul.f32 %v7375_v57, %v7368_v48  ;;  %v7386_v31 = vmul.f32 %v7384_v17, %v7368_v48  ;;  %v8684_v30 = vpop.f32.mrb[249].mxu1 }
0x1a17   :  { %v7371_v53 = vpop.f32.mrb[250].mxu1 }
0x1a18   :  { %v8685_v22 = vpop.f32.mrb[251].mxu1  ;;  %v7387_v35 = vsel %vm7378_vm0, %v7386_v31, 0.0  ;;  %v7379_v2 = vsel %vm7378_vm0, %v7377_v32, 0.0 }
0x1a19   :  { %7388 = vadd.xlane.f32.xlu0 %v7387_v35  ;;  %7380 = vadd.xlane.f32.xlu1 %v7379_v2 }
0x1aa6   :  { %v7389_v61 = vpop.xlane.xlu0 %7388  ;;  %v7381_v37 = vpop.xlane.xlu1 %7380 }
0x1aa7   :  { %v7390_v55 = vadd.f32 %v7389_v61, %v7382_v49  ;;  %v7383_v33 = vadd.f32 %v7382_v49, %v7381_v37 }
0x1aa9   :  { %v7392_v0 = vsel %vm7391_vm3, %v7383_v33, %v7390_v55 }
0x1aaa   :  { %v7395_v23 = vsel %vm7393_vm4, %v7392_v0, -inf  ;;  %7394 = vst.msk [vmem:[#allocation3] sm:$0x3] %vm7393_vm4, %v7392_v0 }
0x1aab   :  { %7396 = vmax.xlane.f32.xlu1 %v7395_v23 }
0x1abc   :  { %7410 = vperm.xlu1 %8706, %v7408_v60  }
0x1ac0   :  { %7440 = vrot.lane.b32.xlu1 %v7408_v60, %s9320_s12 }
0x1b38   :  { %v7397_v54 = vpop.xlane.xlu1 %7396 }
0x1b39   :  { %v7398_v6 = vsub.f32 %v7392_v0, %v7397_v54 }
0x1b3b   :  { %v7399_v40 = vmul.f32 1.442695, %v7398_v6 }
0x1b3c   :  { %v7411_v52 = vpop.permute.xlu1 %7410 }
0x1b3d   :  { %9255 = vpow2.f32 %v7399_v40  ;;  %vm7412_vm5 = vcmp.eq.s32.totalorder %v11794_v36, %v7411_v52 }
0x1b40   :  { %v7441_v59 = vpop.permute.xlu1 %7440 }
0x1b47   :  { %v9256_v41 = vpop.eup %9255 }
0x1b48   :  { %v7401_v20 = vsel %vm7393_vm4, %v9256_v41, 0.0 }
0x1b49   :  { %7402 = vadd.xlane.f32.xlu0 %v7401_v20 }
0x1bd6   :  { %v7403_v28 = vpop.xlane.xlu0 %7402 }
0x1bd7   :  { %9257 = vlog2.f32 %v7403_v28 }
0x1be1   :  { %v9258_v16 = vpop.eup %9257 }
0x1be2   :  { %v7405_v11 = vmul.f32 0.6931472, %v9258_v16 }
0x1be4   :  { %v7406_v4 = vadd.f32 %v7405_v11, %v7397_v54 }
0x1be6   :  { %v7407_v47 = vsub.f32 %v7392_v0, %v7406_v4 }
0x1be8   :  { %v7413_v29 = vsel %vm7412_vm5, %v7407_v47, 0.0 }
0x1be9   :  { %v7414_v14 = vsel %vm7393_vm4, %v7413_v29, 0.0 }
0x1bea   :  { %7415 = vadd.xlane.f32.xlu0 %v7414_v14 }
0x1c00   :  { %7435 = vrot.lane.b32.xlu0 %v7392_v0, %s9320_s12 }
0x1c77   :  { %v7416_v27 = vpop.xlane.xlu0 %7415 }
0x1c78   :  { %v7418_v25 = vsel %vm7417_vm6, %v7416_v27, 0.0 }
0x1c79   :  { %7419 = vadd.xlane.f32.xlu0 %v7418_v25 }
0x1c7b   :  { %v7436_v21 = vpop.permute.xlu0 %7435 }
0x1c7c   :  { %vm7438_vm7 = vcmp.gt.f32.partialorder %v7392_v0, %v7436_v21 }
0x1c7d   :  { %v7439_v9 = vsel %vm7438_vm7, 1, %v11795_v50 }
0x1c7e   :  { %vm7442_vm9 = vcmp.eq.s32.totalorder %v7439_v9, %v7441_v59 }
0x1c7f   :  { %v7443_v45 = vsel %vm7442_vm9, 1, %v11795_v50 }
0x1c80   :  { %v7445_v12 = vsel %vm7444_vm8, %v7443_v45, 0 }
0x1c81   :  { %v7447_v26 = vshrl.u32 %v7445_v12, 16  ;;  %v7446_v42 = vand.u32 65535, %v7445_v12 }
0x1c83   :  { %v7449_v15 = vcvt.s32.f32 %v7447_v26  ;;  %v7448_v1 = vcvt.s32.f32 %v7446_v42 }
0x1c85   :  { %7452 = vadd.xlane.f32.xlu1 %v7449_v15 }
0x1c89   :  { %7450 = vadd.xlane.f32.xlu1 %v7448_v1 }
0x1c8a   :  { %9272 = shalt.err (!%p9269_p4)
}
0x1c8b   :  { %s9273_s8 = scalar_lea.hbm %s11748_s13, 32 }
0x1c8c   :  { %p9274_p5 = scmp.ne.s32.totalorder %s11748_s13, %s9273_s8  ;;  %p9277_p6 = scmp.lt.u32.totalorder %s9273_s8, %s11748_s13 }
0x1c8e   :  { %p9279_p7 = pnand %p9277_p6, %p9274_p5 }
0x1c90   :  { %9282 = shalt.err (!%p9279_p7)
}
0x1c91   :  { %7476 = dma.vmem_to_hbm [thread:$0]  %s7474_s26, 32, %s11748_s13, [#allocation4]  }
0x1c92   :  { %s9283_s24 = scalar_lea.hbm %s11749_s14, 16 }
0x1c93   :  { %p9284_p8 = scmp.ne.s32.totalorder %s11749_s14, %s9283_s24  ;;  %p9287_p9 = scmp.lt.u32.totalorder %s9283_s24, %s11749_s14 }
0x1c95   :  { %p9289_p10 = pnand %p9287_p9, %p9284_p8 }
0x1d06   :  { %v7420_v39 = vpop.xlane.xlu0 %7419 }
0x1d07   :  { %v7421_v58 = vrot.slane %v7420_v39, 4 }
0x1d09   :  { %v7422_v7 = vadd.f32 %v7421_v58, %v7420_v39 }
0x1d0b   :  { %v7423_v13 = vrot.slane %v7422_v7, 2 }
0x1d0d   :  { %v7424_v51 = vadd.f32 %v7423_v13, %v7422_v7 }
0x1d0f   :  { %v7425_v46 = vrot.slane %v7424_v51, 1 }
0x1d11   :  { %v7426_v3 = vadd.f32 %v7425_v46, %v7424_v51 }
0x1d12   :  { %v7453_v63 = vpop.xlane.xlu1 %7452 }
0x1d13   :  { %v7455_v62 = vcvt.f32.s32 %v7453_v63  ;;  %8686 = vpush %v7426_v3 }
0x1d15   :  { %v7456_v19 = vshll.u32 %v7455_v62, 16 }
0x1d16   :  { %v7451_v18 = vpop.xlane.xlu1 %7450 }
0x1d17   :  { %v7454_v24 = vcvt.f32.s32 %v7451_v18 }
0x1d19   :  { %v7457_v56 = vadd.s32 %v7456_v19, %v7454_v24 }
0x1d1b   :  { %v7458_v38 = vrot.slane %v7457_v56, 4 }
0x1d1d   :  { %v7459_v10 = vadd.s32 %v7458_v38, %v7457_v56 }
0x1d1f   :  { %v7460_v44 = vrot.slane %v7459_v10, 2 }
0x1d21   :  { %v7461_v8 = vadd.s32 %v7460_v44, %v7459_v10 }
0x1d23   :  { %v7462_v5 = vrot.slane %v7461_v8, 1 }
0x1d25   :  { %v7463_v34 = vadd.s32 %v7462_v5, %v7461_v8 }
0x1d27   :  { %8688 = vpush %v7463_v34 }
0x1d44   :  { %s8687_s13 = spop %8686 }
0x1d45   :  { %s7430_s9 = smul.f32 0.5, %s8687_s13 }
0x1d47   :  { %s7431_s2 = ssub.f32 0.0, %s7430_s9 }
0x1d49   :  { %7433 = sst [smem:[#allocation6]] %s7431_s2 }
0x1d4a   :  { %9292 = shalt.err (!%p9289_p10)
}
0x1d4b   :  { %s9322_s16 = smov [#allocation6]   ;;  %s9293_s12 = scalar_lea.hbm %s11750_s15, 16 }
0x1d4c   :  { %7484 = dma.smem_to_hbm %s9322_s16, 16, %s11749_s14, [#allocation5]  }
0x1d4d   :  { %p9294_p11 = scmp.ne.s32.totalorder %s11750_s15, %s9293_s12  ;;  %p9297_p12 = scmp.lt.u32.totalorder %s9293_s12, %s11750_s15 }
0x1d4f   :  { %p9299_p13 = pnand %p9297_p12, %p9294_p11 }
0x1d58   :  { %s8689_s11 = spop %8688 }
0x1d59   :  { %7466 = sst [smem:[#allocation7]] %s8689_s11 }
0x1d5a   :  { %9302 = shalt.err (!%p9299_p13)
}
0x1d5b   :  { %s9323_s29 = smov [#allocation7]  }
0x1d5c   :  { %7492 = dma.smem_to_hbm %s9323_s29, 16, %s11750_s15, [#allocation8]  }
0x1d5d   :  { %9303 = dma.done.wait [#allocation4], 32  }
0x1d5e   :  { %9304 = vsyncadd [#allocation4], 4294967264 }
0x1d5f   :  { %9305 = dma.done.wait [#allocation5], 16  }
0x1d60   :  { %9306 = vsyncadd [#allocation5], 4294967280 }
0x1d61   :  { %9307 = dma.done.wait [#allocation8], 16  }
0x1d62   :  { %9308 = vsyncadd [#allocation8], 4294967280 }
0x1d63   :  { %7502 = sfence }
0x1d64   :  { %7503 = vsyncpa [#allocation4], 1 }
0x1d65   :  { %7504 = vsyncpa [#allocation5], 1 }
0x1d66   :  { %7505 = vsyncpa [#allocation8], 1 }

</bundles_post_ra>
